<compile_context>
chip_gen: v7x
topology: tpu7x:2x2x1
jax: 0.10.0
libtpu: 0.0.40
codegen_flags: <defaults>
</compile_context>

<pallas_src>
import functools

import jax
import jax.numpy as jnp
from jax.experimental import pallas as pl
from jax.experimental.pallas import tpu as pltpu

_VMEM_LIMIT = 32 * 1024 * 1024


# ---------------------------------------------------------------------------
# In-kernel helpers
# ---------------------------------------------------------------------------
def _bn_relu(x_ref, scale_ref, bias_ref):
    # x_ref: (1, H, W, C) block; scale/bias: (1, C), broadcast over H, W.
    return jnp.maximum(x_ref[0] * scale_ref[...] + bias_ref[...], 0.0)


def _conv3x3_core(a, w_ref, pad_ref, col_ref, stride):
    """3x3 'same' conv of one image, stride handled in-kernel.

    a:       (H, W, C) f32 activation (already BN+ReLU'ed)
    w_ref:   (9*C, Cout) weight matrix, rows ordered (dy, dx, c)
    pad_ref: VMEM scratch (H+2, W+2, C)   zero-halo buffer
    col_ref: VMEM scratch (Ho, Wo, 9*C)   im2col staging
    Returns (out, center): out = (Ho*Wo, Cout) f32 conv result,
    center = (Ho, Wo, C) strided centre tap (== input of a 1x1 strided conv).
    """
    h, w, c = a.shape
    ho, wo, _ = col_ref.shape

    # Build the 1-pixel zero halo in VMEM (replaces wrapper-side jnp.pad).
    pad_ref[...] = jnp.zeros_like(pad_ref)
    pad_ref[1:h + 1, 1:w + 1, :] = a

    # im2col: stack the 9 (strided) taps along the lane axis -> one K=9*C dot.
    center = None
    for dy in range(3):
        for dx in range(3):
            if stride == 1:
                tap = pad_ref[dy:dy + ho, dx:dx + wo, :]
            else:
                tap = pad_ref[pl.ds(dy, ho, stride), pl.ds(dx, wo, stride), :]
            k = dy * 3 + dx
            col_ref[:, :, k * c:(k + 1) * c] = tap
            if dy == 1 and dx == 1:
                center = tap

    patches = col_ref[...].reshape(ho * wo, 9 * c)
    out = jnp.dot(patches, w_ref[...], preferred_element_type=jnp.float32)
    return out, center


# ---------------------------------------------------------------------------
# Fused kernels
# ---------------------------------------------------------------------------
def _bn_conv1_kernel(x_ref, s_ref, b_ref, w_ref, out_ref, pad_ref, col_ref,
                     *, stride):
    """relu(bn1(x)) -> conv1 (3x3, stride); identity shortcut handled outside."""
    a = _bn_relu(x_ref, s_ref, b_ref)
    out, _ = _conv3x3_core(a, w_ref, pad_ref, col_ref, stride)
    _, ho, wo, cout = out_ref.shape
    out_ref[...] = out.reshape(1, ho, wo, cout).astype(out_ref.dtype)


def _bn_conv1_shortcut_kernel(x_ref, s_ref, b_ref, w_ref, ws_ref,
                              out_ref, short_ref, pad_ref, col_ref, *, stride):
    """relu(bn1(x)) -> conv1 (3x3, stride) plus fused 1x1 strided shortcut."""
    a = _bn_relu(x_ref, s_ref, b_ref)
    out, center = _conv3x3_core(a, w_ref, pad_ref, col_ref, stride)
    _, ho, wo, cout = out_ref.shape
    out_ref[...] = out.reshape(1, ho, wo, cout).astype(out_ref.dtype)
    # convShortcut(relu(bn1(x))) at stride s samples exactly the centre tap.
    cin = ws_ref.shape[0]
    sc = jnp.dot(center.reshape(ho * wo, cin), ws_ref[...],
                 preferred_element_type=jnp.float32)
    short_ref[...] = sc.reshape(1, ho, wo, cout).astype(short_ref.dtype)


def _bn_conv2_add_kernel(y_ref, s_ref, b_ref, w_ref, sc_ref, out_ref,
                         pad_ref, col_ref):
    """relu(bn2(y)) -> conv2 (3x3, stride 1) -> + shortcut (residual add)."""
    a = _bn_relu(y_ref, s_ref, b_ref)
    out, _ = _conv3x3_core(a, w_ref, pad_ref, col_ref, stride=1)
    _, ho, wo, cout = out_ref.shape
    res = out.reshape(1, ho, wo, cout) + sc_ref[...].astype(jnp.float32)
    out_ref[...] = res.astype(out_ref.dtype)


# ---------------------------------------------------------------------------
# Pallas wrappers
# ---------------------------------------------------------------------------
def _fold_bn(gamma, beta, mean, var, eps=1e-5):
    scale = gamma / jnp.sqrt(var + eps)
    bias = beta - mean * scale
    c = gamma.shape[0]
    return scale.reshape(1, c), bias.reshape(1, c)


def _bn_relu_conv1(x_nhwc, scale, bias, w_hwio, ws_io, stride):
    n, h, w, cin = x_nhwc.shape
    cout = w_hwio.shape[-1]
    ho = (h - 1) // stride + 1
    wo = (w - 1) // stride + 1
    wmat = w_hwio.reshape(9 * cin, cout)
    has_sc = ws_io is not None

    in_specs = [
        pl.BlockSpec((1, h, w, cin), lambda b: (b, 0, 0, 0)),
        pl.BlockSpec((1, cin), lambda b: (0, 0)),
        pl.BlockSpec((1, cin), lambda b: (0, 0)),
        pl.BlockSpec((9 * cin, cout), lambda b: (0, 0)),
    ]
    inputs = [x_nhwc, scale, bias, wmat]
    out_spec = pl.BlockSpec((1, ho, wo, cout), lambda b: (b, 0, 0, 0))
    out_sds = jax.ShapeDtypeStruct((n, ho, wo, cout), x_nhwc.dtype)

    if has_sc:
        kernel = functools.partial(_bn_conv1_shortcut_kernel, stride=stride)
        in_specs.append(pl.BlockSpec((cin, cout), lambda b: (0, 0)))
        inputs.append(ws_io)
        out_specs = (out_spec, out_spec)
        out_shape = (out_sds, out_sds)
    else:
        kernel = functools.partial(_bn_conv1_kernel, stride=stride)
        out_specs = out_spec
        out_shape = out_sds

    flops = 2 * n * ho * wo * 9 * cin * cout
    bytes_accessed = 4 * (x_nhwc.size + n * ho * wo * cout + wmat.size)
    if has_sc:
        flops += 2 * n * ho * wo * cin * cout
        bytes_accessed += 4 * (n * ho * wo * cout + ws_io.size)

    return pl.pallas_call(
        kernel,
        grid=(n,),
        in_specs=in_specs,
        out_specs=out_specs,
        out_shape=out_shape,
        scratch_shapes=[
            pltpu.VMEM((h + 2, w + 2, cin), jnp.float32),   # halo buffer
            pltpu.VMEM((ho, wo, 9 * cin), jnp.float32),     # im2col staging
        ],
        compiler_params=pltpu.CompilerParams(
            dimension_semantics=("parallel",),
            vmem_limit_bytes=_VMEM_LIMIT),
        cost_estimate=pl.CostEstimate(flops=flops, transcendentals=0,
                                      bytes_accessed=bytes_accessed),
    )(*inputs)


def _bn_relu_conv2_add(y_nhwc, scale, bias, w_hwio, shortcut_nhwc):
    n, h, w, c = y_nhwc.shape
    cout = w_hwio.shape[-1]
    wmat = w_hwio.reshape(9 * c, cout)
    flops = 2 * n * h * w * 9 * c * cout
    bytes_accessed = 4 * (y_nhwc.size + shortcut_nhwc.size + wmat.size
                          + n * h * w * cout)
    return pl.pallas_call(
        _bn_conv2_add_kernel,
        grid=(n,),
        in_specs=[
            pl.BlockSpec((1, h, w, c), lambda b: (b, 0, 0, 0)),
            pl.BlockSpec((1, c), lambda b: (0, 0)),
            pl.BlockSpec((1, c), lambda b: (0, 0)),
            pl.BlockSpec((9 * c, cout), lambda b: (0, 0)),
            pl.BlockSpec((1, h, w, cout), lambda b: (b, 0, 0, 0)),
        ],
        out_specs=pl.BlockSpec((1, h, w, cout), lambda b: (b, 0, 0, 0)),
        out_shape=jax.ShapeDtypeStruct((n, h, w, cout), y_nhwc.dtype),
        scratch_shapes=[
            pltpu.VMEM((h + 2, w + 2, c), jnp.float32),     # halo buffer
            pltpu.VMEM((h, w, 9 * c), jnp.float32),         # im2col staging
        ],
        compiler_params=pltpu.CompilerParams(
            dimension_semantics=("parallel",),
            vmem_limit_bytes=_VMEM_LIMIT),
        cost_estimate=pl.CostEstimate(flops=flops, transcendentals=0,
                                      bytes_accessed=bytes_accessed),
    )(y_nhwc, scale, bias, wmat, shortcut_nhwc)


# ---------------------------------------------------------------------------
# BasicBlock forward (Pallas) and pure-JAX reference
# ---------------------------------------------------------------------------
@functools.partial(jax.jit, static_argnames=("stride", "equal_in_out"))
def basic_block_forward(x_nchw, p, *, stride, equal_in_out):
    x = jnp.transpose(x_nchw, (0, 2, 3, 1))                  # NCHW -> NHWC
    s1, b1 = _fold_bn(p["bn1_gamma"], p["bn1_beta"], p["bn1_mean"], p["bn1_var"])
    s2, b2 = _fold_bn(p["bn2_gamma"], p["bn2_beta"], p["bn2_mean"], p["bn2_var"])
    if equal_in_out:
        out1 = _bn_relu_conv1(x, s1, b1, p["conv1_w"], None, stride)
        shortcut = x                                         # torch.add(x, out)
    else:
        out1, shortcut = _bn_relu_conv1(x, s1, b1, p["conv1_w"],
                                        p["short_w"], stride)
    y = _bn_relu_conv2_add(out1, s2, b2, p["conv2_w"], shortcut)
    return jnp.transpose(y, (0, 3, 1, 2))                    # NHWC -> NCHW


def ref_forward(x_nchw, p, *, stride, equal_in_out, eps=1e-5):
    x = jnp.transpose(x_nchw, (0, 2, 3, 1))

    def bnr(v, g, b, m, var):
        return jnp.maximum((v - m) / jnp.sqrt(var + eps) * g + b, 0.0)

    def conv(v, w, s, pad):
        return jax.lax.conv_general_dilated(
            v, w, (s, s), pad, dimension_numbers=("NHWC", "HWIO", "NHWC"))

    act = bnr(x, p["bn1_gamma"], p["bn1_beta"], p["bn1_mean"], p["bn1_var"])
    out = conv(act, p["conv1_w"], stride, [(1, 1), (1, 1)])
    out = bnr(out, p["bn2_gamma"], p["bn2_beta"], p["bn2_mean"], p["bn2_var"])
    out = conv(out, p["conv2_w"], 1, [(1, 1), (1, 1)])
    if equal_in_out:
        sc = x
    else:
        w11 = p["short_w"].reshape(1, 1, *p["short_w"].shape)
        sc = conv(act, w11, stride, [(0, 0), (0, 0)])
    return jnp.transpose(sc + out, (0, 3, 1, 2))


def make_params(key, in_planes, out_planes, equal_in_out):
    ks = jax.random.split(key, 12)
    p = {
        "bn1_gamma": jax.random.uniform(ks[0], (in_planes,), jnp.float32, 0.5, 1.5),
        "bn1_beta": 0.1 * jax.random.normal(ks[1], (in_planes,), jnp.float32),
        "bn1_mean": 0.1 * jax.random.normal(ks[2], (in_planes,), jnp.float32),
        "bn1_var": jax.random.uniform(ks[3], (in_planes,), jnp.float32, 0.5, 1.5),
        "bn2_gamma": jax.random.uniform(ks[4], (out_planes,), jnp.float32, 0.5, 1.5),
        "bn2_beta": 0.1 * jax.random.normal(ks[5], (out_planes,), jnp.float32),
        "bn2_mean": 0.1 * jax.random.normal(ks[6], (out_planes,), jnp.float32),
        "bn2_var": jax.random.uniform(ks[7], (out_planes,), jnp.float32, 0.5, 1.5),
        # HWIO weights (PyTorch OIHW -> HWIO would be transpose(2,3,1,0))
        "conv1_w": 0.1 * jax.random.normal(ks[8], (3, 3, in_planes, out_planes), jnp.float32),
        "conv2_w": 0.1 * jax.random.normal(ks[9], (3, 3, out_planes, out_planes), jnp.float32),
    }
    if not equal_in_out:
        p["short_w"] = 0.1 * jax.random.normal(ks[10], (in_planes, out_planes), jnp.float32)
    return p


if __name__ == "__main__":
    key = jax.random.PRNGKey(0)
    kx, kp1, kp2 = jax.random.split(key, 3)

    x = jax.random.normal(kx, (2, 4, 16, 16), jnp.float32)  # NCHW

    # Case A: equalInOut (in=4, out=4, stride=1) -> identity shortcut
    pA = make_params(kp1, 4, 4, equal_in_out=True)
    yA = jax.block_until_ready(basic_block_forward(x, pA, stride=1, equal_in_out=True))
    rA = ref_forward(x, pA, stride=1, equal_in_out=True)
    assert yA.shape == (2, 4, 16, 16)
    assert jnp.allclose(yA, rA, atol=1e-4, rtol=1e-4), float(jnp.max(jnp.abs(yA - rA)))

    # Case B: not equalInOut (in=4, out=8, stride=2) -> fused 1x1 conv shortcut
    pB = make_params(kp2, 4, 8, equal_in_out=False)
    yB = jax.block_until_ready(basic_block_forward(x, pB, stride=2, equal_in_out=False))
    rB = ref_forward(x, pB, stride=2, equal_in_out=False)
    assert yB.shape == (2, 8, 8, 8)
    assert jnp.allclose(yB, rB, atol=1e-4, rtol=1e-4), float(jnp.max(jnp.abs(yB - rB)))

    print("KERNEL_OK")
</pallas_src>

<mosaic_0001>
module attributes {stable_mosaic.version = 11 : i64} {
  func.func @_bn_conv1_kernel(%arg0: i32, %arg1: memref<1x16x16x4xf32, #tpu.memory_space<vmem>>, %arg2: memref<1x4xf32, #tpu.memory_space<vmem>>, %arg3: memref<1x4xf32, #tpu.memory_space<vmem>>, %arg4: memref<36x4xf32, #tpu.memory_space<vmem>>, %arg5: memref<1x16x16x4xf32, #tpu.memory_space<vmem>>, %arg6: memref<18x18x4xf32, #tpu.memory_space<vmem>>, %arg7: memref<16x16x36xf32, #tpu.memory_space<vmem>>) attributes {dimension_semantics = [#tpu.dimension_semantics<parallel>], iteration_bounds = array<i64: 2>, scalar_prefetch = 0 : i64, scratch_operands = 2 : i64, tpu.core_type = #tpu.core_type<tc>, window_params = [{transform_indices = @transform_0, window_bounds = array<i64: 1, 16, 16, 4>}, {pipeline_mode = #tpu.pipeline_mode<synchronous>, transform_indices = @transform_1, window_bounds = array<i64: 1, 4>}, {pipeline_mode = #tpu.pipeline_mode<synchronous>, transform_indices = @transform_2, window_bounds = array<i64: 1, 4>}, {pipeline_mode = #tpu.pipeline_mode<synchronous>, transform_indices = @transform_3, window_bounds = array<i64: 36, 4>}, {transform_indices = @transform_4, window_bounds = array<i64: 1, 16, 16, 4>}]} {
    %c0 = arith.constant 0 : index
    %c0_0 = arith.constant 0 : index
    %c0_1 = arith.constant 0 : index
    %c0_2 = arith.constant 0 : index
    %0 = vector.load %arg1[%c0, %c0_0, %c0_1, %c0_2] : memref<1x16x16x4xf32, #tpu.memory_space<vmem>>, vector<1x16x16x4xf32>
    %1 = vector.shape_cast %0 : vector<1x16x16x4xf32> to vector<16x16x4xf32>
    %c0_3 = arith.constant 0 : index
    %c0_4 = arith.constant 0 : index
    %2 = vector.load %arg2[%c0_3, %c0_4] : memref<1x4xf32, #tpu.memory_space<vmem>>, vector<1x4xf32>
    %3 = vector.shape_cast %2 : vector<1x4xf32> to vector<1x1x4xf32>
    %4 = vector.broadcast %3 : vector<1x1x4xf32> to vector<16x16x4xf32>
    %5 = arith.mulf %1, %4 : vector<16x16x4xf32>
    %c0_5 = arith.constant 0 : index
    %c0_6 = arith.constant 0 : index
    %6 = vector.load %arg3[%c0_5, %c0_6] : memref<1x4xf32, #tpu.memory_space<vmem>>, vector<1x4xf32>
    %7 = vector.shape_cast %6 : vector<1x4xf32> to vector<1x1x4xf32>
    %8 = vector.broadcast %7 : vector<1x1x4xf32> to vector<16x16x4xf32>
    %9 = arith.addf %5, %8 : vector<16x16x4xf32>
    %cst = arith.constant 0.000000e+00 : f32
    %10 = vector.broadcast %cst : f32 to vector<16x16x4xf32>
    %11 = arith.maximumf %9, %10 : vector<16x16x4xf32>
    %cst_7 = arith.constant 0.000000e+00 : f32
    %12 = vector.broadcast %cst_7 : f32 to vector<18x18x4xf32>
    %c0_8 = arith.constant 0 : index
    %c0_9 = arith.constant 0 : index
    %c0_10 = arith.constant 0 : index
    %13 = vector.load %arg6[%c0_8, %c0_9, %c0_10] : memref<18x18x4xf32, #tpu.memory_space<vmem>>, vector<18x18x4xf32>
    tpu.vector_store %arg6[%c0_8, %c0_9, %c0_10], %12 {strides = array<i32>} : memref<18x18x4xf32, #tpu.memory_space<vmem>>, vector<18x18x4xf32>,
    %c1 = arith.constant 1 : index
    %c1_11 = arith.constant 1 : index
    %c0_12 = arith.constant 0 : index
    %14 = vector.load %arg6[%c1, %c1_11, %c0_12] : memref<18x18x4xf32, #tpu.memory_space<vmem>>, vector<16x16x4xf32>
    tpu.vector_store %arg6[%c1, %c1_11, %c0_12], %11 {strides = array<i32>} : memref<18x18x4xf32, #tpu.memory_space<vmem>>, vector<16x16x4xf32>,
    %c0_13 = arith.constant 0 : index
    %c0_14 = arith.constant 0 : index
    %c0_15 = arith.constant 0 : index
    %15 = vector.load %arg6[%c0_13, %c0_14, %c0_15] : memref<18x18x4xf32, #tpu.memory_space<vmem>>, vector<16x16x4xf32>
    %c0_16 = arith.constant 0 : index
    %c0_17 = arith.constant 0 : index
    %c0_18 = arith.constant 0 : index
    %16 = vector.load %arg7[%c0_16, %c0_17, %c0_18] : memref<16x16x36xf32, #tpu.memory_space<vmem>>, vector<16x16x4xf32>
    tpu.vector_store %arg7[%c0_16, %c0_17, %c0_18], %15 {strides = array<i32>} : memref<16x16x36xf32, #tpu.memory_space<vmem>>, vector<16x16x4xf32>,
    %c0_19 = arith.constant 0 : index
    %c1_20 = arith.constant 1 : index
    %c0_21 = arith.constant 0 : index
    %17 = vector.load %arg6[%c0_19, %c1_20, %c0_21] : memref<18x18x4xf32, #tpu.memory_space<vmem>>, vector<16x16x4xf32>
    %c0_22 = arith.constant 0 : index
    %c0_23 = arith.constant 0 : index
    %c4 = arith.constant 4 : index
    %18 = vector.load %arg7[%c0_22, %c0_23, %c4] : memref<16x16x36xf32, #tpu.memory_space<vmem>>, vector<16x16x4xf32>
    tpu.vector_store %arg7[%c0_22, %c0_23, %c4], %17 {strides = array<i32>} : memref<16x16x36xf32, #tpu.memory_space<vmem>>, vector<16x16x4xf32>,
    %c0_24 = arith.constant 0 : index
    %c2 = arith.constant 2 : index
    %c0_25 = arith.constant 0 : index
    %19 = vector.load %arg6[%c0_24, %c2, %c0_25] : memref<18x18x4xf32, #tpu.memory_space<vmem>>, vector<16x16x4xf32>
    %c0_26 = arith.constant 0 : index
    %c0_27 = arith.constant 0 : index
    %c8 = arith.constant 8 : index
    %20 = vector.load %arg7[%c0_26, %c0_27, %c8] : memref<16x16x36xf32, #tpu.memory_space<vmem>>, vector<16x16x4xf32>
    tpu.vector_store %arg7[%c0_26, %c0_27, %c8], %19 {strides = array<i32>} : memref<16x16x36xf32, #tpu.memory_space<vmem>>, vector<16x16x4xf32>,
    %c1_28 = arith.constant 1 : index
    %c0_29 = arith.constant 0 : index
    %c0_30 = arith.constant 0 : index
    %21 = vector.load %arg6[%c1_28, %c0_29, %c0_30] : memref<18x18x4xf32, #tpu.memory_space<vmem>>, vector<16x16x4xf32>
    %c0_31 = arith.constant 0 : index
    %c0_32 = arith.constant 0 : index
    %c12 = arith.constant 12 : index
    %22 = vector.load %arg7[%c0_31, %c0_32, %c12] : memref<16x16x36xf32, #tpu.memory_space<vmem>>, vector<16x16x4xf32>
    tpu.vector_store %arg7[%c0_31, %c0_32, %c12], %21 {strides = array<i32>} : memref<16x16x36xf32, #tpu.memory_space<vmem>>, vector<16x16x4xf32>,
    %c1_33 = arith.constant 1 : index
    %c1_34 = arith.constant 1 : index
    %c0_35 = arith.constant 0 : index
    %23 = vector.load %arg6[%c1_33, %c1_34, %c0_35] : memref<18x18x4xf32, #tpu.memory_space<vmem>>, vector<16x16x4xf32>
    %c0_36 = arith.constant 0 : index
    %c0_37 = arith.constant 0 : index
    %c16 = arith.constant 16 : index
    %24 = vector.load %arg7[%c0_36, %c0_37, %c16] : memref<16x16x36xf32, #tpu.memory_space<vmem>>, vector<16x16x4xf32>
    tpu.vector_store %arg7[%c0_36, %c0_37, %c16], %23 {strides = array<i32>} : memref<16x16x36xf32, #tpu.memory_space<vmem>>, vector<16x16x4xf32>,
    %c1_38 = arith.constant 1 : index
    %c2_39 = arith.constant 2 : index
    %c0_40 = arith.constant 0 : index
    %25 = vector.load %arg6[%c1_38, %c2_39, %c0_40] : memref<18x18x4xf32, #tpu.memory_space<vmem>>, vector<16x16x4xf32>
    %c0_41 = arith.constant 0 : index
    %c0_42 = arith.constant 0 : index
    %c20 = arith.constant 20 : index
    %26 = vector.load %arg7[%c0_41, %c0_42, %c20] : memref<16x16x36xf32, #tpu.memory_space<vmem>>, vector<16x16x4xf32>
    tpu.vector_store %arg7[%c0_41, %c0_42, %c20], %25 {strides = array<i32>} : memref<16x16x36xf32, #tpu.memory_space<vmem>>, vector<16x16x4xf32>,
    %c2_43 = arith.constant 2 : index
    %c0_44 = arith.constant 0 : index
    %c0_45 = arith.constant 0 : index
    %27 = vector.load %arg6[%c2_43, %c0_44, %c0_45] : memref<18x18x4xf32, #tpu.memory_space<vmem>>, vector<16x16x4xf32>
    %c0_46 = arith.constant 0 : index
    %c0_47 = arith.constant 0 : index
    %c24 = arith.constant 24 : index
    %28 = vector.load %arg7[%c0_46, %c0_47, %c24] : memref<16x16x36xf32, #tpu.memory_space<vmem>>, vector<16x16x4xf32>
    tpu.vector_store %arg7[%c0_46, %c0_47, %c24], %27 {strides = array<i32>} : memref<16x16x36xf32, #tpu.memory_space<vmem>>, vector<16x16x4xf32>,
    %c2_48 = arith.constant 2 : index
    %c1_49 = arith.constant 1 : index
    %c0_50 = arith.constant 0 : index
    %29 = vector.load %arg6[%c2_48, %c1_49, %c0_50] : memref<18x18x4xf32, #tpu.memory_space<vmem>>, vector<16x16x4xf32>
    %c0_51 = arith.constant 0 : index
    %c0_52 = arith.constant 0 : index
    %c28 = arith.constant 28 : index
    %30 = vector.load %arg7[%c0_51, %c0_52, %c28] : memref<16x16x36xf32, #tpu.memory_space<vmem>>, vector<16x16x4xf32>
    tpu.vector_store %arg7[%c0_51, %c0_52, %c28], %29 {strides = array<i32>} : memref<16x16x36xf32, #tpu.memory_space<vmem>>, vector<16x16x4xf32>,
    %c2_53 = arith.constant 2 : index
    %c2_54 = arith.constant 2 : index
    %c0_55 = arith.constant 0 : index
    %31 = vector.load %arg6[%c2_53, %c2_54, %c0_55] : memref<18x18x4xf32, #tpu.memory_space<vmem>>, vector<16x16x4xf32>
    %c0_56 = arith.constant 0 : index
    %c0_57 = arith.constant 0 : index
    %c32 = arith.constant 32 : index
    %32 = vector.load %arg7[%c0_56, %c0_57, %c32] : memref<16x16x36xf32, #tpu.memory_space<vmem>>, vector<16x16x4xf32>
    tpu.vector_store %arg7[%c0_56, %c0_57, %c32], %31 {strides = array<i32>} : memref<16x16x36xf32, #tpu.memory_space<vmem>>, vector<16x16x4xf32>,
    %c0_58 = arith.constant 0 : index
    %c0_59 = arith.constant 0 : index
    %c0_60 = arith.constant 0 : index
    %33 = vector.load %arg7[%c0_58, %c0_59, %c0_60] : memref<16x16x36xf32, #tpu.memory_space<vmem>>, vector<16x16x36xf32>
    %34 = vector.shape_cast %33 : vector<16x16x36xf32> to vector<256x36xf32>
    %c0_61 = arith.constant 0 : index
    %c0_62 = arith.constant 0 : index
    %35 = vector.load %arg4[%c0_61, %c0_62] : memref<36x4xf32, #tpu.memory_space<vmem>>, vector<36x4xf32>
    %cst_63 = arith.constant dense<0.000000e+00> : vector<256x4xf32>
    %36 = tpu.matmul %34, %35, %cst_63 {dimension_numbers = #tpu.dot_dimension_numbers<[1], [0], [0], [1], [0, 0, 1, 1], [], []>} : vector<256x36xf32>, vector<36x4xf32>, vector<256x4xf32> -> vector<256x4xf32>
    %37 = vector.shape_cast %36 : vector<256x4xf32> to vector<1x16x16x4xf32>
    %c0_64 = arith.constant 0 : index
    %c0_65 = arith.constant 0 : index
    %c0_66 = arith.constant 0 : index
    %c0_67 = arith.constant 0 : index
    %38 = vector.load %arg5[%c0_64, %c0_65, %c0_66, %c0_67] : memref<1x16x16x4xf32, #tpu.memory_space<vmem>>, vector<1x16x16x4xf32>
    tpu.vector_store %arg5[%c0_64, %c0_65, %c0_66, %c0_67], %37 {strides = array<i32>} : memref<1x16x16x4xf32, #tpu.memory_space<vmem>>, vector<1x16x16x4xf32>,
    return
  }
  func.func @transform_0(%arg0: i32) -> (i32, i32, i32, i32) {
    %c0_i32 = arith.constant 0 : i32
    %c0_i32_0 = arith.constant 0 : i32
    %c0_i32_1 = arith.constant 0 : i32
    %c0_i32_2 = arith.constant 0 : i32
    return %arg0, %c0_i32, %c0_i32_0, %c0_i32_1 : i32, i32, i32, i32
  }
  func.func @transform_1(%arg0: i32) -> (i32, i32) {
    %c0_i32 = arith.constant 0 : i32
    %c0_i32_0 = arith.constant 0 : i32
    %c0_i32_1 = arith.constant 0 : i32
    return %c0_i32, %c0_i32_0 : i32, i32
  }
  func.func @transform_2(%arg0: i32) -> (i32, i32) {
    %c0_i32 = arith.constant 0 : i32
    %c0_i32_0 = arith.constant 0 : i32
    %c0_i32_1 = arith.constant 0 : i32
    return %c0_i32, %c0_i32_0 : i32, i32
  }
  func.func @transform_3(%arg0: i32) -> (i32, i32) {
    %c0_i32 = arith.constant 0 : i32
    %c0_i32_0 = arith.constant 0 : i32
    %c0_i32_1 = arith.constant 0 : i32
    return %c0_i32, %c0_i32_0 : i32, i32
  }
  func.func @transform_4(%arg0: i32) -> (i32, i32, i32, i32) {
    %c0_i32 = arith.constant 0 : i32
    %c0_i32_0 = arith.constant 0 : i32
    %c0_i32_1 = arith.constant 0 : i32
    %c0_i32_2 = arith.constant 0 : i32
    return %arg0, %c0_i32, %c0_i32_0, %c0_i32_1 : i32, i32, i32, i32
  }
}

module attributes {stable_mosaic.version = 11 : i64} {
  func.func @_bn_conv2_add_kernel(%arg0: i32, %arg1: memref<1x16x16x4xf32, #tpu.memory_space<vmem>>, %arg2: memref<1x4xf32, #tpu.memory_space<vmem>>, %arg3: memref<1x4xf32, #tpu.memory_space<vmem>>, %arg4: memref<36x4xf32, #tpu.memory_space<vmem>>, %arg5: memref<1x16x16x4xf32, #tpu.memory_space<vmem>>, %arg6: memref<1x16x16x4xf32, #tpu.memory_space<vmem>>, %arg7: memref<18x18x4xf32, #tpu.memory_space<vmem>>, %arg8: memref<16x16x36xf32, #tpu.memory_space<vmem>>) attributes {dimension_semantics = [#tpu.dimension_semantics<parallel>], iteration_bounds = array<i64: 2>, scalar_prefetch = 0 : i64, scratch_operands = 2 : i64, tpu.core_type = #tpu.core_type<tc>, window_params = [{transform_indices = @transform_0, window_bounds = array<i64: 1, 16, 16, 4>}, {pipeline_mode = #tpu.pipeline_mode<synchronous>, transform_indices = @transform_1, window_bounds = array<i64: 1, 4>}, {pipeline_mode = #tpu.pipeline_mode<synchronous>, transform_indices = @transform_2, window_bounds = array<i64: 1, 4>}, {pipeline_mode = #tpu.pipeline_mode<synchronous>, transform_indices = @transform_3, window_bounds = array<i64: 36, 4>}, {transform_indices = @transform_4, window_bounds = array<i64: 1, 16, 16, 4>}, {transform_indices = @transform_5, window_bounds = array<i64: 1, 16, 16, 4>}]} {
    %c0 = arith.constant 0 : index
    %c0_0 = arith.constant 0 : index
    %c0_1 = arith.constant 0 : index
    %c0_2 = arith.constant 0 : index
    %0 = vector.load %arg1[%c0, %c0_0, %c0_1, %c0_2] : memref<1x16x16x4xf32, #tpu.memory_space<vmem>>, vector<1x16x16x4xf32>
    %1 = vector.shape_cast %0 : vector<1x16x16x4xf32> to vector<16x16x4xf32>
    %c0_3 = arith.constant 0 : index
    %c0_4 = arith.constant 0 : index
    %2 = vector.load %arg2[%c0_3, %c0_4] : memref<1x4xf32, #tpu.memory_space<vmem>>, vector<1x4xf32>
    %3 = vector.shape_cast %2 : vector<1x4xf32> to vector<1x1x4xf32>
    %4 = vector.broadcast %3 : vector<1x1x4xf32> to vector<16x16x4xf32>
    %5 = arith.mulf %1, %4 : vector<16x16x4xf32>
    %c0_5 = arith.constant 0 : index
    %c0_6 = arith.constant 0 : index
    %6 = vector.load %arg3[%c0_5, %c0_6] : memref<1x4xf32, #tpu.memory_space<vmem>>, vector<1x4xf32>
    %7 = vector.shape_cast %6 : vector<1x4xf32> to vector<1x1x4xf32>
    %8 = vector.broadcast %7 : vector<1x1x4xf32> to vector<16x16x4xf32>
    %9 = arith.addf %5, %8 : vector<16x16x4xf32>
    %cst = arith.constant 0.000000e+00 : f32
    %10 = vector.broadcast %cst : f32 to vector<16x16x4xf32>
    %11 = arith.maximumf %9, %10 : vector<16x16x4xf32>
    %cst_7 = arith.constant 0.000000e+00 : f32
    %12 = vector.broadcast %cst_7 : f32 to vector<18x18x4xf32>
    %c0_8 = arith.constant 0 : index
    %c0_9 = arith.constant 0 : index
    %c0_10 = arith.constant 0 : index
    %13 = vector.load %arg7[%c0_8, %c0_9, %c0_10] : memref<18x18x4xf32, #tpu.memory_space<vmem>>, vector<18x18x4xf32>
    tpu.vector_store %arg7[%c0_8, %c0_9, %c0_10], %12 {strides = array<i32>} : memref<18x18x4xf32, #tpu.memory_space<vmem>>, vector<18x18x4xf32>,
    %c1 = arith.constant 1 : index
    %c1_11 = arith.constant 1 : index
    %c0_12 = arith.constant 0 : index
    %14 = vector.load %arg7[%c1, %c1_11, %c0_12] : memref<18x18x4xf32, #tpu.memory_space<vmem>>, vector<16x16x4xf32>
    tpu.vector_store %arg7[%c1, %c1_11, %c0_12], %11 {strides = array<i32>} : memref<18x18x4xf32, #tpu.memory_space<vmem>>, vector<16x16x4xf32>,
    %c0_13 = arith.constant 0 : index
    %c0_14 = arith.constant 0 : index
    %c0_15 = arith.constant 0 : index
    %15 = vector.load %arg7[%c0_13, %c0_14, %c0_15] : memref<18x18x4xf32, #tpu.memory_space<vmem>>, vector<16x16x4xf32>
    %c0_16 = arith.constant 0 : index
    %c0_17 = arith.constant 0 : index
    %c0_18 = arith.constant 0 : index
    %16 = vector.load %arg8[%c0_16, %c0_17, %c0_18] : memref<16x16x36xf32, #tpu.memory_space<vmem>>, vector<16x16x4xf32>
    tpu.vector_store %arg8[%c0_16, %c0_17, %c0_18], %15 {strides = array<i32>} : memref<16x16x36xf32, #tpu.memory_space<vmem>>, vector<16x16x4xf32>,
    %c0_19 = arith.constant 0 : index
    %c1_20 = arith.constant 1 : index
    %c0_21 = arith.constant 0 : index
    %17 = vector.load %arg7[%c0_19, %c1_20, %c0_21] : memref<18x18x4xf32, #tpu.memory_space<vmem>>, vector<16x16x4xf32>
    %c0_22 = arith.constant 0 : index
    %c0_23 = arith.constant 0 : index
    %c4 = arith.constant 4 : index
    %18 = vector.load %arg8[%c0_22, %c0_23, %c4] : memref<16x16x36xf32, #tpu.memory_space<vmem>>, vector<16x16x4xf32>
    tpu.vector_store %arg8[%c0_22, %c0_23, %c4], %17 {strides = array<i32>} : memref<16x16x36xf32, #tpu.memory_space<vmem>>, vector<16x16x4xf32>,
    %c0_24 = arith.constant 0 : index
    %c2 = arith.constant 2 : index
    %c0_25 = arith.constant 0 : index
    %19 = vector.load %arg7[%c0_24, %c2, %c0_25] : memref<18x18x4xf32, #tpu.memory_space<vmem>>, vector<16x16x4xf32>
    %c0_26 = arith.constant 0 : index
    %c0_27 = arith.constant 0 : index
    %c8 = arith.constant 8 : index
    %20 = vector.load %arg8[%c0_26, %c0_27, %c8] : memref<16x16x36xf32, #tpu.memory_space<vmem>>, vector<16x16x4xf32>
    tpu.vector_store %arg8[%c0_26, %c0_27, %c8], %19 {strides = array<i32>} : memref<16x16x36xf32, #tpu.memory_space<vmem>>, vector<16x16x4xf32>,
    %c1_28 = arith.constant 1 : index
    %c0_29 = arith.constant 0 : index
    %c0_30 = arith.constant 0 : index
    %21 = vector.load %arg7[%c1_28, %c0_29, %c0_30] : memref<18x18x4xf32, #tpu.memory_space<vmem>>, vector<16x16x4xf32>
    %c0_31 = arith.constant 0 : index
    %c0_32 = arith.constant 0 : index
    %c12 = arith.constant 12 : index
    %22 = vector.load %arg8[%c0_31, %c0_32, %c12] : memref<16x16x36xf32, #tpu.memory_space<vmem>>, vector<16x16x4xf32>
    tpu.vector_store %arg8[%c0_31, %c0_32, %c12], %21 {strides = array<i32>} : memref<16x16x36xf32, #tpu.memory_space<vmem>>, vector<16x16x4xf32>,
    %c1_33 = arith.constant 1 : index
    %c1_34 = arith.constant 1 : index
    %c0_35 = arith.constant 0 : index
    %23 = vector.load %arg7[%c1_33, %c1_34, %c0_35] : memref<18x18x4xf32, #tpu.memory_space<vmem>>, vector<16x16x4xf32>
    %c0_36 = arith.constant 0 : index
    %c0_37 = arith.constant 0 : index
    %c16 = arith.constant 16 : index
    %24 = vector.load %arg8[%c0_36, %c0_37, %c16] : memref<16x16x36xf32, #tpu.memory_space<vmem>>, vector<16x16x4xf32>
    tpu.vector_store %arg8[%c0_36, %c0_37, %c16], %23 {strides = array<i32>} : memref<16x16x36xf32, #tpu.memory_space<vmem>>, vector<16x16x4xf32>,
    %c1_38 = arith.constant 1 : index
    %c2_39 = arith.constant 2 : index
    %c0_40 = arith.constant 0 : index
    %25 = vector.load %arg7[%c1_38, %c2_39, %c0_40] : memref<18x18x4xf32, #tpu.memory_space<vmem>>, vector<16x16x4xf32>
    %c0_41 = arith.constant 0 : index
    %c0_42 = arith.constant 0 : index
    %c20 = arith.constant 20 : index
    %26 = vector.load %arg8[%c0_41, %c0_42, %c20] : memref<16x16x36xf32, #tpu.memory_space<vmem>>, vector<16x16x4xf32>
    tpu.vector_store %arg8[%c0_41, %c0_42, %c20], %25 {strides = array<i32>} : memref<16x16x36xf32, #tpu.memory_space<vmem>>, vector<16x16x4xf32>,
    %c2_43 = arith.constant 2 : index
    %c0_44 = arith.constant 0 : index
    %c0_45 = arith.constant 0 : index
    %27 = vector.load %arg7[%c2_43, %c0_44, %c0_45] : memref<18x18x4xf32, #tpu.memory_space<vmem>>, vector<16x16x4xf32>
    %c0_46 = arith.constant 0 : index
    %c0_47 = arith.constant 0 : index
    %c24 = arith.constant 24 : index
    %28 = vector.load %arg8[%c0_46, %c0_47, %c24] : memref<16x16x36xf32, #tpu.memory_space<vmem>>, vector<16x16x4xf32>
    tpu.vector_store %arg8[%c0_46, %c0_47, %c24], %27 {strides = array<i32>} : memref<16x16x36xf32, #tpu.memory_space<vmem>>, vector<16x16x4xf32>,
    %c2_48 = arith.constant 2 : index
    %c1_49 = arith.constant 1 : index
    %c0_50 = arith.constant 0 : index
    %29 = vector.load %arg7[%c2_48, %c1_49, %c0_50] : memref<18x18x4xf32, #tpu.memory_space<vmem>>, vector<16x16x4xf32>
    %c0_51 = arith.constant 0 : index
    %c0_52 = arith.constant 0 : index
    %c28 = arith.constant 28 : index
    %30 = vector.load %arg8[%c0_51, %c0_52, %c28] : memref<16x16x36xf32, #tpu.memory_space<vmem>>, vector<16x16x4xf32>
    tpu.vector_store %arg8[%c0_51, %c0_52, %c28], %29 {strides = array<i32>} : memref<16x16x36xf32, #tpu.memory_space<vmem>>, vector<16x16x4xf32>,
    %c2_53 = arith.constant 2 : index
    %c2_54 = arith.constant 2 : index
    %c0_55 = arith.constant 0 : index
    %31 = vector.load %arg7[%c2_53, %c2_54, %c0_55] : memref<18x18x4xf32, #tpu.memory_space<vmem>>, vector<16x16x4xf32>
    %c0_56 = arith.constant 0 : index
    %c0_57 = arith.constant 0 : index
    %c32 = arith.constant 32 : index
    %32 = vector.load %arg8[%c0_56, %c0_57, %c32] : memref<16x16x36xf32, #tpu.memory_space<vmem>>, vector<16x16x4xf32>
    tpu.vector_store %arg8[%c0_56, %c0_57, %c32], %31 {strides = array<i32>} : memref<16x16x36xf32, #tpu.memory_space<vmem>>, vector<16x16x4xf32>,
    %c0_58 = arith.constant 0 : index
    %c0_59 = arith.constant 0 : index
    %c0_60 = arith.constant 0 : index
    %33 = vector.load %arg8[%c0_58, %c0_59, %c0_60] : memref<16x16x36xf32, #tpu.memory_space<vmem>>, vector<16x16x36xf32>
    %34 = vector.shape_cast %33 : vector<16x16x36xf32> to vector<256x36xf32>
    %c0_61 = arith.constant 0 : index
    %c0_62 = arith.constant 0 : index
    %35 = vector.load %arg4[%c0_61, %c0_62] : memref<36x4xf32, #tpu.memory_space<vmem>>, vector<36x4xf32>
    %cst_63 = arith.constant dense<0.000000e+00> : vector<256x4xf32>
    %36 = tpu.matmul %34, %35, %cst_63 {dimension_numbers = #tpu.dot_dimension_numbers<[1], [0], [0], [1], [0, 0, 1, 1], [], []>} : vector<256x36xf32>, vector<36x4xf32>, vector<256x4xf32> -> vector<256x4xf32>
    %37 = vector.shape_cast %36 : vector<256x4xf32> to vector<1x16x16x4xf32>
    %c0_64 = arith.constant 0 : index
    %c0_65 = arith.constant 0 : index
    %c0_66 = arith.constant 0 : index
    %c0_67 = arith.constant 0 : index
    %38 = vector.load %arg5[%c0_64, %c0_65, %c0_66, %c0_67] : memref<1x16x16x4xf32, #tpu.memory_space<vmem>>, vector<1x16x16x4xf32>
    %39 = arith.addf %37, %38 : vector<1x16x16x4xf32>
    %c0_68 = arith.constant 0 : index
    %c0_69 = arith.constant 0 : index
    %c0_70 = arith.constant 0 : index
    %c0_71 = arith.constant 0 : index
    %40 = vector.load %arg6[%c0_68, %c0_69, %c0_70, %c0_71] : memref<1x16x16x4xf32, #tpu.memory_space<vmem>>, vector<1x16x16x4xf32>
    tpu.vector_store %arg6[%c0_68, %c0_69, %c0_70, %c0_71], %39 {strides = array<i32>} : memref<1x16x16x4xf32, #tpu.memory_space<vmem>>, vector<1x16x16x4xf32>,
    return
  }
  func.func @transform_0(%arg0: i32) -> (i32, i32, i32, i32) {
    %c0_i32 = arith.constant 0 : i32
    %c0_i32_0 = arith.constant 0 : i32
    %c0_i32_1 = arith.constant 0 : i32
    %c0_i32_2 = arith.constant 0 : i32
    return %arg0, %c0_i32, %c0_i32_0, %c0_i32_1 : i32, i32, i32, i32
  }
  func.func @transform_1(%arg0: i32) -> (i32, i32) {
    %c0_i32 = arith.constant 0 : i32
    %c0_i32_0 = arith.constant 0 : i32
    %c0_i32_1 = arith.constant 0 : i32
    return %c0_i32, %c0_i32_0 : i32, i32
  }
  func.func @transform_2(%arg0: i32) -> (i32, i32) {
    %c0_i32 = arith.constant 0 : i32
    %c0_i32_0 = arith.constant 0 : i32
    %c0_i32_1 = arith.constant 0 : i32
    return %c0_i32, %c0_i32_0 : i32, i32
  }
  func.func @transform_3(%arg0: i32) -> (i32, i32) {
    %c0_i32 = arith.constant 0 : i32
    %c0_i32_0 = arith.constant 0 : i32
    %c0_i32_1 = arith.constant 0 : i32
    return %c0_i32, %c0_i32_0 : i32, i32
  }
  func.func @transform_4(%arg0: i32) -> (i32, i32, i32, i32) {
    %c0_i32 = arith.constant 0 : i32
    %c0_i32_0 = arith.constant 0 : i32
    %c0_i32_1 = arith.constant 0 : i32
    %c0_i32_2 = arith.constant 0 : i32
    return %arg0, %c0_i32, %c0_i32_0, %c0_i32_1 : i32, i32, i32, i32
  }
  func.func @transform_5(%arg0: i32) -> (i32, i32, i32, i32) {
    %c0_i32 = arith.constant 0 : i32
    %c0_i32_0 = arith.constant 0 : i32
    %c0_i32_1 = arith.constant 0 : i32
    %c0_i32_2 = arith.constant 0 : i32
    return %arg0, %c0_i32, %c0_i32_0, %c0_i32_1 : i32, i32, i32, i32
  }
}

</mosaic_0001>

<bundles_post_ra>
// kernel: basic_block_forward.2
= control target key start
LH: loop header
LB: loop body
LE: loop exit
PB: predicated region body
PF: predicated region fallthrough
CT: control target
= control target key end

     0   :  { %s2704_s15 = smov 0   ;;  %s3841_s0 = inlined_call_operand.vmem [shape: f32[2,16,16,4], index: 0, kind: input, shape index: {}]   ;;  %s3842_s1 = inlined_call_operand.vmem [shape: f32[1,4], index: 1, kind: input, shape index: {}]   ;;  %s3843_s2 = inlined_call_operand.vmem [shape: f32[1,4], index: 2, kind: input, shape index: {}]   ;;  %s3844_s3 = inlined_call_operand.vmem [shape: f32[36,4], index: 3, kind: input, shape index: {}]   ;;  %s3845_s4 = inlined_call_operand.vmem [shape: f32[2,16,16,4], index: 4, kind: output, shape index: {}]  }
   0x1 LB: > { %s2488_s16 = sadd.s32 4294967295, %s2668_s15   ;;  %p2492_p0 = scmp.ge.s32.totalorder %s2668_s15, 1  ;;  %s2668_s15 = sphi %s2704_s15, %s14_s15  }
   0x2   : > { %p162_p1 = scmp.lt.s32.totalorder %s2668_s15, 3 }
   0x4   : > { %p163_p2 = pnand %p2492_p0, %p162_p1 }
   0x5   : > { %vm340_vm0 = vcmask (!%p163_p2), 31744   ;;  %p2714_p3 = scmp.lt.s32.totalorder (!%p163_p2), %s2488_s16, 1  ;;  %v2670_v0 = vmov (!%p163_p2), 0.0   ;;  %vm343_vm1 = vcmask (!%p163_p2), 25600   ;;  %v2782_v1 = vld [vmem:[%s3842_s1] ss:$0 sm:$0xff] (!%p163_p2) }
   0x6   : > { %166 = sbr.rel (%p163_p2) target bundleno = 886 (0x376), region = 36  ;;  %341 = vst.msk [vmem:[#allocation2] sm:$0xff] (!%p163_p2), %vm340_vm0, %v2670_v0  ;;  %342 = vst.msk [vmem:[#allocation2 + $0x8] sm:$0xff] (!%p163_p2), %vm340_vm0, %v2670_v0  ;;  %v2794_v2 = vld [vmem:[%s3843_s2] ss:$0 sm:$0xff] (!%p163_p2)  ;;  %s2671_s26 = smov (!%p163_p2), 4  }
   0x7   : > { %345 = vst.msk [vmem:[#allocation2 + $0x18] sm:$0xff] (!%p163_p2), %vm340_vm0, %v2670_v0  ;;  %346 = vst.msk [vmem:[#allocation2 + $0x20] sm:$0xff] (!%p163_p2), %vm340_vm0, %v2670_v0  ;;  %s2672_s27 = smov (!%p163_p2), 8   ;;  %vm653_vm2 = vcmask (!%p163_p2), 64544   ;;  %s2673_s28 = smov (!%p163_p2), 12   ;;  %vm846_vm3 = vcmask (!%p163_p2), 97344  }
   0x8   : > { %348 = vst.msk [vmem:[#allocation2 + $0x30] sm:$0xff] (!%p163_p2), %vm340_vm0, %v2670_v0  ;;  %349 = vst.msk [vmem:[#allocation2 + $0x38] sm:$0xff] (!%p163_p2), %vm340_vm0, %v2670_v0  ;;  %s2674_s29 = smov (!%p163_p2), 16   ;;  %s2675_s30 = smov (!%p163_p2), 20   ;;  %vm2172_vm4 = vcmask (!%p163_p2), 1043456   ;;  %vm1039_vm5 = vcmask (!%p163_p2), 130144  }
   0x9   : > { %351 = vst.msk [vmem:[#allocation2 + $0x48] sm:$0xff] (!%p163_p2), %vm340_vm0, %v2670_v0  ;;  %352 = vst.msk [vmem:[#allocation2 + $0x50] sm:$0xff] (!%p163_p2), %vm340_vm0, %v2670_v0  ;;  %s2676_s5 = smov (!%p163_p2), 24   ;;  %s2677_s6 = smov (!%p163_p2), 28   ;;  %vm1232_vm6 = vcmask (!%p163_p2), 162944   ;;  %vm1425_vm7 = vcmask (!%p163_p2), 195744  }
   0xa   : > { %354 = vst.msk [vmem:[#allocation2 + $0x60] sm:$0xff] (!%p163_p2), %vm340_vm0, %v2670_v0  ;;  %355 = vst.msk [vmem:[#allocation2 + $0x68] sm:$0xff] (!%p163_p2), %vm340_vm0, %v2670_v0  ;;  %s2678_s11 = smov (!%p163_p2), 32   ;;  %vm1619_vm8 = vcmask (!%p163_p2), 228544   ;;  %vm1812_vm9 = vcmask (!%p163_p2), 261344   ;;  %vm2005_vm10 = vcmask (!%p163_p2), 294144  }
   0xb   : > { %357 = vst.msk [vmem:[#allocation2 + $0x78] sm:$0xff] (!%p163_p2), %vm340_vm0, %v2670_v0  ;;  %358 = vst.msk [vmem:[#allocation2 + $0x80] sm:$0xff] (!%p163_p2), %vm340_vm0, %v2670_v0  ;;  %vm2075_vm11 = vcmask (!%p163_p2), 293888  }
   0xc   : > { %360 = vst.msk [vmem:[#allocation2 + $0x90] sm:$0xff] (!%p163_p2), %vm340_vm0, %v2670_v0  ;;  %361 = vst.msk [vmem:[#allocation2 + $0x98] sm:$0xff] (!%p163_p2), %vm340_vm0, %v2670_v0 }
   0xd   : > { %363 = vst.msk [vmem:[#allocation2 + $0xa8] sm:$0xff] %vm340_vm0, %v2670_v0  ;;  %364 = vst.msk [vmem:[#allocation2 + $0xb0] sm:$0xff] %vm340_vm0, %v2670_v0  ;;  %s3848_s16 = smov (!%p2714_p3, %s2488_s16), 1  ;;  %v493_v12 = vld [vmem:[#allocation2 + $0x1] sm:$0xff] }
   0xe   : > { %366 = vst.msk [vmem:[#allocation2 + $0xc0] sm:$0xff] %vm340_vm0, %v2670_v0  ;;  %367 = vst.msk [vmem:[#allocation2 + $0xc8] sm:$0xff] %vm340_vm0, %v2670_v0  ;;  %s2534_s18 = sshll.u32 %s3848_s16, 8  ;;  %557 = vrot.lane.b32.xlu0 %v493_v12, %s2671_s26 }
   0xf   : > { %369 = vst.msk [vmem:[#allocation2 + $0xd8] sm:$0xff] %vm340_vm0, %v2670_v0  ;;  %370 = vst.msk [vmem:[#allocation2 + $0xe0] sm:$0xff] %vm340_vm0, %v2670_v0  ;;  %s2789_s23 = scalar_lea.vmem %s3841_s0, %s2534_s18 }
  0x10   : > { %372 = vst.msk [vmem:[#allocation2 + $0xf0] sm:$0xff] %vm340_vm0, %v2670_v0  ;;  %373 = vst.msk [vmem:[#allocation2 + $0xf8] sm:$0xff] %vm340_vm0, %v2670_v0  ;;  %v198_v3 = vld [vmem:[%s2789_s23] sm:$0xff]  ;;  %v199_v4 = vld [vmem:[%s2789_s23 + $0x8] sm:$0xff] }
  0x11   : > { %375 = vst.msk [vmem:[#allocation2 + $0x108] sm:$0xff] %vm340_vm0, %v2670_v0  ;;  %376 = vst.msk [vmem:[#allocation2 + $0x110] sm:$0xff] %vm340_vm0, %v2670_v0  ;;  %v200_v5 = vld [vmem:[%s2789_s23 + $0x10] sm:$0xff]  ;;  %v237_v6 = vmul.f32 %v2782_v1, %v198_v3  ;;  %v238_v7 = vmul.f32 %v2782_v1, %v199_v4  ;;  %v201_v9 = vld [vmem:[%s2789_s23 + $0x18] sm:$0xff] }
  0x12   : > { %378 = vst.msk [vmem:[#allocation2 + $0x120] sm:$0xff] %vm340_vm0, %v2670_v0  ;;  %379 = vst.msk [vmem:[#allocation2 + $0x128] sm:$0xff] %vm340_vm0, %v2670_v0  ;;  %v239_v8 = vmul.f32 %v2782_v1, %v200_v5  ;;  %v202_v10 = vld [vmem:[%s2789_s23 + $0x20] sm:$0xff]  ;;  %v203_v11 = vld [vmem:[%s2789_s23 + $0x28] sm:$0xff]  ;;  %v240_v13 = vmul.f32 %v2782_v1, %v201_v9 }
  0x13   : > { %381 = vst.msk [vmem:[#allocation2 + $0x138] sm:$0xff] %vm340_vm0, %v2670_v0  ;;  %382 = vst.msk [vmem:[#allocation2 + $0x140] sm:$0xff] %vm340_vm0, %v2670_v0  ;;  %v241_v14 = vmul.f32 %v2782_v1, %v202_v10  ;;  %v242_v15 = vmul.f32 %v2782_v1, %v203_v11  ;;  %v204_v16 = vld [vmem:[%s2789_s23 + $0x30] sm:$0xff]  ;;  %v205_v17 = vld [vmem:[%s2789_s23 + $0x38] sm:$0xff]  ;;  %v276_v18 = vadd.f32 %v2794_v2, %v237_v6 }
  0x14   : > { %384 = vst.msk [vmem:[#allocation2 + $0x150] sm:$0xff] %vm340_vm0, %v2670_v0  ;;  %385 = vst.msk [vmem:[#allocation2 + $0x158] sm:$0xff] %vm340_vm0, %v2670_v0  ;;  %v277_v20 = vadd.f32 %v2794_v2, %v238_v7  ;;  %v278_v21 = vadd.f32 %v2794_v2, %v239_v8  ;;  %v243_v22 = vmul.f32 %v2782_v1, %v204_v16  ;;  %v206_v27 = vld [vmem:[%s2789_s23 + $0x40] sm:$0xff]  ;;  %v207_v28 = vld [vmem:[%s2789_s23 + $0x48] sm:$0xff] }
  0x15   : > { %387 = vst.msk [vmem:[#allocation2 + $0x168] sm:$0xff] %vm340_vm0, %v2670_v0  ;;  %388 = vst.msk [vmem:[#allocation2 + $0x170] sm:$0xff] %vm340_vm0, %v2670_v0  ;;  %v279_v23 = vadd.f32 %v2794_v2, %v240_v13  ;;  %v280_v24 = vadd.f32 %v2794_v2, %v241_v14  ;;  %v281_v25 = vadd.f32 %v2794_v2, %v242_v15  ;;  %v208_v29 = vld [vmem:[%s2789_s23 + $0x50] sm:$0xff]  ;;  %v308_v30 = vmax.f32 %v276_v18, 0.0  ;;  %v209_v34 = vld [vmem:[%s2789_s23 + $0x58] sm:$0xff] }
  0x16   : > { %390 = vst.msk [vmem:[#allocation2 + $0x180] sm:$0xff] %vm340_vm0, %v2670_v0  ;;  %391 = vst.msk [vmem:[#allocation2 + $0x188] sm:$0xff] %vm340_vm0, %v2670_v0  ;;  %v244_v26 = vmul.f32 %v2782_v1, %v205_v17  ;;  %v309_v31 = vmax.f32 %v277_v20, 0.0  ;;  %v310_v32 = vmax.f32 %v278_v21, 0.0  ;;  %v282_v33 = vadd.f32 %v2794_v2, %v243_v22  ;;  %v210_v35 = vld [vmem:[%s2789_s23 + $0x60] sm:$0xff]  ;;  %v211_v36 = vld [vmem:[%s2789_s23 + $0x68] sm:$0xff] }
  0x17   : > { %393 = vst.msk [vmem:[#allocation2 + $0x198] sm:$0xff] %vm340_vm0, %v2670_v0  ;;  %394 = vst.msk [vmem:[#allocation2 + $0x1a0] sm:$0xff] %vm340_vm0, %v2670_v0  ;;  %v311_v37 = vmax.f32 %v279_v23, 0.0  ;;  %v312_v38 = vmax.f32 %v280_v24, 0.0  ;;  %v313_v39 = vmax.f32 %v281_v25, 0.0  ;;  %v212_v41 = vld [vmem:[%s2789_s23 + $0x70] sm:$0xff]  ;;  %v245_v43 = vmul.f32 %v2782_v1, %v206_v27 }
  0x18   : > { %344 = vst.msk [vmem:[#allocation2 + $0x10] sm:$0x3] %vm343_vm1, %v2670_v0  ;;  %347 = vst.msk [vmem:[#allocation2 + $0x28] sm:$0x3] %vm343_vm1, %v2670_v0  ;;  %v283_v40 = vadd.f32 %v2794_v2, %v244_v26  ;;  %v314_v42 = vmax.f32 %v282_v33, 0.0  ;;  %v246_v44 = vmul.f32 %v2782_v1, %v207_v28  ;;  %v247_v45 = vmul.f32 %v2782_v1, %v208_v29  ;;  %v213_v46 = vld [vmem:[%s2789_s23 + $0x78] sm:$0xff] }
  0x19   : > { %350 = vst.msk [vmem:[#allocation2 + $0x40] sm:$0x3] %vm343_vm1, %v2670_v0  ;;  %353 = vst.msk [vmem:[#allocation2 + $0x58] sm:$0x3] %vm343_vm1, %v2670_v0  ;;  %v248_v48 = vmul.f32 %v2782_v1, %v209_v34  ;;  %v249_v49 = vmul.f32 %v2782_v1, %v210_v35  ;;  %v250_v50 = vmul.f32 %v2782_v1, %v211_v36  ;;  %v214_v55 = vld [vmem:[%s2789_s23 + $0x80] sm:$0xff]  ;;  %v215_v56 = vld [vmem:[%s2789_s23 + $0x88] sm:$0xff] }
  0x1a   : > { %356 = vst.msk [vmem:[#allocation2 + $0x70] sm:$0x3] %vm343_vm1, %v2670_v0  ;;  %359 = vst.msk [vmem:[#allocation2 + $0x88] sm:$0x3] %vm343_vm1, %v2670_v0  ;;  %v315_v47 = vmax.f32 %v283_v40, 0.0  ;;  %v284_v51 = vadd.f32 %v2794_v2, %v245_v43  ;;  %v285_v52 = vadd.f32 %v2794_v2, %v246_v44  ;;  %v286_v53 = vadd.f32 %v2794_v2, %v247_v45  ;;  %v216_v61 = vld [vmem:[%s2789_s23 + $0x90] sm:$0xff] }
  0x1b   : > { %362 = vst.msk [vmem:[#allocation2 + $0xa0] sm:$0x3] %vm343_vm1, %v2670_v0  ;;  %365 = vst.msk [vmem:[#allocation2 + $0xb8] sm:$0x3] %vm343_vm1, %v2670_v0  ;;  %v251_v54 = vmul.f32 %v2782_v1, %v212_v41  ;;  %v287_v57 = vadd.f32 %v2794_v2, %v248_v48  ;;  %v288_v58 = vadd.f32 %v2794_v2, %v249_v49  ;;  %v217_v62 = vld [vmem:[%s2789_s23 + $0x98] sm:$0xff]  ;;  %v218_v63 = vld [vmem:[%s2789_s23 + $0xa0] sm:$0xff] }
  0x1c   : > { %368 = vst.msk [vmem:[#allocation2 + $0xd0] sm:$0x3] %vm343_vm1, %v2670_v0  ;;  %371 = vst.msk [vmem:[#allocation2 + $0xe8] sm:$0x3] %vm343_vm1, %v2670_v0  ;;  %v289_v59 = vadd.f32 %v2794_v2, %v250_v50  ;;  %v252_v60 = vmul.f32 %v2782_v1, %v213_v46  ;;  %v317_v3 = vmax.f32 %v285_v52, 0.0  ;;  %v318_v4 = vmax.f32 %v286_v53, 0.0 }
  0x1d   : > { %374 = vst.msk [vmem:[#allocation2 + $0x100] sm:$0x3] %vm343_vm1, %v2670_v0  ;;  %377 = vst.msk [vmem:[#allocation2 + $0x118] sm:$0x3] %vm343_vm1, %v2670_v0  ;;  %v290_v5 = vadd.f32 %v2794_v2, %v251_v54  ;;  %v219_v6 = vld [vmem:[%s2789_s23 + $0xa8] sm:$0xff]  ;;  %v429_v7 = vld [vmem:[#allocation2] sm:$0xff]  ;;  %v253_v14 = vmul.f32 %v2782_v1, %v214_v55  ;;  %v254_v15 = vmul.f32 %v2782_v1, %v215_v56 }
  0x1e   : > { %380 = vst.msk [vmem:[#allocation2 + $0x130] sm:$0x3] %vm343_vm1, %v2670_v0  ;;  %383 = vst.msk [vmem:[#allocation2 + $0x148] sm:$0x3] %vm343_vm1, %v2670_v0  ;;  %v430_v8 = vld [vmem:[#allocation2 + $0x8] sm:$0xff]  ;;  %v319_v9 = vmax.f32 %v287_v57, 0.0  ;;  %v291_v12 = vadd.f32 %v2794_v2, %v252_v60  ;;  %v255_v16 = vmul.f32 %v2782_v1, %v216_v61  ;;  %v256_v21 = vmul.f32 %v2782_v1, %v217_v62 }
  0x1f   : > { %386 = vst.msk [vmem:[#allocation2 + $0x160] sm:$0x3] %vm343_vm1, %v2670_v0  ;;  %389 = vst.msk [vmem:[#allocation2 + $0x178] sm:$0x3] %vm343_vm1, %v2670_v0  ;;  %v494_v19 = vld [vmem:[#allocation2 + $0x9] sm:$0xff]  ;;  %v320_v10 = vmax.f32 %v288_v58, 0.0  ;;  %v257_v22 = vmul.f32 %v2782_v1, %v218_v63  ;;  %v258_v23 = vmul.f32 %v2782_v1, %v219_v6  ;;  %v292_v25 = vadd.f32 %v2794_v2, %v253_v14 }
  0x20   : > { %392 = vst.msk [vmem:[#allocation2 + $0x190] sm:$0x3] %vm343_vm1, %v2670_v0  ;;  %395 = vst.msk [vmem:[#allocation2 + $0x1a8] sm:$0x3] %vm343_vm1, %v2670_v0  ;;  %559 = vrot.lane.b32.xlu0 %v494_v19, %s2671_s26  ;;  %v316_v0 = vmax.f32 %v284_v51, 0.0  ;;  %v321_v11 = vmax.f32 %v289_v59, 0.0  ;;  %v293_v26 = vadd.f32 %v2794_v2, %v254_v15  ;;  %v294_v27 = vadd.f32 %v2794_v2, %v255_v16 }
  0x21   : > { %397 = vst.msk [vmem:[#allocation2 + $0x19] sm:$0xff] %vm340_vm0, %v308_v30  ;;  %398 = vst.msk [vmem:[#allocation2 + $0x21] sm:$0xff] %vm340_vm0, %v309_v31  ;;  %v322_v13 = vmax.f32 %v290_v5, 0.0  ;;  %v220_v17 = vld [vmem:[%s2789_s23 + $0xb0] sm:$0xff]  ;;  %v323_v20 = vmax.f32 %v291_v12, 0.0  ;;  %v221_v24 = vld [vmem:[%s2789_s23 + $0xb8] sm:$0xff]  ;;  %v295_v31 = vadd.f32 %v2794_v2, %v256_v21  ;;  %v297_v33 = vadd.f32 %v2794_v2, %v258_v23 }
  0x22   : > { %399 = vst.msk [vmem:[#allocation2 + $0x31] sm:$0xff] %vm340_vm0, %v310_v32  ;;  %400 = vst.msk [vmem:[#allocation2 + $0x39] sm:$0xff] %vm340_vm0, %v311_v37  ;;  %v222_v28 = vld [vmem:[%s2789_s23 + $0xc0] sm:$0xff]  ;;  %v296_v32 = vadd.f32 %v2794_v2, %v257_v22  ;;  %v259_v34 = vmul.f32 %v2782_v1, %v220_v17  ;;  %v223_v35 = vld [vmem:[%s2789_s23 + $0xc8] sm:$0xff]  ;;  %v324_v36 = vmax.f32 %v292_v25, 0.0  ;;  %v325_v37 = vmax.f32 %v293_v26, 0.0 }
  0x23   : > { %401 = vst.msk [vmem:[#allocation2 + $0x49] sm:$0xff] %vm340_vm0, %v312_v38  ;;  %402 = vst.msk [vmem:[#allocation2 + $0x51] sm:$0xff] %vm340_vm0, %v313_v39  ;;  %v326_v38 = vmax.f32 %v294_v27, 0.0  ;;  %v260_v39 = vmul.f32 %v2782_v1, %v221_v24  ;;  %v224_v40 = vld [vmem:[%s2789_s23 + $0xd0] sm:$0xff]  ;;  %v225_v41 = vld [vmem:[%s2789_s23 + $0xd8] sm:$0xff]  ;;  %v327_v43 = vmax.f32 %v295_v31, 0.0  ;;  %v261_v49 = vmul.f32 %v2782_v1, %v222_v28 }
  0x24   : > { %403 = vst.msk [vmem:[#allocation2 + $0x61] sm:$0xff] %vm340_vm0, %v314_v42  ;;  %404 = vst.msk [vmem:[#allocation2 + $0x69] sm:$0xff] %vm340_vm0, %v315_v47  ;;  %v226_v42 = vld [vmem:[%s2789_s23 + $0xe0] sm:$0xff]  ;;  %v328_v44 = vmax.f32 %v296_v32, 0.0  ;;  %v329_v45 = vmax.f32 %v297_v33, 0.0  ;;  %v298_v46 = vadd.f32 %v2794_v2, %v259_v34  ;;  %v227_v47 = vld [vmem:[%s2789_s23 + $0xe8] sm:$0xff]  ;;  %v262_v50 = vmul.f32 %v2782_v1, %v223_v35 }
  0x25   : > { %461 = vst.msk [vmem:[#allocation3] sm:$0xff] %vm340_vm0, %v429_v7  ;;  %462 = vst.msk [vmem:[#allocation3 + $0x8] sm:$0xff] %vm340_vm0, %v430_v8  ;;  %v299_v48 = vadd.f32 %v2794_v2, %v260_v39  ;;  %v263_v56 = vmul.f32 %v2782_v1, %v224_v40  ;;  %v264_v57 = vmul.f32 %v2782_v1, %v225_v41 }
  0x26   : > { %405 = vst.msk [vmem:[#allocation2 + $0x79] sm:$0xff] %vm340_vm0, %v316_v0  ;;  %406 = vst.msk [vmem:[#allocation2 + $0x81] sm:$0xff] %vm340_vm0, %v317_v3  ;;  %v330_v55 = vmax.f32 %v298_v46, 0.0  ;;  %v265_v58 = vmul.f32 %v2782_v1, %v226_v42  ;;  %v300_v60 = vadd.f32 %v2794_v2, %v261_v49  ;;  %v301_v61 = vadd.f32 %v2794_v2, %v262_v50 }
  0x27   : > { %407 = vst.msk [vmem:[#allocation2 + $0x91] sm:$0xff] %vm340_vm0, %v318_v4  ;;  %408 = vst.msk [vmem:[#allocation2 + $0x99] sm:$0xff] %vm340_vm0, %v319_v9  ;;  %v331_v59 = vmax.f32 %v299_v48, 0.0  ;;  %v266_v62 = vmul.f32 %v2782_v1, %v227_v47  ;;  %v302_v63 = vadd.f32 %v2794_v2, %v263_v56  ;;  %v303_v0 = vadd.f32 %v2794_v2, %v264_v57 }
  0x28   : > { %v2869_v18 = vld [vmem:[#allocation2 + $0x19] sm:$0xff]  ;;  %409 = vst.msk [vmem:[#allocation2 + $0xa9] sm:$0xff] %vm340_vm0, %v320_v10  ;;  %410 = vst.msk [vmem:[#allocation2 + $0xb1] sm:$0xff] %vm340_vm0, %v321_v11  ;;  %v2889_v29 = vld [vmem:[#allocation2 + $0x21] sm:$0xff]  ;;  %v304_v3 = vadd.f32 %v2794_v2, %v265_v58  ;;  %v332_v4 = vmax.f32 %v300_v60, 0.0  ;;  %v333_v5 = vmax.f32 %v301_v61, 0.0 }
  0x29   : > { %v2871_v19 = vld [vmem:[#allocation2 + $0x31] sm:$0xff]  ;;  %561 = vrot.lane.b32.xlu1 %v2869_v18, %s2671_s26  ;;  %411 = vst.msk [vmem:[#allocation2 + $0xc1] sm:$0xff] %vm340_vm0, %v322_v13  ;;  %412 = vst.msk [vmem:[#allocation2 + $0xc9] sm:$0xff] %vm340_vm0, %v323_v20  ;;  %v2914_v52 = vld [vmem:[#allocation2 + $0x20] sm:$0xff]  ;;  %v305_v6 = vadd.f32 %v2794_v2, %v266_v62  ;;  %v334_v9 = vmax.f32 %v302_v63, 0.0  ;;  %v335_v10 = vmax.f32 %v303_v0, 0.0 }
  0x2a   : > { %565 = vrot.lane.b32.xlu0 %v2871_v19, %s2671_s26  ;;  %v499_v30 = vld [vmem:[#allocation2 + $0x49] sm:$0xff]  ;;  %413 = vst.msk [vmem:[#allocation2 + $0xd9] sm:$0xff] %vm340_vm0, %v324_v36  ;;  %414 = vst.msk [vmem:[#allocation2 + $0xe1] sm:$0xff] %vm340_vm0, %v325_v37  ;;  %v2912_v51 = vld [vmem:[#allocation2 + $0x18] sm:$0xff]  ;;  %v336_v11 = vmax.f32 %v304_v3, 0.0 }
  0x2b   : > { %415 = vst.msk [vmem:[#allocation2 + $0xf1] sm:$0xff] %vm340_vm0, %v326_v38  ;;  %v2916_v53 = vld [vmem:[#allocation2 + $0x39] sm:$0xff]  ;;  %v501_v54 = vld [vmem:[#allocation2 + $0x61] sm:$0xff]  ;;  %416 = vst.msk [vmem:[#allocation2 + $0xf9] sm:$0xff] %vm340_vm0, %v327_v43  ;;  %v337_v12 = vmax.f32 %v305_v6, 0.0 }
  0x2c   : > { %417 = vst.msk [vmem:[#allocation2 + $0x109] sm:$0xff] %vm340_vm0, %v328_v44  ;;  %418 = vst.msk [vmem:[#allocation2 + $0x111] sm:$0xff] %vm340_vm0, %v329_v45  ;;  %v500_v7 = vld [vmem:[#allocation2 + $0x51] sm:$0xff]  ;;  %v502_v15 = vld [vmem:[#allocation2 + $0x69] sm:$0xff] }
  0x2d   : > { %563 = vrot.lane.b32.xlu1 %v2889_v29, %s2671_s26  ;;  %463 = vst.msk [vmem:[#allocation3 + $0x10] sm:$0xff] %vm340_vm0, %v2912_v51  ;;  %464 = vst.msk [vmem:[#allocation3 + $0x18] sm:$0xff] %vm340_vm0, %v2914_v52  ;;  %v503_v8 = vld [vmem:[#allocation2 + $0x79] sm:$0xff]  ;;  %v2942_v13 = vld [vmem:[#allocation2 + $0x30] sm:$0xff] }
  0x2e   : > { %569 = vrot.lane.b32.xlu0 %v499_v30, %s2671_s26  ;;  %419 = vst.msk [vmem:[#allocation2 + $0x121] sm:$0xff] %vm340_vm0, %v330_v55  ;;  %420 = vst.msk [vmem:[#allocation2 + $0x129] sm:$0xff] %vm340_vm0, %v331_v59  ;;  %v2944_v14 = vld [vmem:[#allocation2 + $0x38] sm:$0xff]  ;;  %v2958_v17 = vld [vmem:[#allocation2 + $0x48] sm:$0xff] }
  0x2f   : > { %421 = vst.msk [vmem:[#allocation2 + $0x139] sm:$0xff] %vm340_vm0, %v332_v4  ;;  %422 = vst.msk [vmem:[#allocation2 + $0x141] sm:$0xff] %vm340_vm0, %v333_v5  ;;  %v505_v16 = vld [vmem:[#allocation2 + $0x91] sm:$0xff]  ;;  %v504_v21 = vld [vmem:[#allocation2 + $0x81] sm:$0xff] }
  0x30   : > { %423 = vst.msk [vmem:[#allocation2 + $0x151] sm:$0xff] %vm340_vm0, %v334_v9  ;;  %424 = vst.msk [vmem:[#allocation2 + $0x159] sm:$0xff] %vm340_vm0, %v335_v10  ;;  %v2960_v20 = vld [vmem:[#allocation2 + $0x50] sm:$0xff]  ;;  %v506_v23 = vld [vmem:[#allocation2 + $0x99] sm:$0xff] }
  0x31   : > { %567 = vrot.lane.b32.xlu1 %v2916_v53, %s2671_s26  ;;  %425 = vst.msk [vmem:[#allocation2 + $0x169] sm:$0xff] %vm340_vm0, %v336_v11  ;;  %465 = vst.msk [vmem:[#allocation3 + $0x20] sm:$0xff] %vm340_vm0, %v2942_v13  ;;  %v507_v22 = vld [vmem:[#allocation2 + $0xa9] sm:$0xff]  ;;  %v509_v24 = vld [vmem:[#allocation2 + $0xc1] sm:$0xff] }
  0x32   : > { %573 = vrot.lane.b32.xlu0 %v501_v54, %s2671_s26  ;;  %466 = vst.msk [vmem:[#allocation3 + $0x28] sm:$0xff] %vm340_vm0, %v2944_v14  ;;  %426 = vst.msk [vmem:[#allocation2 + $0x171] sm:$0xff] %vm340_vm0, %v337_v12  ;;  %v2968_v25 = vld [vmem:[#allocation2 + $0x60] sm:$0xff]  ;;  %v2970_v26 = vld [vmem:[#allocation2 + $0x68] sm:$0xff] }
  0x33   : > { %467 = vst.msk [vmem:[#allocation3 + $0x30] sm:$0xff] %vm340_vm0, %v2958_v17  ;;  %468 = vst.msk [vmem:[#allocation3 + $0x38] sm:$0xff] %vm340_vm0, %v2960_v20  ;;  %v2972_v27 = vld [vmem:[#allocation2 + $0x78] sm:$0xff]  ;;  %v2980_v28 = vld [vmem:[#allocation2 + $0x80] sm:$0xff] }
  0x34   : > { %469 = vst.msk [vmem:[#allocation3 + $0x40] sm:$0xff] %vm340_vm0, %v2968_v25  ;;  %470 = vst.msk [vmem:[#allocation3 + $0x48] sm:$0xff] %vm340_vm0, %v2970_v26  ;;  %v2982_v30 = vld [vmem:[#allocation2 + $0x90] sm:$0xff]  ;;  %v2984_v31 = vld [vmem:[#allocation2 + $0x98] sm:$0xff] }
  0x35   : > { %571 = vrot.lane.b32.xlu1 %v500_v7, %s2671_s26  ;;  %471 = vst.msk [vmem:[#allocation3 + $0x50] sm:$0xff] %vm340_vm0, %v2972_v27  ;;  %v508_v32 = vld [vmem:[#allocation2 + $0xb1] sm:$0xff]  ;;  %472 = vst.msk [vmem:[#allocation3 + $0x58] sm:$0xff] %vm340_vm0, %v2980_v28  ;;  %v2992_v33 = vld [vmem:[#allocation2 + $0xa8] sm:$0xff] }
  0x36   : > { %577 = vrot.lane.b32.xlu0 %v503_v8, %s2671_s26  ;;  %473 = vst.msk [vmem:[#allocation3 + $0x60] sm:$0xff] %vm340_vm0, %v2982_v30  ;;  %474 = vst.msk [vmem:[#allocation3 + $0x68] sm:$0xff] %vm340_vm0, %v2984_v31  ;;  %v2994_v34 = vld [vmem:[#allocation2 + $0xb0] sm:$0xff]  ;;  %v2996_v35 = vld [vmem:[#allocation2 + $0xc0] sm:$0xff] }
  0x37   : > { %475 = vst.msk [vmem:[#allocation3 + $0x70] sm:$0xff] %vm340_vm0, %v2992_v33  ;;  %476 = vst.msk [vmem:[#allocation3 + $0x78] sm:$0xff] %vm340_vm0, %v2994_v34  ;;  %v3006_v36 = vld [vmem:[#allocation2 + $0xc8] sm:$0xff]  ;;  %v3008_v37 = vld [vmem:[#allocation2 + $0xd8] sm:$0xff] }
  0x38   : > { %477 = vst.msk [vmem:[#allocation3 + $0x80] sm:$0xff] %vm340_vm0, %v2996_v35  ;;  %v3010_v38 = vld [vmem:[#allocation2 + $0xe0] sm:$0xff]  ;;  %478 = vst.msk [vmem:[#allocation3 + $0x88] sm:$0xff] %vm340_vm0, %v3006_v36  ;;  %v3020_v40 = vld [vmem:[#allocation2 + $0xf0] sm:$0xff] }
  0x39   : > { %575 = vrot.lane.b32.xlu1 %v502_v15, %s2671_s26  ;;  %v3012_v39 = vld [vmem:[#allocation2 + $0xd9] sm:$0xff]  ;;  %479 = vst.msk [vmem:[#allocation3 + $0x90] sm:$0xff] %vm340_vm0, %v3008_v37  ;;  %480 = vst.msk [vmem:[#allocation3 + $0x98] sm:$0xff] %vm340_vm0, %v3010_v38  ;;  %v3031_v42 = vld [vmem:[#allocation2 + $0x108] sm:$0xff] }
  0x3a   : > { %581 = vrot.lane.b32.xlu0 %v505_v16, %s2671_s26  ;;  %v3022_v41 = vld [vmem:[#allocation2 + $0xf8] sm:$0xff]  ;;  %481 = vst.msk [vmem:[#allocation3 + $0xa0] sm:$0xff] %vm340_vm0, %v3020_v40  ;;  %v3033_v43 = vld [vmem:[#allocation2 + $0x110] sm:$0xff]  ;;  %483 = vst.msk [vmem:[#allocation3 + $0xb0] sm:$0xff] %vm340_vm0, %v3031_v42 }
  0x3b   : > { %482 = vst.msk [vmem:[#allocation3 + $0xa8] sm:$0xff] %vm340_vm0, %v3022_v41  ;;  %v510_v44 = vld [vmem:[#allocation2 + $0xc9] sm:$0xff]  ;;  %v3035_v45 = vld [vmem:[#allocation2 + $0xf1] sm:$0xff]  ;;  %484 = vst.msk [vmem:[#allocation3 + $0xb8] sm:$0xff] %vm340_vm0, %v3033_v43 }
  0x3c   : > { %v3044_v46 = vld [vmem:[#allocation2 + $0x120] sm:$0xff]  ;;  %v3046_v47 = vld [vmem:[#allocation2 + $0x128] sm:$0xff]  ;;  %v3060_v50 = vld [vmem:[#allocation2 + $0x138] sm:$0xff] }
  0x3d   : > { %579 = vrot.lane.b32.xlu1 %v504_v21, %s2671_s26  ;;  %v3048_v48 = vld [vmem:[#allocation2 + $0xe1] sm:$0xff]  ;;  %v3050_v49 = vld [vmem:[#allocation2 + $0x109] sm:$0xff]  ;;  %485 = vst.msk [vmem:[#allocation3 + $0xc0] sm:$0xff] %vm340_vm0, %v3044_v46  ;;  %486 = vst.msk [vmem:[#allocation3 + $0xc8] sm:$0xff] %vm340_vm0, %v3046_v47 }
  0x3e   : > { %585 = vrot.lane.b32.xlu0 %v507_v22, %s2671_s26  ;;  %v3062_v54 = vld [vmem:[#allocation2 + $0x140] sm:$0xff]  ;;  %487 = vst.msk [vmem:[#allocation3 + $0xd0] sm:$0xff] %vm340_vm0, %v3060_v50  ;;  %v3073_v57 = vld [vmem:[#allocation2 + $0x150] sm:$0xff]  ;;  %v3075_v58 = vld [vmem:[#allocation2 + $0x158] sm:$0xff] }
  0x3f   : > { %v3064_v55 = vld [vmem:[#allocation2 + $0xf9] sm:$0xff]  ;;  %v517_v56 = vld [vmem:[#allocation2 + $0x121] sm:$0xff]  ;;  %488 = vst.msk [vmem:[#allocation3 + $0xd8] sm:$0xff] %vm340_vm0, %v3062_v54  ;;  %v3077_v59 = vld [vmem:[#allocation2 + $0x111] sm:$0xff] }
  0x40   : > { %v519_v60 = vld [vmem:[#allocation2 + $0x139] sm:$0xff]  ;;  %489 = vst.msk [vmem:[#allocation3 + $0xe0] sm:$0xff] %vm340_vm0, %v3073_v57  ;;  %490 = vst.msk [vmem:[#allocation3 + $0xe8] sm:$0xff] %vm340_vm0, %v3075_v58  ;;  %v3086_v61 = vld [vmem:[#allocation2 + $0x168] sm:$0xff] }
  0x41   : > { %583 = vrot.lane.b32.xlu1 %v506_v23, %s2671_s26  ;;  %v3088_v62 = vld [vmem:[#allocation2 + $0x170] sm:$0xff]  ;;  %491 = vst.msk [vmem:[#allocation3 + $0xf0] sm:$0xff] %vm340_vm0, %v3086_v61  ;;  %v229_v5 = vld [vmem:[%s2789_s23 + $0xf8] sm:$0xff]  ;;  %v520_v9 = vld [vmem:[#allocation2 + $0x141] sm:$0xff] }
  0x42   : > { %589 = vrot.lane.b32.xlu0 %v509_v24, %s2671_s26  ;;  %v228_v63 = vld [vmem:[%s2789_s23 + $0xf0] sm:$0xff]  ;;  %492 = vst.msk [vmem:[#allocation3 + $0xf8] sm:$0xff] %vm340_vm0, %v3088_v62  ;;  %v268_v6 = vmul.f32 %v2782_v1, %v229_v5  ;;  %v686_v15 = vld [vmem:[#allocation2 + $0x2] sm:$0xff]  ;;  %v3108_v16 = vld [vmem:[#allocation2 + $0x1a] sm:$0xff]  ;;  %s3736_s23 = scalar_lea.vmem %s3845_s4, %s2534_s18 }
  0x43   : > { %v518_v0 = vld [vmem:[#allocation2 + $0x129] sm:$0xff]  ;;  %v521_v3 = vld [vmem:[#allocation2 + $0x151] sm:$0xff]  ;;  %v267_v4 = vmul.f32 %v2782_v1, %v228_v63  ;;  %v522_v1 = vld [vmem:[#allocation2 + $0x159] sm:$0xff] }
  0x44   : > { %v307_v8 = vadd.f32 %v2794_v2, %v268_v6  ;;  %v523_v10 = vld [vmem:[#allocation2 + $0x169] sm:$0xff]  ;;  %v3113_v22 = vld [vmem:[#allocation2 + $0x32] sm:$0xff]  ;;  %v699_v5 = vld [vmem:[#allocation2 + $0x9a] sm:$0xff] }
  0x45   : > { %587 = vrot.lane.b32.xlu1 %v508_v32, %s2671_s26  ;;  %v306_v7 = vadd.f32 %v2794_v2, %v267_v4  ;;  %v524_v2 = vld [vmem:[#allocation2 + $0x171] sm:$0xff]  ;;  %v3118_v23 = vld [vmem:[#allocation2 + $0x22] sm:$0xff]  ;;  %v3126_v32 = vld [vmem:[#allocation2 + $0x3a] sm:$0xff] }
  0x46   : > { %593 = vrot.lane.b32.xlu0 %v3012_v39, %s2671_s26  ;;  %v339_v12 = vmax.f32 %v307_v8, 0.0  ;;  %v687_v21 = vld [vmem:[#allocation2 + $0xa] sm:$0xff]  ;;  %v702_v6 = vld [vmem:[#allocation2 + $0xc2] sm:$0xff]  ;;  %v3145_v8 = vld [vmem:[#allocation2 + $0xda] sm:$0xff] }
  0x47   : > { %v338_v11 = vmax.f32 %v306_v7, 0.0  ;;  %v3120_v24 = vld [vmem:[#allocation2 + $0x4a] sm:$0xff]  ;;  %v701_v7 = vld [vmem:[#allocation2 + $0xb2] sm:$0xff] }
  0x48   : > { %428 = vst.msk [vmem:[#allocation2 + $0x189] sm:$0xff] %vm340_vm0, %v339_v12  ;;  %v695_v63 = vld [vmem:[#allocation2 + $0x6a] sm:$0xff] }
  0x49   : > { %591 = vrot.lane.b32.xlu1 %v510_v44, %s2671_s26  ;;  %427 = vst.msk [vmem:[#allocation2 + $0x181] sm:$0xff] %vm340_vm0, %v338_v11  ;;  %v3128_v44 = vld [vmem:[#allocation2 + $0x62] sm:$0xff]  ;;  %v700_v4 = vld [vmem:[#allocation2 + $0xaa] sm:$0xff] }
  0x4a   : > { %597 = vrot.lane.b32.xlu0 %v3035_v45, %s2671_s26  ;;  %v3155_v11 = vld [vmem:[#allocation2 + $0xe2] sm:$0xff]  ;;  %v3157_v12 = vld [vmem:[#allocation2 + $0x10a] sm:$0xff] }
  0x4d   : > { %595 = vrot.lane.b32.xlu1 %v3048_v48, %s2671_s26 }
  0x4e   : > { %601 = vrot.lane.b32.xlu0 %v3050_v49, %s2671_s26 }
  0x51   : > { %599 = vrot.lane.b32.xlu1 %v3064_v55, %s2671_s26 }
  0x52   : > { %605 = vrot.lane.b32.xlu0 %v517_v56, %s2671_s26  ;;  %v3134_v56 = vld [vmem:[#allocation2 + $0x52] sm:$0xff] }
  0x55   : > { %603 = vrot.lane.b32.xlu1 %v3077_v59, %s2671_s26 }
  0x56   : > { %609 = vrot.lane.b32.xlu0 %v519_v60, %s2671_s26  ;;  %v696_v60 = vld [vmem:[#allocation2 + $0x7a] sm:$0xff] }
  0x59   : > { %607 = vrot.lane.b32.xlu1 %v518_v0, %s2671_s26  ;;  %v698_v0 = vld [vmem:[#allocation2 + $0x92] sm:$0xff] }
  0x5a   : > { %613 = vrot.lane.b32.xlu0 %v521_v3, %s2671_s26  ;;  %v697_v3 = vld [vmem:[#allocation2 + $0x82] sm:$0xff] }
  0x5d   : > { %611 = vrot.lane.b32.xlu1 %v520_v9, %s2671_s26  ;;  %v703_v9 = vld [vmem:[#allocation2 + $0xca] sm:$0xff] }
  0x5e   : > { %617 = vrot.lane.b32.xlu0 %v523_v10, %s2671_s26  ;;  %v3150_v10 = vld [vmem:[#allocation2 + $0xf2] sm:$0xff] }
  0x61   : > { %615 = vrot.lane.b32.xlu1 %v522_v1, %s2671_s26  ;;  %v3163_v1 = vld [vmem:[#allocation2 + $0xfa] sm:$0xff] }
  0x62   : > { %750 = vrot.lane.b32.xlu0 %v686_v15, %s2672_s27  ;;  %v3165_v15 = vld [vmem:[#allocation2 + $0x122] sm:$0xff] }
  0x65   : > { %619 = vrot.lane.b32.xlu1 %v524_v2, %s2671_s26 }
  0x66   : > { %754 = vrot.lane.b32.xlu0 %v3108_v16, %s2672_s27 }
  0x69   : > { %752 = vrot.lane.b32.xlu1 %v687_v21, %s2672_s27  ;;  %v3172_v21 = vld [vmem:[#allocation2 + $0x112] sm:$0xff] }
  0x6a   : > { %758 = vrot.lane.b32.xlu0 %v3113_v22, %s2672_s27 }
  0x6d   : > { %756 = vrot.lane.b32.xlu1 %v3118_v23, %s2672_s27 }
  0x6e   : > { %762 = vrot.lane.b32.xlu0 %v3120_v24, %s2672_s27 }
  0x71   : > { %760 = vrot.lane.b32.xlu1 %v3126_v32, %s2672_s27 }
  0x72   : > { %766 = vrot.lane.b32.xlu0 %v3128_v44, %s2672_s27 }
  0x75   : > { %764 = vrot.lane.b32.xlu1 %v3134_v56, %s2672_s27 }
  0x76   : > { %770 = vrot.lane.b32.xlu0 %v696_v60, %s2672_s27  ;;  %v712_v60 = vld [vmem:[#allocation2 + $0x13a] sm:$0xff] }
  0x79   : > { %768 = vrot.lane.b32.xlu1 %v695_v63, %s2672_s27 }
  0x7a   : > { %774 = vrot.lane.b32.xlu0 %v698_v0, %s2672_s27  ;;  %v3178_v0 = vld [vmem:[#allocation2 + $0x12a] sm:$0xff] }
  0x7d   : > { %772 = vrot.lane.b32.xlu1 %v697_v3, %s2672_s27  ;;  %v714_v3 = vld [vmem:[#allocation2 + $0x152] sm:$0xff] }
  0x7e   : > { %778 = vrot.lane.b32.xlu0 %v700_v4, %s2672_s27  ;;  %v713_v4 = vld [vmem:[#allocation2 + $0x142] sm:$0xff] }
  0x80   : > { %v558_v2 = vpop.permute.xlu0 %557 }
  0x81   : > { %776 = vrot.lane.b32.xlu1 %v699_v5, %s2672_s27  ;;  %654 = vst.msk [vmem:[#allocation3] sm:$0xff] %vm653_vm2, %v558_v2  ;;  %v716_v5 = vld [vmem:[#allocation2 + $0x16a] sm:$0xff] }
  0x82   : > { %782 = vrot.lane.b32.xlu0 %v702_v6, %s2672_s27 }
  0x85   : > { %780 = vrot.lane.b32.xlu1 %v701_v7, %s2672_s27 }
  0x86   : > { %786 = vrot.lane.b32.xlu0 %v3145_v8, %s2672_s27 }
  0x89   : > { %784 = vrot.lane.b32.xlu1 %v703_v9, %s2672_s27  ;;  %v715_v9 = vld [vmem:[#allocation2 + $0x15a] sm:$0xff] }
  0x8a   : > { %790 = vrot.lane.b32.xlu0 %v3150_v10, %s2672_s27 }
  0x8d   : > { %788 = vrot.lane.b32.xlu1 %v3155_v11, %s2672_s27 }
  0x8e   : > { %794 = vrot.lane.b32.xlu0 %v3157_v12, %s2672_s27 }
  0x91   : > { %792 = vrot.lane.b32.xlu1 %v3163_v1, %s2672_s27 }
  0x92   : > { %798 = vrot.lane.b32.xlu0 %v3165_v15, %s2672_s27  ;;  %v560_v63 = vpop.permute.xlu0 %559 }
  0x93   : > { %655 = vst.msk [vmem:[#allocation3 + $0x8] sm:$0xff] %vm653_vm2, %v560_v63  ;;  %v717_v63 = vld [vmem:[#allocation2 + $0x172] sm:$0xff] }
  0x95   : > { %796 = vrot.lane.b32.xlu1 %v3172_v21, %s2672_s27 }
  0x96   : > { %802 = vrot.lane.b32.xlu0 %v712_v60, %s2672_s27 }
  0x99   : > { %800 = vrot.lane.b32.xlu1 %v3178_v0, %s2672_s27 }
  0x9a   : > { %806 = vrot.lane.b32.xlu0 %v714_v3, %s2672_s27 }
  0x9b   : > { %v562_v6 = vpop.permute.xlu1 %561 }
  0x9c   : > { %v566_v7 = vpop.permute.xlu0 %565  ;;  %656 = vst.msk [vmem:[#allocation3 + $0x10] sm:$0xff] %vm653_vm2, %v562_v6 }
  0x9d   : > { %658 = vst.msk [vmem:[#allocation3 + $0x20] sm:$0xff] %vm653_vm2, %v566_v7  ;;  %804 = vrot.lane.b32.xlu1 %v713_v4, %s2672_s27 }
  0x9e   : > { %810 = vrot.lane.b32.xlu0 %v716_v5, %s2672_s27 }
  0x9f   : > { %v564_v2 = vpop.permute.xlu1 %563 }
  0xa0   : > { %v570_v60 = vpop.permute.xlu0 %569  ;;  %657 = vst.msk [vmem:[#allocation3 + $0x18] sm:$0xff] %vm653_vm2, %v564_v2 }
  0xa1   : > { %660 = vst.msk [vmem:[#allocation3 + $0x30] sm:$0xff] %vm653_vm2, %v570_v60  ;;  %808 = vrot.lane.b32.xlu1 %v715_v9, %s2672_s27 }
  0xa2   : > { %943 = vrot.lane.b32.xlu0 %v2912_v51, %s2673_s28 }
  0xa3   : > { %v568_v3 = vpop.permute.xlu1 %567 }
  0xa4   : > { %v574_v6 = vpop.permute.xlu0 %573  ;;  %659 = vst.msk [vmem:[#allocation3 + $0x28] sm:$0xff] %vm653_vm2, %v568_v3 }
  0xa5   : > { %662 = vst.msk [vmem:[#allocation3 + $0x40] sm:$0xff] %vm653_vm2, %v574_v6  ;;  %812 = vrot.lane.b32.xlu1 %v717_v63, %s2672_s27 }
  0xa6   : > { %947 = vrot.lane.b32.xlu0 %v2942_v13, %s2673_s28 }
  0xa7   : > { %v572_v4 = vpop.permute.xlu1 %571 }
  0xa8   : > { %v578_v5 = vpop.permute.xlu0 %577  ;;  %661 = vst.msk [vmem:[#allocation3 + $0x38] sm:$0xff] %vm653_vm2, %v572_v4 }
  0xa9   : > { %664 = vst.msk [vmem:[#allocation3 + $0x50] sm:$0xff] %vm653_vm2, %v578_v5  ;;  %945 = vrot.lane.b32.xlu1 %v2914_v52, %s2673_s28 }
  0xaa   : > { %951 = vrot.lane.b32.xlu0 %v2958_v17, %s2673_s28 }
  0xab   : > { %v576_v51 = vpop.permute.xlu1 %575 }
  0xac   : > { %v582_v7 = vpop.permute.xlu0 %581  ;;  %663 = vst.msk [vmem:[#allocation3 + $0x48] sm:$0xff] %vm653_vm2, %v576_v51 }
  0xad   : > { %666 = vst.msk [vmem:[#allocation3 + $0x60] sm:$0xff] %vm653_vm2, %v582_v7  ;;  %949 = vrot.lane.b32.xlu1 %v2944_v14, %s2673_s28 }
  0xae   : > { %955 = vrot.lane.b32.xlu0 %v2968_v25, %s2673_s28 }
  0xaf   : > { %v580_v9 = vpop.permute.xlu1 %579 }
  0xb0   : > { %v586_v2 = vpop.permute.xlu0 %585  ;;  %665 = vst.msk [vmem:[#allocation3 + $0x58] sm:$0xff] %vm653_vm2, %v580_v9 }
  0xb1   : > { %668 = vst.msk [vmem:[#allocation3 + $0x70] sm:$0xff] %vm653_vm2, %v586_v2  ;;  %953 = vrot.lane.b32.xlu1 %v2960_v20, %s2673_s28 }
  0xb2   : > { %959 = vrot.lane.b32.xlu0 %v2972_v27, %s2673_s28 }
  0xb3   : > { %v584_v52 = vpop.permute.xlu1 %583 }
  0xb4   : > { %v590_v60 = vpop.permute.xlu0 %589  ;;  %667 = vst.msk [vmem:[#allocation3 + $0x68] sm:$0xff] %vm653_vm2, %v584_v52 }
  0xb5   : > { %670 = vst.msk [vmem:[#allocation3 + $0x80] sm:$0xff] %vm653_vm2, %v590_v60  ;;  %957 = vrot.lane.b32.xlu1 %v2970_v26, %s2673_s28  ;;  %v909_v60 = vld [vmem:[#allocation2 + $0x180] sm:$0xff] }
  0xb6   : > { %963 = vrot.lane.b32.xlu0 %v2982_v30, %s2673_s28 }
  0xb7   : > { %v588_v63 = vpop.permute.xlu1 %587 }
  0xb8   : > { %v594_v3 = vpop.permute.xlu0 %593  ;;  %669 = vst.msk [vmem:[#allocation3 + $0x78] sm:$0xff] %vm653_vm2, %v588_v63 }
  0xb9   : > { %672 = vst.msk [vmem:[#allocation3 + $0x90] sm:$0xff] %vm653_vm2, %v594_v3  ;;  %961 = vrot.lane.b32.xlu1 %v2980_v28, %s2673_s28 }
  0xba   : > { %967 = vrot.lane.b32.xlu0 %v2992_v33, %s2673_s28 }
  0xbb   : > { %v592_v6 = vpop.permute.xlu1 %591 }
  0xbc   : > { %v598_v4 = vpop.permute.xlu0 %597  ;;  %671 = vst.msk [vmem:[#allocation3 + $0x88] sm:$0xff] %vm653_vm2, %v592_v6 }
  0xbd   : > { %674 = vst.msk [vmem:[#allocation3 + $0xa0] sm:$0xff] %vm653_vm2, %v598_v4  ;;  %965 = vrot.lane.b32.xlu1 %v2984_v31, %s2673_s28 }
  0xbe   : > { %971 = vrot.lane.b32.xlu0 %v2996_v35, %s2673_s28 }
  0xbf   : > { %v596_v30 = vpop.permute.xlu1 %595 }
  0xc0   : > { %v602_v5 = vpop.permute.xlu0 %601  ;;  %673 = vst.msk [vmem:[#allocation3 + $0x98] sm:$0xff] %vm653_vm2, %v596_v30 }
  0xc1   : > { %676 = vst.msk [vmem:[#allocation3 + $0xb0] sm:$0xff] %vm653_vm2, %v602_v5  ;;  %969 = vrot.lane.b32.xlu1 %v2994_v34, %s2673_s28 }
  0xc2   : > { %975 = vrot.lane.b32.xlu0 %v3008_v37, %s2673_s28 }
  0xc3   : > { %v600_v33 = vpop.permute.xlu1 %599 }
  0xc4   : > { %v606_v51 = vpop.permute.xlu0 %605  ;;  %675 = vst.msk [vmem:[#allocation3 + $0xa8] sm:$0xff] %vm653_vm2, %v600_v33 }
  0xc5   : > { %678 = vst.msk [vmem:[#allocation3 + $0xc0] sm:$0xff] %vm653_vm2, %v606_v51  ;;  %973 = vrot.lane.b32.xlu1 %v3006_v36, %s2673_s28 }
  0xc6   : > { %979 = vrot.lane.b32.xlu0 %v3020_v40, %s2673_s28 }
  0xc7   : > { %v604_v31 = vpop.permute.xlu1 %603 }
  0xc8   : > { %v610_v35 = vpop.permute.xlu0 %609  ;;  %677 = vst.msk [vmem:[#allocation3 + $0xb8] sm:$0xff] %vm653_vm2, %v604_v31 }
  0xc9   : > { %680 = vst.msk [vmem:[#allocation3 + $0xd0] sm:$0xff] %vm653_vm2, %v610_v35  ;;  %977 = vrot.lane.b32.xlu1 %v3010_v38, %s2673_s28 }
  0xca   : > { %983 = vrot.lane.b32.xlu0 %v3031_v42, %s2673_s28 }
  0xcb   : > { %v608_v34 = vpop.permute.xlu1 %607 }
  0xcc   : > { %v614_v37 = vpop.permute.xlu0 %613  ;;  %679 = vst.msk [vmem:[#allocation3 + $0xc8] sm:$0xff] %vm653_vm2, %v608_v34  ;;  %v2071_v34 = vld [vmem:[%s3844_s3 + $0x8] sm:$0xff] }
  0xcd   : > { %682 = vst.msk [vmem:[#allocation3 + $0xe0] sm:$0xff] %vm653_vm2, %v614_v37  ;;  %981 = vrot.lane.b32.xlu1 %v3022_v41, %s2673_s28 }
  0xce   : > { %987 = vrot.lane.b32.xlu0 %v3044_v46, %s2673_s28 }
  0xcf   : > { %v612_v36 = vpop.permute.xlu1 %611 }
  0xd0   : > { %v618_v7 = vpop.permute.xlu0 %617  ;;  %681 = vst.msk [vmem:[#allocation3 + $0xd8] sm:$0xff] %vm653_vm2, %v612_v36 }
  0xd1   : > { %684 = vst.msk [vmem:[#allocation3 + $0xf0] sm:$0xff] %vm653_vm2, %v618_v7  ;;  %985 = vrot.lane.b32.xlu1 %v3033_v43, %s2673_s28 }
  0xd2   : > { %991 = vrot.lane.b32.xlu0 %v3060_v50, %s2673_s28 }
  0xd3   : > { %v616_v38 = vpop.permute.xlu1 %615 }
  0xd4   : > { %v751_v9 = vpop.permute.xlu0 %750  ;;  %683 = vst.msk [vmem:[#allocation3 + $0xe8] sm:$0xff] %vm653_vm2, %v616_v38  ;;  %v2073_v38 = vld [vmem:[%s3844_s3 + $0x18] sm:$0xff] }
  0xd5   : > { %847 = vst.msk [vmem:[#allocation3] sm:$0xff] %vm846_vm3, %v751_v9  ;;  %989 = vrot.lane.b32.xlu1 %v3046_v47, %s2673_s28 }
  0xd6   : > { %995 = vrot.lane.b32.xlu0 %v3073_v57, %s2673_s28 }
  0xd7   : > { %v620_v2 = vpop.permute.xlu1 %619 }
  0xd8   : > { %v755_v52 = vpop.permute.xlu0 %754  ;;  %685 = vst.msk [vmem:[#allocation3 + $0xf8] sm:$0xff] %vm653_vm2, %v620_v2 }
  0xd9   : > { %849 = vst.msk [vmem:[#allocation3 + $0x10] sm:$0xff] %vm846_vm3, %v755_v52  ;;  %993 = vrot.lane.b32.xlu1 %v3062_v54, %s2673_s28 }
  0xda   : > { %999 = vrot.lane.b32.xlu0 %v3086_v61, %s2673_s28  ;;  %v910_v61 = vld [vmem:[#allocation2 + $0x188] sm:$0xff] }
  0xdb   : > { %v753_v63 = vpop.permute.xlu1 %752 }
  0xdc   : > { %v759_v3 = vpop.permute.xlu0 %758  ;;  %848 = vst.msk [vmem:[#allocation3 + $0x8] sm:$0xff] %vm846_vm3, %v753_v63 }
  0xdd   : > { %851 = vst.msk [vmem:[#allocation3 + $0x20] sm:$0xff] %vm846_vm3, %v759_v3  ;;  %997 = vrot.lane.b32.xlu1 %v3075_v58, %s2673_s28  ;;  %v2074_v3 = vld [vmem:[%s3844_s3 + $0x20] sm:$0xf] }
  0xde   : > { %1003 = vrot.lane.b32.xlu0 %v909_v60, %s2673_s28 }
  0xdf   : > { %v757_v6 = vpop.permute.xlu1 %756 }
  0xe0   : > { %v763_v4 = vpop.permute.xlu0 %762  ;;  %850 = vst.msk [vmem:[#allocation3 + $0x18] sm:$0xff] %vm846_vm3, %v757_v6 }
  0xe1   : > { %853 = vst.msk [vmem:[#allocation3 + $0x30] sm:$0xff] %vm846_vm3, %v763_v4  ;;  %1001 = vrot.lane.b32.xlu1 %v3088_v62, %s2673_s28 }
  0xe2   : > { %1136 = vrot.lane.b32.xlu0 %v2869_v18, %s2674_s29 }
  0xe3   : > { %v761_v30 = vpop.permute.xlu1 %760 }
  0xe4   : > { %v767_v5 = vpop.permute.xlu0 %766  ;;  %852 = vst.msk [vmem:[#allocation3 + $0x28] sm:$0xff] %vm846_vm3, %v761_v30 }
  0xe5   : > { %855 = vst.msk [vmem:[#allocation3 + $0x40] sm:$0xff] %vm846_vm3, %v767_v5  ;;  %1005 = vrot.lane.b32.xlu1 %v910_v61, %s2673_s28 }
  0xe6   : > { %1140 = vrot.lane.b32.xlu0 %v2871_v19, %s2674_s29 }
  0xe7   : > { %v765_v33 = vpop.permute.xlu1 %764 }
  0xe8   : > { %v771_v51 = vpop.permute.xlu0 %770  ;;  %854 = vst.msk [vmem:[#allocation3 + $0x38] sm:$0xff] %vm846_vm3, %v765_v33 }
  0xe9   : > { %857 = vst.msk [vmem:[#allocation3 + $0x50] sm:$0xff] %vm846_vm3, %v771_v51  ;;  %1138 = vrot.lane.b32.xlu1 %v2889_v29, %s2674_s29 }
  0xea   : > { %1168 = vrot.lane.b32.xlu0 %v3012_v39, %s2674_s29 }
  0xeb   : > { %v769_v18 = vpop.permute.xlu1 %768 }
  0xec   : > { %v775_v62 = vpop.permute.xlu0 %774  ;;  %856 = vst.msk [vmem:[#allocation3 + $0x48] sm:$0xff] %vm846_vm3, %v769_v18 }
  0xed   : > { %859 = vst.msk [vmem:[#allocation3 + $0x60] sm:$0xff] %vm846_vm3, %v775_v62  ;;  %1142 = vrot.lane.b32.xlu1 %v2916_v53, %s2674_s29 }
  0xee   : > { %1329 = vrot.lane.b32.xlu0 %v3108_v16, %s2675_s30 }
  0xef   : > { %v773_v19 = vpop.permute.xlu1 %772 }
  0xf0   : > { %v779_v31 = vpop.permute.xlu0 %778  ;;  %858 = vst.msk [vmem:[#allocation3 + $0x58] sm:$0xff] %vm846_vm3, %v773_v19 }
  0xf1   : > { %861 = vst.msk [vmem:[#allocation3 + $0x70] sm:$0xff] %vm846_vm3, %v779_v31  ;;  %1170 = vrot.lane.b32.xlu1 %v3048_v48, %s2674_s29  ;;  %v1652_v48 = vld [vmem:[#allocation2 + $0x31] sm:$0xff] }
  0xf2   : > { %1331 = vrot.lane.b32.xlu0 %v3118_v23, %s2675_s30 }
  0xf3   : > { %v777_v29 = vpop.permute.xlu1 %776 }
  0xf4   : > { %v783_v39 = vpop.permute.xlu0 %782  ;;  %860 = vst.msk [vmem:[#allocation3 + $0x68] sm:$0xff] %vm846_vm3, %v777_v29 }
  0xf5   : > { %863 = vst.msk [vmem:[#allocation3 + $0x80] sm:$0xff] %vm846_vm3, %v783_v39  ;;  %1361 = vrot.lane.b32.xlu1 %v3145_v8, %s2675_s30 }
  0xf6   : > { %1523 = vrot.lane.b32.xlu0 %v2942_v13, %s2676_s5 }
  0xf7   : > { %v781_v53 = vpop.permute.xlu1 %780 }
  0xf8   : > { %v787_v16 = vpop.permute.xlu0 %786  ;;  %862 = vst.msk [vmem:[#allocation3 + $0x78] sm:$0xff] %vm846_vm3, %v781_v53 }
  0xf9   : > { %865 = vst.msk [vmem:[#allocation3 + $0x90] sm:$0xff] %vm846_vm3, %v787_v16  ;;  %1363 = vrot.lane.b32.xlu1 %v3155_v11, %s2675_s30 }
  0xfa   : > { %1525 = vrot.lane.b32.xlu0 %v2944_v14, %s2676_s5 }
  0xfb   : > { %v785_v23 = vpop.permute.xlu1 %784 }
  0xfc   : > { %v791_v35 = vpop.permute.xlu0 %790  ;;  %864 = vst.msk [vmem:[#allocation3 + $0x88] sm:$0xff] %vm846_vm3, %v785_v23 }
  0xfd   : > { %867 = vst.msk [vmem:[#allocation3 + $0xa0] sm:$0xff] %vm846_vm3, %v791_v35  ;;  %1555 = vrot.lane.b32.xlu1 %v3020_v40, %s2676_s5  ;;  %v1653_v40 = vld [vmem:[#allocation2 + $0x39] sm:$0xff] }
  0xfe   : > { %1716 = vrot.lane.b32.xlu0 %v1652_v48, %s2677_s6 }
  0xff   : > { %v789_v13 = vpop.permute.xlu1 %788 }
 0x100   : > { %v795_v8 = vpop.permute.xlu0 %794  ;;  %866 = vst.msk [vmem:[#allocation3 + $0x98] sm:$0xff] %vm846_vm3, %v789_v13 }
 0x101   : > { %869 = vst.msk [vmem:[#allocation3 + $0xb0] sm:$0xff] %vm846_vm3, %v795_v8  ;;  %1557 = vrot.lane.b32.xlu1 %v3022_v41, %s2676_s5  ;;  %v2070_v41 = vld [vmem:[%s3844_s3] sm:$0xff] }
 0x102   : > { %1172 = vrot.lane.b32.xlu0 %v3035_v45, %s2674_s29  ;;  %v2631_v7 = vpack.c.bf16 %v2071_v34, %v2070_v41  ;;  %v1271_v41 = vld [vmem:[#allocation2 + $0x62] sm:$0xff] }
 0x103   : > { %v793_v14 = vpop.permute.xlu1 %792 }
 0x104   : > { %v799_v11 = vpop.permute.xlu0 %798  ;;  %868 = vst.msk [vmem:[#allocation3 + $0xa8] sm:$0xff] %vm846_vm3, %v793_v14  ;;  %2632 = vmatprep.subr.bf16.mxu0 %v2631_v7  ;;  %2639 = vmatprep.subr.bf16.mxu1 %v2631_v7 }
 0x105   : > { %871 = vst.msk [vmem:[#allocation3 + $0xc0] sm:$0xff] %vm846_vm3, %v799_v11  ;;  %1748 = vrot.lane.b32.xlu1 %v3035_v45, %s2677_s6  ;;  %v2072_v45 = vld [vmem:[%s3844_s3 + $0x10] sm:$0xff]  ;;  %2634 = vmatpush3.bf16.msra.mxu0 %v2631_v7 }
 0x106   : > { %1750 = vrot.lane.b32.xlu0 %v3064_v55, %s2677_s6  ;;  %2642 = vmatpush3.bf16.msra.mxu1 %v2631_v7  ;;  %v2635_v52 = vpack.c.bf16 %v2073_v38, %v2072_v45 }
 0x107   : > { %v797_v37 = vpop.permute.xlu1 %796 }
 0x108   : > { %v803_v36 = vpop.permute.xlu0 %802  ;;  %870 = vst.msk [vmem:[#allocation3 + $0xb8] sm:$0xff] %vm846_vm3, %v797_v37  ;;  %2636 = vmatprep.subr.bf16.mxu0 %v2635_v52  ;;  %2640 = vmatprep.subr.bf16.mxu1 %v2635_v52 }
 0x109   : > { %873 = vst.msk [vmem:[#allocation3 + $0xd0] sm:$0xff] %vm846_vm3, %v803_v36  ;;  %1718 = vrot.lane.b32.xlu1 %v1653_v40, %s2677_s6  ;;  %2638 = vmatpush3.bf16.msra.mxu0 %v2635_v52 }
 0x10a   : > { %1941 = vrot.lane.b32.xlu0 %v3150_v10, %s2678_s11  ;;  %2643 = vmatpush3.bf16.msra.mxu1 %v2635_v52 }
 0x10b   : > { %v801_v9 = vpop.permute.xlu1 %800  ;;  %2581 = vmatprep.subr.msk.mxu0 %vm2172_vm4, %v2074_v3  ;;  %2641 = vmatprep.subr.msk.mxu1 %vm2172_vm4, %v2074_v3 }
 0x10c   : > { %v807_v2 = vpop.permute.xlu0 %806  ;;  %872 = vst.msk [vmem:[#allocation3 + $0xc8] sm:$0xff] %vm846_vm3, %v801_v9 }
 0x10d   : > { %875 = vst.msk [vmem:[#allocation3 + $0xe0] sm:$0xff] %vm846_vm3, %v807_v2  ;;  %1909 = vrot.lane.b32.xlu1 %v3113_v22, %s2678_s11  ;;  %2582 = vmatpush3.msk.msra.mxu0 %vm2172_vm4, %v2074_v3 }
 0x10e   : > { %1333 = vrot.lane.b32.xlu0 %v3113_v22, %s2675_s30  ;;  %2644 = vmatpush3.msk.msra.mxu1 %vm2172_vm4, %v2074_v3 }
 0x10f   : > { %v805_v60 = vpop.permute.xlu1 %804 }
 0x110   : > { %v811_v63 = vpop.permute.xlu0 %810  ;;  %874 = vst.msk [vmem:[#allocation3 + $0xd8] sm:$0xff] %vm846_vm3, %v805_v60 }
 0x111   : > { %877 = vst.msk [vmem:[#allocation3 + $0xf0] sm:$0xff] %vm846_vm3, %v811_v63  ;;  %1174 = vrot.lane.b32.xlu1 %v3064_v55, %s2674_s29 }
 0x112   : > { %1911 = vrot.lane.b32.xlu0 %v3126_v32, %s2678_s11 }
 0x113   : > { %v809_v22 = vpop.permute.xlu1 %808 }
 0x114   : > { %v944_v6 = vpop.permute.xlu0 %943  ;;  %876 = vst.msk [vmem:[#allocation3 + $0xe8] sm:$0xff] %vm846_vm3, %v809_v22 }
 0x115   : > { %1040 = vst.msk [vmem:[#allocation3] sm:$0xff] %vm1039_vm5, %v944_v6  ;;  %1365 = vrot.lane.b32.xlu1 %v3150_v10, %s2675_s30 }
 0x116   : > { %1335 = vrot.lane.b32.xlu0 %v3126_v32, %s2675_s30  ;;  %v1654_v32 = vld [vmem:[#allocation2 + $0x49] sm:$0xff] }
 0x117   : > { %v813_v55 = vpop.permute.xlu1 %812 }
 0x118   : > { %v948_v4 = vpop.permute.xlu0 %947  ;;  %878 = vst.msk [vmem:[#allocation3 + $0xf8] sm:$0xff] %vm846_vm3, %v813_v55 }
 0x119   : > { %1042 = vst.msk [vmem:[#allocation3 + $0x10] sm:$0xff] %vm1039_vm5, %v948_v4  ;;  %1943 = vrot.lane.b32.xlu1 %v3163_v1, %s2678_s11 }
 0x11a   : > { %1527 = vrot.lane.b32.xlu0 %v2958_v17, %s2676_s5 }
 0x11b   : > { %v946_v61 = vpop.permute.xlu1 %945 }
 0x11c   : > { %v952_v30 = vpop.permute.xlu0 %951  ;;  %1041 = vst.msk [vmem:[#allocation3 + $0x8] sm:$0xff] %vm1039_vm5, %v946_v61 }
 0x11d   : > { %1044 = vst.msk [vmem:[#allocation3 + $0x20] sm:$0xff] %vm1039_vm5, %v952_v30  ;;  %1367 = vrot.lane.b32.xlu1 %v3163_v1, %s2675_s30 }
 0x11e   : > { %1529 = vrot.lane.b32.xlu0 %v2960_v20, %s2676_s5  ;;  %v1655_v20 = vld [vmem:[#allocation2 + $0x51] sm:$0xff] }
 0x11f   : > { %v950_v10 = vpop.permute.xlu1 %949 }
 0x120   : > { %v956_v5 = vpop.permute.xlu0 %955  ;;  %1043 = vst.msk [vmem:[#allocation3 + $0x18] sm:$0xff] %vm1039_vm5, %v950_v10  ;;  %v1867_v10 = vld [vmem:[#allocation2 + $0x13a] sm:$0xff] }
 0x121   : > { %1046 = vst.msk [vmem:[#allocation3 + $0x30] sm:$0xff] %vm1039_vm5, %v956_v5  ;;  %1559 = vrot.lane.b32.xlu1 %v3031_v42, %s2676_s5 }
 0x122   : > { %1720 = vrot.lane.b32.xlu0 %v1654_v32, %s2677_s6 }
 0x123   : > { %v954_v17 = vpop.permute.xlu1 %953 }
 0x124   : > { %v960_v33 = vpop.permute.xlu0 %959  ;;  %1045 = vst.msk [vmem:[#allocation3 + $0x28] sm:$0xff] %vm1039_vm5, %v954_v17 }
 0x125   : > { %1048 = vst.msk [vmem:[#allocation3 + $0x40] sm:$0xff] %vm1039_vm5, %v960_v33  ;;  %1561 = vrot.lane.b32.xlu1 %v3033_v43, %s2676_s5 }
 0x126   : > { %1144 = vrot.lane.b32.xlu0 %v1654_v32, %s2674_s29 }
 0x127   : > { %v958_v1 = vpop.permute.xlu1 %957 }
 0x128   : > { %v964_v51 = vpop.permute.xlu0 %963  ;;  %1047 = vst.msk [vmem:[#allocation3 + $0x38] sm:$0xff] %vm1039_vm5, %v958_v1 }
 0x129   : > { %1050 = vst.msk [vmem:[#allocation3 + $0x50] sm:$0xff] %vm1039_vm5, %v964_v51  ;;  %1752 = vrot.lane.b32.xlu1 %v3050_v49, %s2677_s6 }
 0x12a   : > { %1722 = vrot.lane.b32.xlu0 %v1655_v20, %s2677_s6 }
 0x12b   : > { %v962_v42 = vpop.permute.xlu1 %961 }
 0x12c   : > { %v968_v18 = vpop.permute.xlu0 %967  ;;  %1049 = vst.msk [vmem:[#allocation3 + $0x48] sm:$0xff] %vm1039_vm5, %v962_v42 }
 0x12d   : > { %1052 = vst.msk [vmem:[#allocation3 + $0x60] sm:$0xff] %vm1039_vm5, %v968_v18  ;;  %1176 = vrot.lane.b32.xlu1 %v3050_v49, %s2674_s29 }
 0x12e   : > { %1913 = vrot.lane.b32.xlu0 %v3120_v24, %s2678_s11 }
 0x12f   : > { %v966_v43 = vpop.permute.xlu1 %965 }
 0x130   : > { %v972_v62 = vpop.permute.xlu0 %971  ;;  %1051 = vst.msk [vmem:[#allocation3 + $0x58] sm:$0xff] %vm1039_vm5, %v966_v43 }
 0x131   : > { %1054 = vst.msk [vmem:[#allocation3 + $0x70] sm:$0xff] %vm1039_vm5, %v972_v62  ;;  %1754 = vrot.lane.b32.xlu1 %v3077_v59, %s2677_s6 }
 0x132   : > { %1146 = vrot.lane.b32.xlu0 %v1655_v20, %s2674_s29  ;;  %v1852_v20 = vld [vmem:[#allocation2 + $0x82] sm:$0xff] }
 0x133   : > { %v970_v19 = vpop.permute.xlu1 %969 }
 0x134   : > { %v976_v31 = vpop.permute.xlu0 %975  ;;  %1053 = vst.msk [vmem:[#allocation3 + $0x68] sm:$0xff] %vm1039_vm5, %v970_v19  ;;  %v1868_v19 = vld [vmem:[#allocation2 + $0x142] sm:$0xff] }
 0x135   : > { %1056 = vst.msk [vmem:[#allocation3 + $0x80] sm:$0xff] %vm1039_vm5, %v976_v31  ;;  %1945 = vrot.lane.b32.xlu1 %v3157_v12, %s2678_s11  ;;  %v1467_v31 = vld [vmem:[#allocation2 + $0x90] sm:$0xff] }
 0x136   : > { %1337 = vrot.lane.b32.xlu0 %v3120_v24, %s2675_s30 }
 0x137   : > { %v974_v49 = vpop.permute.xlu1 %973 }
 0x138   : > { %v980_v29 = vpop.permute.xlu0 %979  ;;  %1055 = vst.msk [vmem:[#allocation3 + $0x78] sm:$0xff] %vm1039_vm5, %v974_v49 }
 0x139   : > { %1058 = vst.msk [vmem:[#allocation3 + $0x90] sm:$0xff] %vm1039_vm5, %v980_v29  ;;  %1178 = vrot.lane.b32.xlu1 %v3077_v59, %s2674_s29 }
 0x13a   : > { %1915 = vrot.lane.b32.xlu0 %v3134_v56, %s2678_s11 }
 0x13b   : > { %v978_v39 = vpop.permute.xlu1 %977 }
 0x13c   : > { %v984_v53 = vpop.permute.xlu0 %983  ;;  %1057 = vst.msk [vmem:[#allocation3 + $0x88] sm:$0xff] %vm1039_vm5, %v978_v39  ;;  %v1468_v39 = vld [vmem:[#allocation2 + $0x98] sm:$0xff] }
 0x13d   : > { %1060 = vst.msk [vmem:[#allocation3 + $0xa0] sm:$0xff] %vm1039_vm5, %v984_v53  ;;  %1369 = vrot.lane.b32.xlu1 %v3157_v12, %s2675_s30 }
 0x13e   : > { %1339 = vrot.lane.b32.xlu0 %v3134_v56, %s2675_s30  ;;  %v1656_v56 = vld [vmem:[#allocation2 + $0x61] sm:$0xff] }
 0x13f   : > { %v982_v24 = vpop.permute.xlu1 %981 }
 0x140   : > { %v988_v16 = vpop.permute.xlu0 %987  ;;  %1059 = vst.msk [vmem:[#allocation3 + $0x98] sm:$0xff] %vm1039_vm5, %v982_v24 }
 0x141   : > { %1062 = vst.msk [vmem:[#allocation3 + $0xb0] sm:$0xff] %vm1039_vm5, %v988_v16  ;;  %1947 = vrot.lane.b32.xlu1 %v3172_v21, %s2678_s11 }
 0x142   : > { %1531 = vrot.lane.b32.xlu0 %v2968_v25, %s2676_s5 }
 0x143   : > { %v986_v59 = vpop.permute.xlu1 %985 }
 0x144   : > { %v992_v48 = vpop.permute.xlu0 %991  ;;  %1061 = vst.msk [vmem:[#allocation3 + $0xa8] sm:$0xff] %vm1039_vm5, %v986_v59  ;;  %v1660_v59 = vld [vmem:[#allocation2 + $0x91] sm:$0xff] }
 0x145   : > { %1064 = vst.msk [vmem:[#allocation3 + $0xc0] sm:$0xff] %vm1039_vm5, %v992_v48  ;;  %1371 = vrot.lane.b32.xlu1 %v3172_v21, %s2675_s30  ;;  %v1657_v21 = vld [vmem:[#allocation2 + $0x69] sm:$0xff] }
 0x146   : > { %1533 = vrot.lane.b32.xlu0 %v2970_v26, %s2676_s5  ;;  %v1672_v26 = vld [vmem:[#allocation2 + $0x121] sm:$0xff] }
 0x147   : > { %v990_v12 = vpop.permute.xlu1 %989 }
 0x148   : > { %v996_v23 = vpop.permute.xlu0 %995  ;;  %1063 = vst.msk [vmem:[#allocation3 + $0xb8] sm:$0xff] %vm1039_vm5, %v990_v12 }
 0x149   : > { %1066 = vst.msk [vmem:[#allocation3 + $0xd0] sm:$0xff] %vm1039_vm5, %v996_v23  ;;  %1563 = vrot.lane.b32.xlu1 %v3044_v46, %s2676_s5 }
 0x14a   : > { %1724 = vrot.lane.b32.xlu0 %v1656_v56, %s2677_s6 }
 0x14b   : > { %v994_v25 = vpop.permute.xlu1 %993 }
 0x14c   : > { %v1000_v35 = vpop.permute.xlu0 %999  ;;  %1065 = vst.msk [vmem:[#allocation3 + $0xc8] sm:$0xff] %vm1039_vm5, %v994_v25  ;;  %v1676_v25 = vld [vmem:[#allocation2 + $0x151] sm:$0xff] }
 0x14d   : > { %1068 = vst.msk [vmem:[#allocation3 + $0xe0] sm:$0xff] %vm1039_vm5, %v1000_v35  ;;  %1565 = vrot.lane.b32.xlu1 %v3046_v47, %s2676_s5  ;;  %v1673_v47 = vld [vmem:[#allocation2 + $0x129] sm:$0xff]  ;;  %v1661_v35 = vld [vmem:[#allocation2 + $0x99] sm:$0xff] }
 0x14e   : > { %1148 = vrot.lane.b32.xlu0 %v1656_v56, %s2674_s29 }
 0x14f   : > { %v998_v13 = vpop.permute.xlu1 %997 }
 0x150   : > { %v1004_v8 = vpop.permute.xlu0 %1003  ;;  %1067 = vst.msk [vmem:[#allocation3 + $0xd8] sm:$0xff] %vm1039_vm5, %v998_v13 }
 0x151   : > { %1070 = vst.msk [vmem:[#allocation3 + $0xf0] sm:$0xff] %vm1039_vm5, %v1004_v8  ;;  %1756 = vrot.lane.b32.xlu1 %v1672_v26, %s2677_s6 }
 0x152   : > { %1726 = vrot.lane.b32.xlu0 %v1657_v21, %s2677_s6 }
 0x153   : > { %v1002_v46 = vpop.permute.xlu1 %1001 }
 0x154   : > { %v1137_v14 = vpop.permute.xlu0 %1136  ;;  %1069 = vst.msk [vmem:[#allocation3 + $0xe8] sm:$0xff] %vm1039_vm5, %v1002_v46 }
 0x155   : > { %1233 = vst.msk [vmem:[#allocation3] sm:$0xff] %vm1232_vm6, %v1137_v14  ;;  %1180 = vrot.lane.b32.xlu1 %v1672_v26, %s2674_s29 }
 0x156   : > { %1917 = vrot.lane.b32.xlu0 %v3128_v44, %s2678_s11  ;;  %v1850_v44 = vld [vmem:[#allocation2 + $0x6a] sm:$0xff] }
 0x157   : > { %v1006_v11 = vpop.permute.xlu1 %1005 }
 0x158   : > { %v1141_v40 = vpop.permute.xlu0 %1140  ;;  %1071 = vst.msk [vmem:[#allocation3 + $0xf8] sm:$0xff] %vm1039_vm5, %v1006_v11  ;;  %v1869_v11 = vld [vmem:[#allocation2 + $0x152] sm:$0xff] }
 0x159   : > { %1235 = vst.msk [vmem:[#allocation3 + $0x10] sm:$0xff] %vm1232_vm6, %v1141_v40  ;;  %1758 = vrot.lane.b32.xlu1 %v1673_v47, %s2677_s6 }
 0x15a   : > { %1150 = vrot.lane.b32.xlu0 %v1657_v21, %s2674_s29 }
 0x15b   : > { %v1139_v34 = vpop.permute.xlu1 %1138 }
 0x15c   : > { %v1169_v37 = vpop.permute.xlu0 %1168  ;;  %1234 = vst.msk [vmem:[#allocation3 + $0x8] sm:$0xff] %vm1232_vm6, %v1139_v34  ;;  %v1854_v34 = vld [vmem:[#allocation2 + $0x9a] sm:$0xff] }
 0x15d   : > { %1249 = vst.msk [vmem:[#allocation3 + $0x80] sm:$0xff] %vm1232_vm6, %v1169_v37  ;;  %1949 = vrot.lane.b32.xlu1 %v3165_v15, %s2678_s11 }
 0x15e   : > { %1341 = vrot.lane.b32.xlu0 %v1271_v41, %s2675_s30 }
 0x15f   : > { %v1143_v36 = vpop.permute.xlu1 %1142 }
 0x160   : > { %v1330_v7 = vpop.permute.xlu0 %1329  ;;  %1236 = vst.msk [vmem:[#allocation3 + $0x18] sm:$0xff] %vm1232_vm6, %v1143_v36 }
 0x161   : > { %1426 = vst.msk [vmem:[#allocation3] sm:$0xff] %vm1425_vm7, %v1330_v7  ;;  %1182 = vrot.lane.b32.xlu1 %v1673_v47, %s2674_s29 }
 0x162   : > { %1919 = vrot.lane.b32.xlu0 %v1850_v44, %s2678_s11 }
 0x163   : > { %v1171_v45 = vpop.permute.xlu1 %1170 }
 0x164   : > { %v1332_v38 = vpop.permute.xlu0 %1331  ;;  %1250 = vst.msk [vmem:[#allocation3 + $0x88] sm:$0xff] %vm1232_vm6, %v1171_v45 }
 0x165   : > { %1427 = vst.msk [vmem:[#allocation3 + $0x8] sm:$0xff] %vm1425_vm7, %v1332_v38  ;;  %1373 = vrot.lane.b32.xlu1 %v3165_v15, %s2675_s30  ;;  %v1658_v15 = vld [vmem:[#allocation2 + $0x79] sm:$0xff] }
 0x166   : > { %1343 = vrot.lane.b32.xlu0 %v1850_v44, %s2675_s30 }
 0x167   : > { %v1362_v9 = vpop.permute.xlu1 %1361 }
 0x168   : > { %v1524_v2 = vpop.permute.xlu0 %1523  ;;  %1442 = vst.msk [vmem:[#allocation3 + $0x80] sm:$0xff] %vm1425_vm7, %v1362_v9  ;;  %v1870_v9 = vld [vmem:[#allocation2 + $0x15a] sm:$0xff] }
 0x169   : > { %1620 = vst.msk [vmem:[#allocation3] sm:$0xff] %vm1619_vm8, %v1524_v2  ;;  %1951 = vrot.lane.b32.xlu1 %v3178_v0, %s2678_s11  ;;  %v1469_v2 = vld [vmem:[#allocation2 + $0xa8] sm:$0xff] }
 0x16a   : > { %1535 = vrot.lane.b32.xlu0 %v2972_v27, %s2676_s5 }
 0x16b   : > { %v1364_v52 = vpop.permute.xlu1 %1363 }
 0x16c   : > { %v1526_v60 = vpop.permute.xlu0 %1525  ;;  %1443 = vst.msk [vmem:[#allocation3 + $0x88] sm:$0xff] %vm1425_vm7, %v1364_v52 }
 0x16d   : > { %1621 = vst.msk [vmem:[#allocation3 + $0x8] sm:$0xff] %vm1619_vm8, %v1526_v60  ;;  %1375 = vrot.lane.b32.xlu1 %v3178_v0, %s2675_s30  ;;  %v1659_v0 = vld [vmem:[#allocation2 + $0x81] sm:$0xff] }
 0x16e   : > { %1537 = vrot.lane.b32.xlu0 %v2980_v28, %s2676_s5  ;;  %v1674_v28 = vld [vmem:[#allocation2 + $0x139] sm:$0xff] }
 0x16f   : > { %v1556_v63 = vpop.permute.xlu1 %1555 }
 0x170   : > { %v1717_v3 = vpop.permute.xlu0 %1716  ;;  %1636 = vst.msk [vmem:[#allocation3 + $0x80] sm:$0xff] %vm1619_vm8, %v1556_v63 }
 0x171   : > { %1813 = vst.msk [vmem:[#allocation3] sm:$0xff] %vm1812_vm9, %v1717_v3  ;;  %1567 = vrot.lane.b32.xlu1 %v3060_v50, %s2676_s5  ;;  %v1851_v50 = vld [vmem:[#allocation2 + $0x7a] sm:$0xff] }
 0x172   : > { %1728 = vrot.lane.b32.xlu0 %v1658_v15, %s2677_s6 }
 0x173   : > { %v1558_v27 = vpop.permute.xlu1 %1557 }
 0x174   : > { %v1173_v22 = vpop.permute.xlu0 %1172  ;;  %1637 = vst.msk [vmem:[#allocation3 + $0x88] sm:$0xff] %vm1619_vm8, %v1558_v27 }
 0x175   : > { %1251 = vst.msk [vmem:[#allocation3 + $0x90] sm:$0xff] %vm1232_vm6, %v1173_v22  ;;  %1569 = vrot.lane.b32.xlu1 %v3062_v54, %s2676_s5  ;;  %v1675_v54 = vld [vmem:[#allocation2 + $0x141] sm:$0xff] }
 0x176   : > { %1152 = vrot.lane.b32.xlu0 %v1658_v15, %s2674_s29  ;;  %v1470_v15 = vld [vmem:[#allocation2 + $0xb0] sm:$0xff]  ;;  %v1485_v22 = vld [vmem:[#allocation2 + $0x168] sm:$0xff] }
 0x177   : > { %v1749_v6 = vpop.permute.xlu1 %1748 }
 0x178   : > { %v1751_v55 = vpop.permute.xlu0 %1750  ;;  %1829 = vst.msk [vmem:[#allocation3 + $0x80] sm:$0xff] %vm1812_vm9, %v1749_v6 }
 0x179   : > { %1830 = vst.msk [vmem:[#allocation3 + $0x88] sm:$0xff] %vm1812_vm9, %v1751_v55  ;;  %1760 = vrot.lane.b32.xlu1 %v1674_v28, %s2677_s6  ;;  %v1486_v55 = vld [vmem:[#allocation2 + $0x170] sm:$0xff] }
 0x17a   : > { %1730 = vrot.lane.b32.xlu0 %v1659_v0, %s2677_s6 }
 0x17b   : > { %v1719_v4 = vpop.permute.xlu1 %1718 }
 0x17c   : > { %v1942_v61 = vpop.permute.xlu0 %1941  ;;  %1814 = vst.msk [vmem:[#allocation3 + $0x8] sm:$0xff] %vm1812_vm9, %v1719_v4 }
 0x17d   : > { %2022 = vst.msk [vmem:[#allocation3 + $0x80] sm:$0xff] %vm2005_vm10, %v1942_v61  ;;  %1184 = vrot.lane.b32.xlu1 %v1674_v28, %s2674_s29  ;;  %v1662_v28 = vld [vmem:[#allocation2 + $0xa9] sm:$0xff] }
 0x17e   : > { %1921 = vrot.lane.b32.xlu0 %v1851_v50, %s2678_s11  ;;  %v1678_v61 = vld [vmem:[#allocation2 + $0x169] sm:$0xff] }
 0x17f   : > { %v1910_v30 = vpop.permute.xlu1 %1909 }
 0x180   : > { %v1334_v32 = vpop.permute.xlu0 %1333  ;;  %2006 = vst.msk [vmem:[#allocation3] sm:$0xff] %vm2005_vm10, %v1910_v30 }
 0x181   : > { %1428 = vst.msk [vmem:[#allocation3 + $0x10] sm:$0xff] %vm1425_vm7, %v1334_v32  ;;  %1762 = vrot.lane.b32.xlu1 %v1675_v54, %s2677_s6 }
 0x182   : > { %1154 = vrot.lane.b32.xlu0 %v1659_v0, %s2674_s29 }
 0x183   : > { %v1175_v5 = vpop.permute.xlu1 %1174 }
 0x184   : > { %v1912_v17 = vpop.permute.xlu0 %1911  ;;  %v2054_v33 = vld [vmem:[#allocation3 + $0x80] sm:$0xff]  ;;  %1252 = vst.msk [vmem:[#allocation3 + $0x98] sm:$0xff] %vm1232_vm6, %v1175_v5 }
 0x185   : > { %2007 = vst.msk [vmem:[#allocation3 + $0x8] sm:$0xff] %vm2005_vm10, %v1912_v17  ;;  %2607 = vmatprep.mubr.msk.f32.mxu1 %vm2075_vm11, %v2054_v33  ;;  %1953 = vrot.lane.b32.xlu1 %v1867_v10, %s2678_s11  ;;  %v1679_v33 = vld [vmem:[#allocation2 + $0x171] sm:$0xff] }
 0x186   : > { %1345 = vrot.lane.b32.xlu0 %v1851_v50, %s2675_s30 }
 0x187   : > { %v1366_v1 = vpop.permute.xlu1 %1365  ;;  %v2038_v51 = vld [vmem:[#allocation3] sm:$0xff] }
 0x188   : > { %v1336_v42 = vpop.permute.xlu0 %1335  ;;  %1444 = vst.msk [vmem:[#allocation3 + $0x90] sm:$0xff] %vm1425_vm7, %v1366_v1  ;;  %2583 = vmatprep.mubr.msk.f32.mxu0 %vm2075_vm11, %v2038_v51 }
 0x189   : > { %1429 = vst.msk [vmem:[#allocation3 + $0x18] sm:$0xff] %vm1425_vm7, %v1336_v42  ;;  %1186 = vrot.lane.b32.xlu1 %v1675_v54, %s2674_s29  ;;  %v1663_v54 = vld [vmem:[#allocation2 + $0xb1] sm:$0xff] }
 0x18a   : > { %1923 = vrot.lane.b32.xlu0 %v1852_v20, %s2678_s11  ;;  %v1871_v42 = vld [vmem:[#allocation2 + $0x16a] sm:$0xff] }
 0x18b   : > { %v1944_v18 = vpop.permute.xlu1 %1943 }
 0x18c   : > { %v1528_v43 = vpop.permute.xlu0 %1527  ;;  %v2039_v62 = vld [vmem:[#allocation3 + $0x8] sm:$0xff]  ;;  %2023 = vst.msk [vmem:[#allocation3 + $0x88] sm:$0xff] %vm2005_vm10, %v1944_v18 }
 0x18d   : > { %1622 = vst.msk [vmem:[#allocation3 + $0x10] sm:$0xff] %vm1619_vm8, %v1528_v43  ;;  %2584 = vmatmul.mubr.msk.f32.vlgmr.msra.gmra.mrb[0].mxu0 %vm2075_vm11, %v2039_v62  ;;  %1377 = vrot.lane.b32.xlu1 %v1867_v10, %s2675_s30  ;;  %v1855_v10 = vld [vmem:[#allocation2 + $0xaa] sm:$0xff]  ;;  %v1856_v62 = vld [vmem:[#allocation2 + $0xb2] sm:$0xff] }
 0x18e   : > { %1347 = vrot.lane.b32.xlu0 %v1852_v20, %s2675_s30 }
 0x18f   : > { %v1368_v49 = vpop.permute.xlu1 %1367 }
 0x190   : > { %v1530_v29 = vpop.permute.xlu0 %1529  ;;  %1445 = vst.msk [vmem:[#allocation3 + $0x98] sm:$0xff] %vm1425_vm7, %v1368_v49 }
 0x191   : > { %1623 = vst.msk [vmem:[#allocation3 + $0x18] sm:$0xff] %vm1619_vm8, %v1530_v29  ;;  %1955 = vrot.lane.b32.xlu1 %v1868_v19, %s2678_s11 }
 0x192   : > { %1539 = vrot.lane.b32.xlu0 %v1467_v31, %s2676_s5 }
 0x193   : > { %v1560_v53 = vpop.permute.xlu1 %1559  ;;  %v2055_v24 = vld [vmem:[#allocation3 + $0x88] sm:$0xff] }
 0x194   : > { %v1721_v16 = vpop.permute.xlu0 %1720  ;;  %1638 = vst.msk [vmem:[#allocation3 + $0x90] sm:$0xff] %vm1619_vm8, %v1560_v53  ;;  %2608 = vmatmul.mubr.msk.f32.vlgmr.msra.gmra.mrb[0].mxu1 %vm2075_vm11, %v2055_v24  ;;  %v1872_v24 = vld [vmem:[#allocation2 + $0x172] sm:$0xff] }
 0x195   : > { %1815 = vst.msk [vmem:[#allocation3 + $0x10] sm:$0xff] %vm1812_vm9, %v1721_v16  ;;  %1379 = vrot.lane.b32.xlu1 %v1868_v19, %s2675_s30  ;;  %v1471_v16 = vld [vmem:[#allocation2 + $0xc0] sm:$0xff] }
 0x196   : > { %1541 = vrot.lane.b32.xlu0 %v1468_v39, %s2676_s5 }
 0x197   : > { %v1562_v48 = vpop.permute.xlu1 %1561 }
 0x198   : > { %v1145_v56 = vpop.permute.xlu0 %1144  ;;  %1639 = vst.msk [vmem:[#allocation3 + $0x98] sm:$0xff] %vm1619_vm8, %v1562_v48 }
 0x199   : > { %1237 = vst.msk [vmem:[#allocation3 + $0x20] sm:$0xff] %vm1232_vm6, %v1145_v56  ;;  %1571 = vrot.lane.b32.xlu1 %v3073_v57, %s2676_s5  ;;  %v1853_v57 = vld [vmem:[#allocation2 + $0x92] sm:$0xff]  ;;  %v1472_v56 = vld [vmem:[#allocation2 + $0xc8] sm:$0xff] }
 0x19a   : > { %1732 = vrot.lane.b32.xlu0 %v1660_v59, %s2677_s6 }
 0x19b   : > { %v1753_v12 = vpop.permute.xlu1 %1752 }
 0x19c   : > { %v1723_v23 = vpop.permute.xlu0 %1722  ;;  %1831 = vst.msk [vmem:[#allocation3 + $0x90] sm:$0xff] %vm1812_vm9, %v1753_v12 }
 0x19d   : > { %1816 = vst.msk [vmem:[#allocation3 + $0x18] sm:$0xff] %vm1812_vm9, %v1723_v23  ;;  %1573 = vrot.lane.b32.xlu1 %v3075_v58, %s2676_s5  ;;  %v1677_v58 = vld [vmem:[#allocation2 + $0x159] sm:$0xff] }
 0x19e   : > { %1156 = vrot.lane.b32.xlu0 %v1660_v59, %s2674_s29 }
 0x19f   : > { %v1177_v26 = vpop.permute.xlu1 %1176 }
 0x1a0   : > { %v1914_v21 = vpop.permute.xlu0 %1913  ;;  %1253 = vst.msk [vmem:[#allocation3 + $0xa0] sm:$0xff] %vm1232_vm6, %v1177_v26  ;;  %v1664_v26 = vld [vmem:[#allocation2 + $0xc1] sm:$0xff] }
 0x1a1   : > { %2008 = vst.msk [vmem:[#allocation3 + $0x10] sm:$0xff] %vm2005_vm10, %v1914_v21  ;;  %1764 = vrot.lane.b32.xlu1 %v1676_v25, %s2677_s6 }
 0x1a2   : > { %1734 = vrot.lane.b32.xlu0 %v1661_v35, %s2677_s6 }
 0x1a3   : > { %v1755_v13 = vpop.permute.xlu1 %1754 }
 0x1a4   : > { %v1147_v8 = vpop.permute.xlu0 %1146  ;;  %1832 = vst.msk [vmem:[#allocation3 + $0x98] sm:$0xff] %vm1812_vm9, %v1755_v13  ;;  %v1488_v13 = vld [vmem:[#allocation2 + $0x188] sm:$0xff] }
 0x1a5   : > { %1238 = vst.msk [vmem:[#allocation3 + $0x28] sm:$0xff] %vm1232_vm6, %v1147_v8  ;;  %1188 = vrot.lane.b32.xlu1 %v1676_v25, %s2674_s29 }
 0x1a6   : > { %1925 = vrot.lane.b32.xlu0 %v1853_v57, %s2678_s11 }
 0x1a7   : > { %v1946_v46 = vpop.permute.xlu1 %1945 }
 0x1a8   : > { %v1338_v14 = vpop.permute.xlu0 %1337  ;;  %v2040_v47 = vld [vmem:[#allocation3 + $0x10] sm:$0xff]  ;;  %2024 = vst.msk [vmem:[#allocation3 + $0x90] sm:$0xff] %vm2005_vm10, %v1946_v46 }
 0x1a9   : > { %1430 = vst.msk [vmem:[#allocation3 + $0x20] sm:$0xff] %vm1425_vm7, %v1338_v14  ;;  %2586 = vmatprep.mubr.msk.f32.mxu0 %vm2075_vm11, %v2040_v47  ;;  %1766 = vrot.lane.b32.xlu1 %v1677_v58, %s2677_s6  ;;  %v1680_v46 = vld [vmem:[#allocation2 + $0x181] sm:$0xff]  ;;  %v1665_v14 = vld [vmem:[#allocation2 + $0xc9] sm:$0xff] }
 0x1aa   : > { %1158 = vrot.lane.b32.xlu0 %v1661_v35, %s2674_s29  ;;  %v1487_v35 = vld [vmem:[#allocation2 + $0x180] sm:$0xff] }
 0x1ab   : > { %v1179_v40 = vpop.permute.xlu1 %1178 }
 0x1ac   : > { %v1916_v41 = vpop.permute.xlu0 %1915  ;;  %1254 = vst.msk [vmem:[#allocation3 + $0xa8] sm:$0xff] %vm1232_vm6, %v1179_v40  ;;  %v1857_v40 = vld [vmem:[#allocation2 + $0xc2] sm:$0xff] }
 0x1ad   : > { %2009 = vst.msk [vmem:[#allocation3 + $0x18] sm:$0xff] %vm2005_vm10, %v1916_v41  ;;  %1957 = vrot.lane.b32.xlu1 %v1869_v11, %s2678_s11 }
 0x1ae   : > { %1349 = vrot.lane.b32.xlu0 %v1853_v57, %s2675_s30 }
 0x1af   : > { %v1370_v37 = vpop.permute.xlu1 %1369  ;;  %v2056_v44 = vld [vmem:[#allocation3 + $0x90] sm:$0xff] }
 0x1b0   : > { %v1340_v36 = vpop.permute.xlu0 %1339  ;;  %1446 = vst.msk [vmem:[#allocation3 + $0xa0] sm:$0xff] %vm1425_vm7, %v1370_v37  ;;  %2610 = vmatprep.mubr.msk.f32.mxu1 %vm2075_vm11, %v2056_v44  ;;  %v1681_v37 = vld [vmem:[#allocation2 + $0x189] sm:$0xff] }
 0x1b1   : > { %1431 = vst.msk [vmem:[#allocation3 + $0x28] sm:$0xff] %vm1425_vm7, %v1340_v36  ;;  %1190 = vrot.lane.b32.xlu1 %v1677_v58, %s2674_s29 }
 0x1b2   : > { %1927 = vrot.lane.b32.xlu0 %v1854_v34, %s2678_s11 }
 0x1b3   : > { %v1948_v7 = vpop.permute.xlu1 %1947 }
 0x1b4   : > { %v1532_v45 = vpop.permute.xlu0 %1531  ;;  %v2041_v38 = vld [vmem:[#allocation3 + $0x18] sm:$0xff]  ;;  %2025 = vst.msk [vmem:[#allocation3 + $0x98] sm:$0xff] %vm2005_vm10, %v1948_v7 }
 0x1b5   : > { %1624 = vst.msk [vmem:[#allocation3 + $0x20] sm:$0xff] %vm1619_vm8, %v1532_v45  ;;  %2587 = vmatmul.mubr.msk.f32.gmra.mrb[2].mxu0 %vm2075_vm11, %v2041_v38  ;;  %1381 = vrot.lane.b32.xlu1 %v1869_v11, %s2675_s30  ;;  %v1873_v45 = vld [vmem:[#allocation2 + $0x182] sm:$0xff] }
 0x1b6   : > { %1351 = vrot.lane.b32.xlu0 %v1854_v34, %s2675_s30 }
 0x1b7   : > { %v1372_v52 = vpop.permute.xlu1 %1371 }
 0x1b8   : > { %v1534_v60 = vpop.permute.xlu0 %1533  ;;  %1447 = vst.msk [vmem:[#allocation3 + $0xa8] sm:$0xff] %vm1425_vm7, %v1372_v52 }
 0x1b9   : > { %1625 = vst.msk [vmem:[#allocation3 + $0x28] sm:$0xff] %vm1619_vm8, %v1534_v60  ;;  %1959 = vrot.lane.b32.xlu1 %v1870_v9, %s2678_s11 }
 0x1ba   : > { %1543 = vrot.lane.b32.xlu0 %v1469_v2, %s2676_s5  ;;  %v1858_v2 = vld [vmem:[#allocation2 + $0xca] sm:$0xff] }
 0x1bb   : > { %v1564_v63 = vpop.permute.xlu1 %1563  ;;  %v2057_v3 = vld [vmem:[#allocation3 + $0x98] sm:$0xff] }
 0x1bc   : > { %v1725_v27 = vpop.permute.xlu0 %1724  ;;  %1640 = vst.msk [vmem:[#allocation3 + $0xa0] sm:$0xff] %vm1619_vm8, %v1564_v63  ;;  %2611 = vmatmul.mubr.msk.f32.gmra.mrb[2].mxu1 %vm2075_vm11, %v2057_v3 }
 0x1bd   : > { %1817 = vst.msk [vmem:[#allocation3 + $0x20] sm:$0xff] %vm1812_vm9, %v1725_v27  ;;  %1383 = vrot.lane.b32.xlu1 %v1870_v9, %s2675_s30 }
 0x1be   : > { %1545 = vrot.lane.b32.xlu0 %v1470_v15, %s2676_s5 }
 0x1bf   : > { %v1566_v0 = vpop.permute.xlu1 %1565 }
 0x1c0   : > { %v1149_v6 = vpop.permute.xlu0 %1148  ;;  %1641 = vst.msk [vmem:[#allocation3 + $0xa8] sm:$0xff] %vm1619_vm8, %v1566_v0 }
 0x1c1   : > { %1239 = vst.msk [vmem:[#allocation3 + $0x30] sm:$0xff] %vm1232_vm6, %v1149_v6  ;;  %1575 = vrot.lane.b32.xlu1 %v1485_v22, %s2676_s5  ;;  %v1874_v22 = vld [vmem:[#allocation2 + $0x18a] sm:$0xff] }
 0x1c2   : > { %1736 = vrot.lane.b32.xlu0 %v1662_v28, %s2677_s6 }
 0x1c3   : > { %v1757_v50 = vpop.permute.xlu1 %1756 }
 0x1c4   : > { %v1727_v4 = vpop.permute.xlu0 %1726  ;;  %1833 = vst.msk [vmem:[#allocation3 + $0xa0] sm:$0xff] %vm1812_vm9, %v1757_v50 }
 0x1c5   : > { %1818 = vst.msk [vmem:[#allocation3 + $0x28] sm:$0xff] %vm1812_vm9, %v1727_v4  ;;  %1577 = vrot.lane.b32.xlu1 %v1486_v55, %s2676_s5  ;;  %v1474_v55 = vld [vmem:[#allocation2 + $0xe0] sm:$0xff] }
 0x1c6   : > { %1160 = vrot.lane.b32.xlu0 %v1662_v28, %s2674_s29  ;;  %v1473_v28 = vld [vmem:[#allocation2 + $0xd8] sm:$0xff] }
 0x1c7   : > { %v1181_v30 = vpop.permute.xlu1 %1180 }
 0x1c8   : > { %v1918_v32 = vpop.permute.xlu0 %1917  ;;  %1255 = vst.msk [vmem:[#allocation3 + $0xb0] sm:$0xff] %vm1232_vm6, %v1181_v30  ;;  %v1666_v30 = vld [vmem:[#allocation2 + $0xd9] sm:$0xff] }
 0x1c9   : > { %2010 = vst.msk [vmem:[#allocation3 + $0x20] sm:$0xff] %vm2005_vm10, %v1918_v32  ;;  %1768 = vrot.lane.b32.xlu1 %v1678_v61, %s2677_s6 }
 0x1ca   : > { %1738 = vrot.lane.b32.xlu0 %v1663_v54, %s2677_s6 }
 0x1cb   : > { %v1759_v5 = vpop.permute.xlu1 %1758 }
 0x1cc   : > { %v1151_v17 = vpop.permute.xlu0 %1150  ;;  %1834 = vst.msk [vmem:[#allocation3 + $0xa8] sm:$0xff] %vm1812_vm9, %v1759_v5  ;;  %v1490_v5 = vld [vmem:[#allocation2 + $0x1a0] sm:$0xff] }
 0x1cd   : > { %1240 = vst.msk [vmem:[#allocation3 + $0x38] sm:$0xff] %vm1232_vm6, %v1151_v17  ;;  %1192 = vrot.lane.b32.xlu1 %v1678_v61, %s2674_s29  ;;  %v1667_v17 = vld [vmem:[#allocation2 + $0xe1] sm:$0xff] }
 0x1ce   : > { %1929 = vrot.lane.b32.xlu0 %v1855_v10, %s2678_s11 }
 0x1cf   : > { %v1950_v20 = vpop.permute.xlu1 %1949 }
 0x1d0   : > { %v1342_v1 = vpop.permute.xlu0 %1341  ;;  %v2042_v51 = vld [vmem:[#allocation3 + $0x20] sm:$0xff]  ;;  %2026 = vst.msk [vmem:[#allocation3 + $0xa0] sm:$0xff] %vm2005_vm10, %v1950_v20 }
 0x1d1   : > { %1432 = vst.msk [vmem:[#allocation3 + $0x30] sm:$0xff] %vm1425_vm7, %v1342_v1  ;;  %2589 = vmatprep.mubr.msk.f32.mxu0 %vm2075_vm11, %v2042_v51  ;;  %1770 = vrot.lane.b32.xlu1 %v1679_v33, %s2677_s6  ;;  %v1682_v1 = vld [vmem:[#allocation2 + $0x199] sm:$0xff] }
 0x1d2   : > { %1162 = vrot.lane.b32.xlu0 %v1663_v54, %s2674_s29  ;;  %v1489_v54 = vld [vmem:[#allocation2 + $0x198] sm:$0xff] }
 0x1d3   : > { %v1183_v18 = vpop.permute.xlu1 %1182  ;;  %v1859_v51 = vld [vmem:[#allocation2 + $0xda] sm:$0xff] }
 0x1d4   : > { %v1920_v43 = vpop.permute.xlu0 %1919  ;;  %1256 = vst.msk [vmem:[#allocation3 + $0xb8] sm:$0xff] %vm1232_vm6, %v1183_v18 }
 0x1d5   : > { %2011 = vst.msk [vmem:[#allocation3 + $0x28] sm:$0xff] %vm2005_vm10, %v1920_v43  ;;  %1961 = vrot.lane.b32.xlu1 %v1871_v42, %s2678_s11  ;;  %v1683_v43 = vld [vmem:[#allocation2 + $0x1a1] sm:$0xff] }
 0x1d6   : > { %1353 = vrot.lane.b32.xlu0 %v1855_v10, %s2675_s30 }
 0x1d7   : > { %v1374_v19 = vpop.permute.xlu1 %1373  ;;  %v2058_v31 = vld [vmem:[#allocation3 + $0xa0] sm:$0xff] }
 0x1d8   : > { %v1344_v49 = vpop.permute.xlu0 %1343  ;;  %1448 = vst.msk [vmem:[#allocation3 + $0xb0] sm:$0xff] %vm1425_vm7, %v1374_v19  ;;  %2613 = vmatprep.mubr.msk.f32.mxu1 %vm2075_vm11, %v2058_v31 }
 0x1d9   : > { %1433 = vst.msk [vmem:[#allocation3 + $0x38] sm:$0xff] %vm1425_vm7, %v1344_v49  ;;  %1194 = vrot.lane.b32.xlu1 %v1679_v33, %s2674_s29  ;;  %v1875_v49 = vld [vmem:[#allocation2 + $0x19a] sm:$0xff] }
 0x1da   : > { %1931 = vrot.lane.b32.xlu0 %v1856_v62, %s2678_s11 }
 0x1db   : > { %v1952_v29 = vpop.permute.xlu1 %1951 }
 0x1dc   : > { %v1536_v39 = vpop.permute.xlu0 %1535  ;;  %v2043_v53 = vld [vmem:[#allocation3 + $0x28] sm:$0xff]  ;;  %2027 = vst.msk [vmem:[#allocation3 + $0xa8] sm:$0xff] %vm2005_vm10, %v1952_v29 }
 0x1dd   : > { %1626 = vst.msk [vmem:[#allocation3 + $0x30] sm:$0xff] %vm1619_vm8, %v1536_v39  ;;  %2590 = vmatmul.mubr.msk.f32.gmra.mrb[4].mxu0 %vm2075_vm11, %v2043_v53  ;;  %1385 = vrot.lane.b32.xlu1 %v1871_v42, %s2675_s30 }
 0x1de   : > { %1355 = vrot.lane.b32.xlu0 %v1856_v62, %s2675_s30  ;;  %v1860_v62 = vld [vmem:[#allocation2 + $0xe2] sm:$0xff] }
 0x1df   : > { %v1376_v59 = vpop.permute.xlu1 %1375 }
 0x1e0   : > { %v1538_v48 = vpop.permute.xlu0 %1537  ;;  %1449 = vst.msk [vmem:[#allocation3 + $0xb8] sm:$0xff] %vm1425_vm7, %v1376_v59 }
 0x1e1   : > { %1627 = vst.msk [vmem:[#allocation3 + $0x38] sm:$0xff] %vm1619_vm8, %v1538_v48  ;;  %1963 = vrot.lane.b32.xlu1 %v1872_v24, %s2678_s11 }
 0x1e2   : > { %1547 = vrot.lane.b32.xlu0 %v1471_v16, %s2676_s5 }
 0x1e3   : > { %v1568_v12 = vpop.permute.xlu1 %1567  ;;  %v2059_v23 = vld [vmem:[#allocation3 + $0xa8] sm:$0xff] }
 0x1e4   : > { %v1729_v25 = vpop.permute.xlu0 %1728  ;;  %1642 = vst.msk [vmem:[#allocation3 + $0xb0] sm:$0xff] %vm1619_vm8, %v1568_v12  ;;  %2614 = vmatmul.mubr.msk.f32.gmra.mrb[4].mxu1 %vm2075_vm11, %v2059_v23 }
 0x1e5   : > { %1819 = vst.msk [vmem:[#allocation3 + $0x30] sm:$0xff] %vm1812_vm9, %v1729_v25  ;;  %1387 = vrot.lane.b32.xlu1 %v1872_v24, %s2675_s30  ;;  %v1876_v24 = vld [vmem:[#allocation2 + $0x1a2] sm:$0xff] }
 0x1e6   : > { %1549 = vrot.lane.b32.xlu0 %v1472_v56, %s2676_s5 }
 0x1e7   : > { %v1570_v21 = vpop.permute.xlu1 %1569 }
 0x1e8   : > { %v1153_v57 = vpop.permute.xlu0 %1152  ;;  %1643 = vst.msk [vmem:[#allocation3 + $0xb8] sm:$0xff] %vm1619_vm8, %v1570_v21 }
 0x1e9   : > { %1241 = vst.msk [vmem:[#allocation3 + $0x40] sm:$0xff] %vm1232_vm6, %v1153_v57  ;;  %1579 = vrot.lane.b32.xlu1 %v1487_v35, %s2676_s5 }
 0x1ea   : > { %1740 = vrot.lane.b32.xlu0 %v1664_v26, %s2677_s6 }
 0x1eb   : > { %v1761_v8 = vpop.permute.xlu1 %1760 }
 0x1ec   : > { %v1731_v58 = vpop.permute.xlu0 %1730  ;;  %1835 = vst.msk [vmem:[#allocation3 + $0xb0] sm:$0xff] %vm1812_vm9, %v1761_v8 }
 0x1ed   : > { %1820 = vst.msk [vmem:[#allocation3 + $0x38] sm:$0xff] %vm1812_vm9, %v1731_v58  ;;  %1581 = vrot.lane.b32.xlu1 %v1488_v13, %s2676_s5 }
 0x1ee   : > { %1164 = vrot.lane.b32.xlu0 %v1664_v26, %s2674_s29 }
 0x1ef   : > { %v1185_v47 = vpop.permute.xlu1 %1184 }
 0x1f0   : > { %v1922_v11 = vpop.permute.xlu0 %1921  ;;  %1257 = vst.msk [vmem:[#allocation3 + $0xc0] sm:$0xff] %vm1232_vm6, %v1185_v47 }
 0x1f1   : > { %2012 = vst.msk [vmem:[#allocation3 + $0x30] sm:$0xff] %vm2005_vm10, %v1922_v11  ;;  %1772 = vrot.lane.b32.xlu1 %v1680_v46, %s2677_s6 }
 0x1f2   : > { %1742 = vrot.lane.b32.xlu0 %v1665_v14, %s2677_s6 }
 0x1f3   : > { %v1763_v41 = vpop.permute.xlu1 %1762 }
 0x1f4   : > { %v1155_v34 = vpop.permute.xlu0 %1154  ;;  %1836 = vst.msk [vmem:[#allocation3 + $0xb8] sm:$0xff] %vm1812_vm9, %v1763_v41 }
 0x1f5   : > { %1242 = vst.msk [vmem:[#allocation3 + $0x48] sm:$0xff] %vm1232_vm6, %v1155_v34  ;;  %1196 = vrot.lane.b32.xlu1 %v1680_v46, %s2674_s29 }
 0x1f6   : > { %1933 = vrot.lane.b32.xlu0 %v1857_v40, %s2678_s11 }
 0x1f7   : > { %v1954_v44 = vpop.permute.xlu1 %1953 }
 0x1f8   : > { %v1346_v36 = vpop.permute.xlu0 %1345  ;;  %v2044_v7 = vld [vmem:[#allocation3 + $0x30] sm:$0xff]  ;;  %2028 = vst.msk [vmem:[#allocation3 + $0xb0] sm:$0xff] %vm2005_vm10, %v1954_v44 }
 0x1f9   : > { %1434 = vst.msk [vmem:[#allocation3 + $0x40] sm:$0xff] %vm1425_vm7, %v1346_v36  ;;  %2592 = vmatprep.mubr.msk.f32.mxu0 %vm2075_vm11, %v2044_v7  ;;  %1774 = vrot.lane.b32.xlu1 %v1681_v37, %s2677_s6 }
 0x1fa   : > { %1166 = vrot.lane.b32.xlu0 %v1665_v14, %s2674_s29 }
 0x1fb   : > { %v1187_v38 = vpop.permute.xlu1 %1186 }
 0x1fc   : > { %v1924_v9 = vpop.permute.xlu0 %1923  ;;  %1258 = vst.msk [vmem:[#allocation3 + $0xc8] sm:$0xff] %vm1232_vm6, %v1187_v38 }
 0x1fd   : > { %2013 = vst.msk [vmem:[#allocation3 + $0x38] sm:$0xff] %vm2005_vm10, %v1924_v9  ;;  %1965 = vrot.lane.b32.xlu1 %v1873_v45, %s2678_s11 }
 0x1fe   : > { %1357 = vrot.lane.b32.xlu0 %v1857_v40, %s2675_s30 }
 0x1ff   : > { %v1378_v52 = vpop.permute.xlu1 %1377  ;;  %v2060_v60 = vld [vmem:[#allocation3 + $0xb0] sm:$0xff] }
 0x200   : > { %v1348_v15 = vpop.permute.xlu0 %1347  ;;  %1450 = vst.msk [vmem:[#allocation3 + $0xc0] sm:$0xff] %vm1425_vm7, %v1378_v52  ;;  %2616 = vmatprep.mubr.msk.f32.mxu1 %vm2075_vm11, %v2060_v60 }
 0x201   : > { %1435 = vst.msk [vmem:[#allocation3 + $0x48] sm:$0xff] %vm1425_vm7, %v1348_v15  ;;  %1198 = vrot.lane.b32.xlu1 %v1681_v37, %s2674_s29 }
 0x202   : > { %1935 = vrot.lane.b32.xlu0 %v1858_v2, %s2678_s11 }
 0x203   : > { %v1956_v63 = vpop.permute.xlu1 %1955 }
 0x204   : > { %v1540_v3 = vpop.permute.xlu0 %1539  ;;  %v2045_v27 = vld [vmem:[#allocation3 + $0x38] sm:$0xff]  ;;  %2029 = vst.msk [vmem:[#allocation3 + $0xb8] sm:$0xff] %vm2005_vm10, %v1956_v63 }
 0x205   : > { %1628 = vst.msk [vmem:[#allocation3 + $0x40] sm:$0xff] %vm1619_vm8, %v1540_v3  ;;  %2593 = vmatmul.mubr.msk.f32.gmra.mrb[6].mxu0 %vm2075_vm11, %v2045_v27  ;;  %1389 = vrot.lane.b32.xlu1 %v1873_v45, %s2675_s30 }
 0x206   : > { %1359 = vrot.lane.b32.xlu0 %v1858_v2, %s2675_s30 }
 0x207   : > { %v1380_v0 = vpop.permute.xlu1 %1379 }
 0x208   : > { %v1542_v6 = vpop.permute.xlu0 %1541  ;;  %1451 = vst.msk [vmem:[#allocation3 + $0xc8] sm:$0xff] %vm1425_vm7, %v1380_v0 }
 0x209   : > { %1629 = vst.msk [vmem:[#allocation3 + $0x48] sm:$0xff] %vm1619_vm8, %v1542_v6  ;;  %1967 = vrot.lane.b32.xlu1 %v1874_v22, %s2678_s11 }
 0x20a   : > { %1551 = vrot.lane.b32.xlu0 %v1473_v28, %s2676_s5 }
 0x20b   : > { %v1572_v50 = vpop.permute.xlu1 %1571  ;;  %v2061_v4 = vld [vmem:[#allocation3 + $0xb8] sm:$0xff] }
 0x20c   : > { %v1733_v61 = vpop.permute.xlu0 %1732  ;;  %1644 = vst.msk [vmem:[#allocation3 + $0xc0] sm:$0xff] %vm1619_vm8, %v1572_v50  ;;  %2617 = vmatmul.mubr.msk.f32.gmra.mrb[6].mxu1 %vm2075_vm11, %v2061_v4 }
 0x20d   : > { %1821 = vst.msk [vmem:[#allocation3 + $0x40] sm:$0xff] %vm1812_vm9, %v1733_v61  ;;  %1391 = vrot.lane.b32.xlu1 %v1874_v22, %s2675_s30 }
 0x20e   : > { %1553 = vrot.lane.b32.xlu0 %v1474_v55, %s2676_s5 }
 0x20f   : > { %v1574_v32 = vpop.permute.xlu1 %1573 }
 0x210   : > { %v1157_v10 = vpop.permute.xlu0 %1156  ;;  %1645 = vst.msk [vmem:[#allocation3 + $0xc8] sm:$0xff] %vm1619_vm8, %v1574_v32 }
 0x211   : > { %1243 = vst.msk [vmem:[#allocation3 + $0x50] sm:$0xff] %vm1232_vm6, %v1157_v10  ;;  %1583 = vrot.lane.b32.xlu1 %v1489_v54, %s2676_s5 }
 0x212   : > { %1744 = vrot.lane.b32.xlu0 %v1666_v30, %s2677_s6 }
 0x213   : > { %v1765_v33 = vpop.permute.xlu1 %1764 }
 0x214   : > { %v1735_v20 = vpop.permute.xlu0 %1734  ;;  %1837 = vst.msk [vmem:[#allocation3 + $0xc0] sm:$0xff] %vm1812_vm9, %v1765_v33 }
 0x215   : > { %1822 = vst.msk [vmem:[#allocation3 + $0x48] sm:$0xff] %vm1812_vm9, %v1735_v20  ;;  %1585 = vrot.lane.b32.xlu1 %v1490_v5, %s2676_s5 }
 0x216   : > { %1746 = vrot.lane.b32.xlu0 %v1667_v17, %s2677_s6 }
 0x217   : > { %v1189_v42 = vpop.permute.xlu1 %1188 }
 0x218   : > { %v1926_v18 = vpop.permute.xlu0 %1925  ;;  %1259 = vst.msk [vmem:[#allocation3 + $0xd0] sm:$0xff] %vm1232_vm6, %v1189_v42 }
 0x219   : > { %2014 = vst.msk [vmem:[#allocation3 + $0x40] sm:$0xff] %vm2005_vm10, %v1926_v18  ;;  %1776 = vrot.lane.b32.xlu1 %v1682_v1, %s2677_s6 }
 0x21a   : > { %1937 = vrot.lane.b32.xlu0 %v1859_v51, %s2678_s11 }
 0x21b   : > { %v1767_v19 = vpop.permute.xlu1 %1766 }
 0x21c   : > { %v1159_v31 = vpop.permute.xlu0 %1158  ;;  %1838 = vst.msk [vmem:[#allocation3 + $0xc8] sm:$0xff] %vm1812_vm9, %v1767_v19 }
 0x21d   : > { %1244 = vst.msk [vmem:[#allocation3 + $0x58] sm:$0xff] %vm1232_vm6, %v1159_v31  ;;  %1778 = vrot.lane.b32.xlu1 %v1683_v43, %s2677_s6 }
 0x21e   : > { %1939 = vrot.lane.b32.xlu0 %v1860_v62, %s2678_s11 }
 0x21f   : > { %v1958_v29 = vpop.permute.xlu1 %1957 }
 0x220   : > { %v1350_v39 = vpop.permute.xlu0 %1349  ;;  %v2046_v53 = vld [vmem:[#allocation3 + $0x40] sm:$0xff]  ;;  %2030 = vst.msk [vmem:[#allocation3 + $0xc0] sm:$0xff] %vm2005_vm10, %v1958_v29 }
 0x221   : > { %1436 = vst.msk [vmem:[#allocation3 + $0x50] sm:$0xff] %vm1425_vm7, %v1350_v39  ;;  %2595 = vmatprep.mubr.msk.f32.mxu0 %vm2075_vm11, %v2046_v53  ;;  %1969 = vrot.lane.b32.xlu1 %v1875_v49, %s2678_s11 }
 0x223   : > { %v1191_v16 = vpop.permute.xlu1 %1190 }
 0x224   : > { %v1928_v59 = vpop.permute.xlu0 %1927  ;;  %1260 = vst.msk [vmem:[#allocation3 + $0xd8] sm:$0xff] %vm1232_vm6, %v1191_v16 }
 0x225   : > { %2015 = vst.msk [vmem:[#allocation3 + $0x48] sm:$0xff] %vm2005_vm10, %v1928_v59  ;;  %1971 = vrot.lane.b32.xlu1 %v1876_v24, %s2678_s11 }
 0x227   : > { %v1382_v48 = vpop.permute.xlu1 %1381  ;;  %v2062_v56 = vld [vmem:[#allocation3 + $0xc0] sm:$0xff] }
 0x228   : > { %v1352_v12 = vpop.permute.xlu0 %1351  ;;  %1452 = vst.msk [vmem:[#allocation3 + $0xd0] sm:$0xff] %vm1425_vm7, %v1382_v48  ;;  %2619 = vmatprep.mubr.msk.f32.mxu1 %vm2075_vm11, %v2062_v56 }
 0x229   : > { %1437 = vst.msk [vmem:[#allocation3 + $0x58] sm:$0xff] %vm1425_vm7, %v1352_v12 }
 0x22b   : > { %v1960_v23 = vpop.permute.xlu1 %1959 }
 0x22c   : > { %v1544_v25 = vpop.permute.xlu0 %1543  ;;  %v2047_v35 = vld [vmem:[#allocation3 + $0x48] sm:$0xff]  ;;  %2031 = vst.msk [vmem:[#allocation3 + $0xc8] sm:$0xff] %vm2005_vm10, %v1960_v23 }
 0x22d   : > { %1630 = vst.msk [vmem:[#allocation3 + $0x50] sm:$0xff] %vm1619_vm8, %v1544_v25  ;;  %2596 = vmatmul.mubr.msk.f32.gmra.mrb[8].mxu0 %vm2075_vm11, %v2047_v35 }
 0x22f   : > { %v1384_v26 = vpop.permute.xlu1 %1383 }
 0x230   : > { %v1546_v21 = vpop.permute.xlu0 %1545  ;;  %1453 = vst.msk [vmem:[#allocation3 + $0xd8] sm:$0xff] %vm1425_vm7, %v1384_v26 }
 0x231   : > { %1631 = vst.msk [vmem:[#allocation3 + $0x58] sm:$0xff] %vm1619_vm8, %v1546_v21 }
 0x233   : > { %v1576_v57 = vpop.permute.xlu1 %1575  ;;  %v2063_v13 = vld [vmem:[#allocation3 + $0xc8] sm:$0xff] }
 0x234   : > { %v1737_v8 = vpop.permute.xlu0 %1736  ;;  %1646 = vst.msk [vmem:[#allocation3 + $0xd0] sm:$0xff] %vm1619_vm8, %v1576_v57  ;;  %2620 = vmatmul.mubr.msk.f32.gmra.mrb[8].mxu1 %vm2075_vm11, %v2063_v13 }
 0x235   : > { %1823 = vst.msk [vmem:[#allocation3 + $0x50] sm:$0xff] %vm1812_vm9, %v1737_v8 }
 0x237   : > { %v1578_v58 = vpop.permute.xlu1 %1577 }
 0x238   : > { %v1161_v46 = vpop.permute.xlu0 %1160  ;;  %1647 = vst.msk [vmem:[#allocation3 + $0xd8] sm:$0xff] %vm1619_vm8, %v1578_v58 }
 0x239   : > { %1245 = vst.msk [vmem:[#allocation3 + $0x60] sm:$0xff] %vm1232_vm6, %v1161_v46 }
 0x23b   : > { %v1769_v14 = vpop.permute.xlu1 %1768 }
 0x23c   : > { %v1739_v47 = vpop.permute.xlu0 %1738  ;;  %1839 = vst.msk [vmem:[#allocation3 + $0xd0] sm:$0xff] %vm1812_vm9, %v1769_v14 }
 0x23d   : > { %1824 = vst.msk [vmem:[#allocation3 + $0x58] sm:$0xff] %vm1812_vm9, %v1739_v47 }
 0x23f   : > { %v1193_v11 = vpop.permute.xlu1 %1192 }
 0x240   : > { %v1930_v40 = vpop.permute.xlu0 %1929  ;;  %1261 = vst.msk [vmem:[#allocation3 + $0xe0] sm:$0xff] %vm1232_vm6, %v1193_v11 }
 0x241   : > { %2016 = vst.msk [vmem:[#allocation3 + $0x50] sm:$0xff] %vm2005_vm10, %v1930_v40 }
 0x243   : > { %v1771_v41 = vpop.permute.xlu1 %1770 }
 0x244   : > { %v1163_v34 = vpop.permute.xlu0 %1162  ;;  %1840 = vst.msk [vmem:[#allocation3 + $0xd8] sm:$0xff] %vm1812_vm9, %v1771_v41 }
 0x245   : > { %1246 = vst.msk [vmem:[#allocation3 + $0x68] sm:$0xff] %vm1232_vm6, %v1163_v34 }
 0x247   : > { %v1962_v37 = vpop.permute.xlu1 %1961 }
 0x248   : > { %v1354_v44 = vpop.permute.xlu0 %1353  ;;  %v2048_v36 = vld [vmem:[#allocation3 + $0x50] sm:$0xff]  ;;  %2032 = vst.msk [vmem:[#allocation3 + $0xd0] sm:$0xff] %vm2005_vm10, %v1962_v37 }
 0x249   : > { %1438 = vst.msk [vmem:[#allocation3 + $0x60] sm:$0xff] %vm1425_vm7, %v1354_v44  ;;  %2598 = vmatprep.mubr.msk.f32.mxu0 %vm2075_vm11, %v2048_v36 }
 0x24b   : > { %v1195_v7 = vpop.permute.xlu1 %1194 }
 0x24c   : > { %v1932_v45 = vpop.permute.xlu0 %1931  ;;  %1262 = vst.msk [vmem:[#allocation3 + $0xe8] sm:$0xff] %vm1232_vm6, %v1195_v7 }
 0x24d   : > { %2017 = vst.msk [vmem:[#allocation3 + $0x58] sm:$0xff] %vm2005_vm10, %v1932_v45 }
 0x24f   : > { %v1386_v38 = vpop.permute.xlu1 %1385  ;;  %v2064_v9 = vld [vmem:[#allocation3 + $0xd0] sm:$0xff] }
 0x250   : > { %v1356_v2 = vpop.permute.xlu0 %1355  ;;  %1454 = vst.msk [vmem:[#allocation3 + $0xe0] sm:$0xff] %vm1425_vm7, %v1386_v38  ;;  %2622 = vmatprep.mubr.msk.f32.mxu1 %vm2075_vm11, %v2064_v9 }
 0x251   : > { %1439 = vst.msk [vmem:[#allocation3 + $0x68] sm:$0xff] %vm1425_vm7, %v1356_v2 }
 0x253   : > { %v1964_v52 = vpop.permute.xlu1 %1963 }
 0x254   : > { %v1548_v60 = vpop.permute.xlu0 %1547  ;;  %v2049_v15 = vld [vmem:[#allocation3 + $0x58] sm:$0xff]  ;;  %2033 = vst.msk [vmem:[#allocation3 + $0xd8] sm:$0xff] %vm2005_vm10, %v1964_v52 }
 0x255   : > { %1632 = vst.msk [vmem:[#allocation3 + $0x60] sm:$0xff] %vm1619_vm8, %v1548_v60  ;;  %2599 = vmatmul.mubr.msk.f32.gmra.mrb[10].mxu0 %vm2075_vm11, %v2049_v15 }
 0x257   : > { %v1388_v63 = vpop.permute.xlu1 %1387 }
 0x258   : > { %v1550_v3 = vpop.permute.xlu0 %1549  ;;  %1455 = vst.msk [vmem:[#allocation3 + $0xe8] sm:$0xff] %vm1425_vm7, %v1388_v63 }
 0x259   : > { %1633 = vst.msk [vmem:[#allocation3 + $0x68] sm:$0xff] %vm1619_vm8, %v1550_v3 }
 0x25b   : > { %v1580_v27 = vpop.permute.xlu1 %1579  ;;  %v2065_v22 = vld [vmem:[#allocation3 + $0xd8] sm:$0xff] }
 0x25c   : > { %v1741_v28 = vpop.permute.xlu0 %1740  ;;  %1648 = vst.msk [vmem:[#allocation3 + $0xe0] sm:$0xff] %vm1619_vm8, %v1580_v27  ;;  %2623 = vmatmul.mubr.msk.f32.gmra.mrb[10].mxu1 %vm2075_vm11, %v2065_v22 }
 0x25d   : > { %1825 = vst.msk [vmem:[#allocation3 + $0x60] sm:$0xff] %vm1812_vm9, %v1741_v28 }
 0x25f   : > { %v1582_v0 = vpop.permute.xlu1 %1581 }
 0x260   : > { %v1165_v6 = vpop.permute.xlu0 %1164  ;;  %1649 = vst.msk [vmem:[#allocation3 + $0xe8] sm:$0xff] %vm1619_vm8, %v1582_v0  ;;  %v2585_v55 = vpop.f32.mrb[0].mxu0 }
 0x261   : > { %1247 = vst.msk [vmem:[#allocation3 + $0x70] sm:$0xff] %vm1232_vm6, %v1165_v6  ;;  %v2242_v50 = vpop.f32.mrb[1].mxu0 }
 0x262   : > { %2402 = vst.msk [vmem:[%s3736_s23 + $0x8] sm:$0xff] %vm340_vm0, %v2585_v55  ;;  %2401 = vst.msk [vmem:[%s3736_s23] sm:$0xff] %vm340_vm0, %v2242_v50 }
 0x263   : > { %v1773_v4 = vpop.permute.xlu1 %1772 }
 0x264   : > { %v1743_v61 = vpop.permute.xlu0 %1742  ;;  %1841 = vst.msk [vmem:[#allocation3 + $0xe0] sm:$0xff] %vm1812_vm9, %v1773_v4 }
 0x265   : > { %1826 = vst.msk [vmem:[#allocation3 + $0x68] sm:$0xff] %vm1812_vm9, %v1743_v61 }
 0x267   : > { %v2609_v54 = vpop.f32.mrb[0].mxu1  ;;  %v1197_v30 = vpop.permute.xlu1 %1196 }
 0x268   : > { %2418 = vst.msk [vmem:[%s3736_s23 + $0x88] sm:$0xff] %vm340_vm0, %v2609_v54  ;;  %v2322_v32 = vpop.f32.mrb[1].mxu1  ;;  %v1934_v10 = vpop.permute.xlu0 %1933 }
 0x269   : > { %1263 = vst.msk [vmem:[#allocation3 + $0xf0] sm:$0xff] %vm1232_vm6, %v1197_v30 }
 0x26a   : > { %2417 = vst.msk [vmem:[%s3736_s23 + $0x80] sm:$0xff] %vm340_vm0, %v2322_v32 }
 0x26b   : > { %2018 = vst.msk [vmem:[#allocation3 + $0x60] sm:$0xff] %vm2005_vm10, %v1934_v10  ;;  %v1775_v5 = vpop.permute.xlu1 %1774 }
 0x26c   : > { %1842 = vst.msk [vmem:[#allocation3 + $0xe8] sm:$0xff] %vm1812_vm9, %v1775_v5  ;;  %v1167_v17 = vpop.permute.xlu0 %1166 }
 0x26d   : > { %1248 = vst.msk [vmem:[#allocation3 + $0x78] sm:$0xff] %vm1232_vm6, %v1167_v17 }
 0x26f   : > { %v1966_v33 = vpop.permute.xlu1 %1965 }
 0x270   : > { %2034 = vst.msk [vmem:[#allocation3 + $0xe0] sm:$0xff] %vm2005_vm10, %v1966_v33  ;;  %v1358_v20 = vpop.permute.xlu0 %1357 }
 0x271   : > { %1440 = vst.msk [vmem:[#allocation3 + $0x70] sm:$0xff] %vm1425_vm7, %v1358_v20 }
 0x272   : > { %v2050_v1 = vld [vmem:[#allocation3 + $0x60] sm:$0xff] }
 0x273   : > { %2601 = vmatprep.mubr.msk.f32.mxu0 %vm2075_vm11, %v2050_v1  ;;  %v1199_v51 = vpop.permute.xlu1 %1198 }
 0x274   : > { %1264 = vst.msk [vmem:[#allocation3 + $0xf8] sm:$0xff] %vm1232_vm6, %v1199_v51  ;;  %v1936_v42 = vpop.permute.xlu0 %1935 }
 0x275   : > { %2019 = vst.msk [vmem:[#allocation3 + $0x68] sm:$0xff] %vm2005_vm10, %v1936_v42 }
 0x277   : > { %v1390_v18 = vpop.permute.xlu1 %1389  ;;  %v2066_v43 = vld [vmem:[#allocation3 + $0xe0] sm:$0xff] }
 0x278   : > { %1456 = vst.msk [vmem:[#allocation3 + $0xf0] sm:$0xff] %vm1425_vm7, %v1390_v18  ;;  %2625 = vmatprep.mubr.msk.f32.mxu1 %vm2075_vm11, %v2066_v43  ;;  %v1360_v62 = vpop.permute.xlu0 %1359 }
 0x279   : > { %1441 = vst.msk [vmem:[#allocation3 + $0x78] sm:$0xff] %vm1425_vm7, %v1360_v62 }
 0x27b   : > { %v1968_v19 = vpop.permute.xlu1 %1967 }
 0x27c   : > { %2035 = vst.msk [vmem:[#allocation3 + $0xe8] sm:$0xff] %vm2005_vm10, %v1968_v19  ;;  %v1552_v31 = vpop.permute.xlu0 %1551  ;;  %v2051_v49 = vld [vmem:[#allocation3 + $0x68] sm:$0xff] }
 0x27d   : > { %1634 = vst.msk [vmem:[#allocation3 + $0x70] sm:$0xff] %vm1619_vm8, %v1552_v31  ;;  %2602 = vmatmul.mubr.msk.f32.gmra.mrb[12].mxu0 %vm2075_vm11, %v2051_v49 }
 0x27f   : > { %v1392_v29 = vpop.permute.xlu1 %1391 }
 0x280   : > { %1457 = vst.msk [vmem:[#allocation3 + $0xf8] sm:$0xff] %vm1425_vm7, %v1392_v29  ;;  %v1554_v39 = vpop.permute.xlu0 %1553 }
 0x281   : > { %1635 = vst.msk [vmem:[#allocation3 + $0x78] sm:$0xff] %vm1619_vm8, %v1554_v39 }
 0x283   : > { %v1584_v53 = vpop.permute.xlu1 %1583  ;;  %v2067_v24 = vld [vmem:[#allocation3 + $0xe8] sm:$0xff] }
 0x284   : > { %1650 = vst.msk [vmem:[#allocation3 + $0xf0] sm:$0xff] %vm1619_vm8, %v1584_v53  ;;  %2626 = vmatmul.mubr.msk.f32.gmra.mrb[12].mxu1 %vm2075_vm11, %v2067_v24  ;;  %v1745_v16 = vpop.permute.xlu0 %1744 }
 0x285   : > { %1827 = vst.msk [vmem:[#allocation3 + $0x70] sm:$0xff] %vm1812_vm9, %v1745_v16 }
 0x287   : > { %v1586_v59 = vpop.permute.xlu1 %1585 }
 0x288   : > { %v2588_v48 = vpop.f32.mrb[2].mxu0  ;;  %1651 = vst.msk [vmem:[#allocation3 + $0xf8] sm:$0xff] %vm1619_vm8, %v1586_v59  ;;  %v1747_v56 = vpop.permute.xlu0 %1746 }
 0x289   : > { %2404 = vst.msk [vmem:[%s3736_s23 + $0x18] sm:$0xff] %vm340_vm0, %v2588_v48  ;;  %v2252_v12 = vpop.f32.mrb[3].mxu0 }
 0x28a   : > { %1828 = vst.msk [vmem:[#allocation3 + $0x78] sm:$0xff] %vm1812_vm9, %v1747_v56 }
 0x28b   : > { %2403 = vst.msk [vmem:[%s3736_s23 + $0x10] sm:$0xff] %vm340_vm0, %v2252_v12  ;;  %v1777_v23 = vpop.permute.xlu1 %1776 }
 0x28c   : > { %1843 = vst.msk [vmem:[#allocation3 + $0xf0] sm:$0xff] %vm1812_vm9, %v1777_v23  ;;  %v1938_v25 = vpop.permute.xlu0 %1937 }
 0x28d   : > { %2020 = vst.msk [vmem:[#allocation3 + $0x70] sm:$0xff] %vm2005_vm10, %v1938_v25 }
 0x28f   : > { %v2612_v35 = vpop.f32.mrb[2].mxu1  ;;  %v1779_v26 = vpop.permute.xlu1 %1778 }
 0x290   : > { %2420 = vst.msk [vmem:[%s3736_s23 + $0x98] sm:$0xff] %vm340_vm0, %v2612_v35  ;;  %v2332_v21 = vpop.f32.mrb[3].mxu1  ;;  %v1940_v57 = vpop.permute.xlu0 %1939 }
 0x291   : > { %1844 = vst.msk [vmem:[#allocation3 + $0xf8] sm:$0xff] %vm1812_vm9, %v1779_v26 }
 0x292   : > { %2419 = vst.msk [vmem:[%s3736_s23 + $0x90] sm:$0xff] %vm340_vm0, %v2332_v21 }
 0x293   : > { %2021 = vst.msk [vmem:[#allocation3 + $0x78] sm:$0xff] %vm2005_vm10, %v1940_v57  ;;  %v1970_v13 = vpop.permute.xlu1 %1969 }
 0x294   : > { %2036 = vst.msk [vmem:[#allocation3 + $0xf0] sm:$0xff] %vm2005_vm10, %v1970_v13  ;;  %v2052_v8 = vld [vmem:[#allocation3 + $0x70] sm:$0xff] }
 0x295   : > { %2604 = vmatprep.mubr.msk.f32.mxu0 %vm2075_vm11, %v2052_v8 }
 0x297   : > { %v1972_v58 = vpop.permute.xlu1 %1971 }
 0x298   : > { %2037 = vst.msk [vmem:[#allocation3 + $0xf8] sm:$0xff] %vm2005_vm10, %v1972_v58 }
 0x29a   : > { %v2053_v46 = vld [vmem:[#allocation3 + $0x78] sm:$0xff] }
 0x29b   : > { %2605 = vmatmul.mubr.msk.f32.gmra.mrb[14].mxu0 %vm2075_vm11, %v2053_v46  ;;  %v2068_v14 = vld [vmem:[#allocation3 + $0xf0] sm:$0xff] }
 0x29c   : > { %2628 = vmatprep.mubr.msk.f32.mxu1 %vm2075_vm11, %v2068_v14 }
 0x29f   : > { %v2069_v47 = vld [vmem:[#allocation3 + $0xf8] sm:$0xff] }
 0x2a0   : > { %2629 = vmatmul.mubr.msk.f32.gmra.mrb[14].mxu1 %vm2075_vm11, %v2069_v47 }
 0x2b0   : > { %v2591_v11 = vpop.f32.mrb[4].mxu0 }
 0x2b1   : > { %2406 = vst.msk [vmem:[%s3736_s23 + $0x28] sm:$0xff] %vm340_vm0, %v2591_v11  ;;  %v2262_v40 = vpop.f32.mrb[5].mxu0 }
 0x2b2   : > { %2405 = vst.msk [vmem:[%s3736_s23 + $0x20] sm:$0xff] %vm340_vm0, %v2262_v40 }
 0x2b7   : > { %v2615_v41 = vpop.f32.mrb[4].mxu1 }
 0x2b8   : > { %2422 = vst.msk [vmem:[%s3736_s23 + $0xa8] sm:$0xff] %vm340_vm0, %v2615_v41  ;;  %v2342_v34 = vpop.f32.mrb[5].mxu1 }
 0x2b9   : > { %2421 = vst.msk [vmem:[%s3736_s23 + $0xa0] sm:$0xff] %vm340_vm0, %v2342_v34 }
 0x2d8   : > { %v2594_v37 = vpop.f32.mrb[6].mxu0 }
 0x2d9   : > { %2408 = vst.msk [vmem:[%s3736_s23 + $0x38] sm:$0xff] %vm340_vm0, %v2594_v37  ;;  %v2272_v44 = vpop.f32.mrb[7].mxu0 }
 0x2da   : > { %2407 = vst.msk [vmem:[%s3736_s23 + $0x30] sm:$0xff] %vm340_vm0, %v2272_v44 }
 0x2df   : > { %v2618_v36 = vpop.f32.mrb[6].mxu1 }
 0x2e0   : > { %2424 = vst.msk [vmem:[%s3736_s23 + $0xb8] sm:$0xff] %vm340_vm0, %v2618_v36  ;;  %v2352_v7 = vpop.f32.mrb[7].mxu1 }
 0x2e1   : > { %2423 = vst.msk [vmem:[%s3736_s23 + $0xb0] sm:$0xff] %vm340_vm0, %v2352_v7 }
 0x300   : > { %v2597_v45 = vpop.f32.mrb[8].mxu0 }
 0x301   : > { %2410 = vst.msk [vmem:[%s3736_s23 + $0x48] sm:$0xff] %vm340_vm0, %v2597_v45  ;;  %v2282_v38 = vpop.f32.mrb[9].mxu0 }
 0x302   : > { %2409 = vst.msk [vmem:[%s3736_s23 + $0x40] sm:$0xff] %vm340_vm0, %v2282_v38 }
 0x307   : > { %v2621_v9 = vpop.f32.mrb[8].mxu1 }
 0x308   : > { %2426 = vst.msk [vmem:[%s3736_s23 + $0xc8] sm:$0xff] %vm340_vm0, %v2621_v9  ;;  %v2362_v2 = vpop.f32.mrb[9].mxu1 }
 0x309   : > { %2425 = vst.msk [vmem:[%s3736_s23 + $0xc0] sm:$0xff] %vm340_vm0, %v2362_v2 }
 0x328   : > { %v2600_v52 = vpop.f32.mrb[10].mxu0 }
 0x329   : > { %2412 = vst.msk [vmem:[%s3736_s23 + $0x58] sm:$0xff] %vm340_vm0, %v2600_v52  ;;  %v2292_v60 = vpop.f32.mrb[11].mxu0 }
 0x32a   : > { %2411 = vst.msk [vmem:[%s3736_s23 + $0x50] sm:$0xff] %vm340_vm0, %v2292_v60 }
 0x32f   : > { %v2624_v15 = vpop.f32.mrb[10].mxu1 }
 0x330   : > { %2428 = vst.msk [vmem:[%s3736_s23 + $0xd8] sm:$0xff] %vm340_vm0, %v2624_v15  ;;  %v2372_v63 = vpop.f32.mrb[11].mxu1 }
 0x331   : > { %2427 = vst.msk [vmem:[%s3736_s23 + $0xd0] sm:$0xff] %vm340_vm0, %v2372_v63 }
 0x350   : > { %v2603_v3 = vpop.f32.mrb[12].mxu0 }
 0x351   : > { %2414 = vst.msk [vmem:[%s3736_s23 + $0x68] sm:$0xff] %vm340_vm0, %v2603_v3  ;;  %v2302_v27 = vpop.f32.mrb[13].mxu0 }
 0x352   : > { %2413 = vst.msk [vmem:[%s3736_s23 + $0x60] sm:$0xff] %vm340_vm0, %v2302_v27 }
 0x357   : > { %v2627_v22 = vpop.f32.mrb[12].mxu1 }
 0x358   : > { %2430 = vst.msk [vmem:[%s3736_s23 + $0xe8] sm:$0xff] %vm340_vm0, %v2627_v22  ;;  %v2382_v28 = vpop.f32.mrb[13].mxu1 }
 0x359   : > { %2429 = vst.msk [vmem:[%s3736_s23 + $0xe0] sm:$0xff] %vm340_vm0, %v2382_v28 }
 0x36e   : > { %v2606_v0 = vpop.f32.mrb[14].mxu0 }
 0x36f   : > { %2416 = vst.msk [vmem:[%s3736_s23 + $0x78] sm:$0xff] %vm340_vm0, %v2606_v0  ;;  %v2312_v6 = vpop.f32.mrb[15].mxu0 }
 0x370   : > { %2415 = vst.msk [vmem:[%s3736_s23 + $0x70] sm:$0xff] %vm340_vm0, %v2312_v6 }
 0x373   : > { %v2630_v55 = vpop.f32.mrb[14].mxu1 }
 0x374   : > { %2432 = vst.msk [vmem:[%s3736_s23 + $0xf8] sm:$0xff] %vm340_vm0, %v2630_v55  ;;  %v2392_v50 = vpop.f32.mrb[15].mxu1 }
 0x375   : > { %2431 = vst.msk [vmem:[%s3736_s23 + $0xf0] sm:$0xff] %vm340_vm0, %v2392_v50 }
 0x376 PF: > { %s14_s15 = sadd.s32 1, %s2668_s15  }
 0x377   : > { %p11_p4 = scmp.ge.s32.totalorder %s14_s15, 4  }
 0x379   :  { %13 = sbr.rel (!%p11_p4) target bundleno = 1 (0x1), region = 68 }

// kernel: basic_block_forward.3
= control target key start
LH: loop header
LB: loop body
LE: loop exit
PB: predicated region body
PF: predicated region fallthrough
CT: control target
= control target key end

     0   :  { %s2835_s18 = smov 0   ;;  %s4003_s0 = inlined_call_operand.vmem [shape: f32[2,16,16,4], index: 0, kind: input, shape index: {}]   ;;  %s4004_s1 = inlined_call_operand.vmem [shape: f32[1,4], index: 1, kind: input, shape index: {}]   ;;  %s4005_s2 = inlined_call_operand.vmem [shape: f32[1,4], index: 2, kind: input, shape index: {}]   ;;  %s4006_s3 = inlined_call_operand.vmem [shape: f32[36,4], index: 3, kind: input, shape index: {}]   ;;  %s4007_s4 = inlined_call_operand.vmem [shape: f32[2,16,16,4], index: 4, kind: input, shape index: {}]   ;;  %s4008_s5 = inlined_call_operand.vmem [shape: f32[2,16,16,4], index: 5, kind: output, shape index: {}]  }
   0x1 LB: > { %s2611_s19 = sadd.s32 4294967295, %s2794_s18   ;;  %p2615_p0 = scmp.ge.s32.totalorder %s2794_s18, 1  ;;  %s2794_s18 = sphi %s2835_s18, %s15_s18  }
   0x2   : > { %p197_p1 = scmp.lt.s32.totalorder %s2794_s18, 3 }
   0x4   : > { %p198_p2 = pnand %p2615_p0, %p197_p1 }
   0x5   : > { %vm387_vm0 = vcmask (!%p198_p2), 31744   ;;  %p2845_p3 = scmp.lt.s32.totalorder (!%p198_p2), %s2611_s19, 1  ;;  %v2796_v0 = vmov (!%p198_p2), 0.0   ;;  %vm390_vm1 = vcmask (!%p198_p2), 25600   ;;  %v2912_v1 = vld [vmem:[%s4004_s1] ss:$0 sm:$0xff] (!%p198_p2) }
   0x6   : > { %201 = sbr.rel (%p198_p2) target bundleno = 888 (0x378), region = 40  ;;  %388 = vst.msk [vmem:[#allocation2] sm:$0xff] (!%p198_p2), %vm387_vm0, %v2796_v0  ;;  %389 = vst.msk [vmem:[#allocation2 + $0x8] sm:$0xff] (!%p198_p2), %vm387_vm0, %v2796_v0  ;;  %v2923_v2 = vld [vmem:[%s4005_s2] ss:$0 sm:$0xff] (!%p198_p2)  ;;  %s2797_s29 = smov (!%p198_p2), 4  }
   0x7   : > { %392 = vst.msk [vmem:[#allocation2 + $0x18] sm:$0xff] (!%p198_p2), %vm387_vm0, %v2796_v0  ;;  %393 = vst.msk [vmem:[#allocation2 + $0x20] sm:$0xff] (!%p198_p2), %vm387_vm0, %v2796_v0  ;;  %s2798_s30 = smov (!%p198_p2), 8   ;;  %vm700_vm2 = vcmask (!%p198_p2), 64544   ;;  %s2799_s6 = smov (!%p198_p2), 12   ;;  %vm893_vm3 = vcmask (!%p198_p2), 97344  }
   0x8   : > { %395 = vst.msk [vmem:[#allocation2 + $0x30] sm:$0xff] (!%p198_p2), %vm387_vm0, %v2796_v0  ;;  %396 = vst.msk [vmem:[#allocation2 + $0x38] sm:$0xff] (!%p198_p2), %vm387_vm0, %v2796_v0  ;;  %s2800_s7 = smov (!%p198_p2), 16   ;;  %s2801_s8 = smov (!%p198_p2), 20   ;;  %vm2219_vm4 = vcmask (!%p198_p2), 1043456   ;;  %vm1086_vm5 = vcmask (!%p198_p2), 130144  }
   0x9   : > { %398 = vst.msk [vmem:[#allocation2 + $0x48] sm:$0xff] (!%p198_p2), %vm387_vm0, %v2796_v0  ;;  %399 = vst.msk [vmem:[#allocation2 + $0x50] sm:$0xff] (!%p198_p2), %vm387_vm0, %v2796_v0  ;;  %s2802_s9 = smov (!%p198_p2), 24   ;;  %s2803_s10 = smov (!%p198_p2), 28   ;;  %vm1279_vm6 = vcmask (!%p198_p2), 162944   ;;  %vm1472_vm7 = vcmask (!%p198_p2), 195744  }
   0xa   : > { %401 = vst.msk [vmem:[#allocation2 + $0x60] sm:$0xff] (!%p198_p2), %vm387_vm0, %v2796_v0  ;;  %402 = vst.msk [vmem:[#allocation2 + $0x68] sm:$0xff] (!%p198_p2), %vm387_vm0, %v2796_v0  ;;  %s2804_s11 = smov (!%p198_p2), 32   ;;  %vm1666_vm8 = vcmask (!%p198_p2), 228544   ;;  %vm1859_vm9 = vcmask (!%p198_p2), 261344   ;;  %vm2052_vm10 = vcmask (!%p198_p2), 294144  }
   0xb   : > { %404 = vst.msk [vmem:[#allocation2 + $0x78] sm:$0xff] (!%p198_p2), %vm387_vm0, %v2796_v0  ;;  %405 = vst.msk [vmem:[#allocation2 + $0x80] sm:$0xff] (!%p198_p2), %vm387_vm0, %v2796_v0  ;;  %vm2122_vm11 = vcmask (!%p198_p2), 293888  }
   0xc   : > { %407 = vst.msk [vmem:[#allocation2 + $0x90] sm:$0xff] (!%p198_p2), %vm387_vm0, %v2796_v0  ;;  %408 = vst.msk [vmem:[#allocation2 + $0x98] sm:$0xff] (!%p198_p2), %vm387_vm0, %v2796_v0 }
   0xd   : > { %410 = vst.msk [vmem:[#allocation2 + $0xa8] sm:$0xff] %vm387_vm0, %v2796_v0  ;;  %411 = vst.msk [vmem:[#allocation2 + $0xb0] sm:$0xff] %vm387_vm0, %v2796_v0  ;;  %s4011_s19 = smov (!%p2845_p3, %s2611_s19), 1  ;;  %v540_v12 = vld [vmem:[#allocation2 + $0x1] sm:$0xff] }
   0xe   : > { %413 = vst.msk [vmem:[#allocation2 + $0xc0] sm:$0xff] %vm387_vm0, %v2796_v0  ;;  %414 = vst.msk [vmem:[#allocation2 + $0xc8] sm:$0xff] %vm387_vm0, %v2796_v0  ;;  %s2907_s21 = sshll.u32 %s4011_s19, 8  ;;  %604 = vrot.lane.b32.xlu0 %v540_v12, %s2797_s29 }
   0xf   : > { %416 = vst.msk [vmem:[#allocation2 + $0xd8] sm:$0xff] %vm387_vm0, %v2796_v0  ;;  %417 = vst.msk [vmem:[#allocation2 + $0xe0] sm:$0xff] %vm387_vm0, %v2796_v0  ;;  %s2918_s26 = scalar_lea.vmem %s4003_s0, %s2907_s21 }
  0x10   : > { %419 = vst.msk [vmem:[#allocation2 + $0xf0] sm:$0xff] %vm387_vm0, %v2796_v0  ;;  %420 = vst.msk [vmem:[#allocation2 + $0xf8] sm:$0xff] %vm387_vm0, %v2796_v0  ;;  %v245_v3 = vld [vmem:[%s2918_s26] sm:$0xff]  ;;  %v246_v4 = vld [vmem:[%s2918_s26 + $0x8] sm:$0xff] }
  0x11   : > { %422 = vst.msk [vmem:[#allocation2 + $0x108] sm:$0xff] %vm387_vm0, %v2796_v0  ;;  %423 = vst.msk [vmem:[#allocation2 + $0x110] sm:$0xff] %vm387_vm0, %v2796_v0  ;;  %v247_v5 = vld [vmem:[%s2918_s26 + $0x10] sm:$0xff]  ;;  %v284_v6 = vmul.f32 %v2912_v1, %v245_v3  ;;  %v285_v7 = vmul.f32 %v2912_v1, %v246_v4  ;;  %v248_v9 = vld [vmem:[%s2918_s26 + $0x18] sm:$0xff] }
  0x12   : > { %425 = vst.msk [vmem:[#allocation2 + $0x120] sm:$0xff] %vm387_vm0, %v2796_v0  ;;  %426 = vst.msk [vmem:[#allocation2 + $0x128] sm:$0xff] %vm387_vm0, %v2796_v0  ;;  %v286_v8 = vmul.f32 %v2912_v1, %v247_v5  ;;  %v249_v10 = vld [vmem:[%s2918_s26 + $0x20] sm:$0xff]  ;;  %v250_v11 = vld [vmem:[%s2918_s26 + $0x28] sm:$0xff]  ;;  %v287_v13 = vmul.f32 %v2912_v1, %v248_v9 }
  0x13   : > { %428 = vst.msk [vmem:[#allocation2 + $0x138] sm:$0xff] %vm387_vm0, %v2796_v0  ;;  %429 = vst.msk [vmem:[#allocation2 + $0x140] sm:$0xff] %vm387_vm0, %v2796_v0  ;;  %v288_v14 = vmul.f32 %v2912_v1, %v249_v10  ;;  %v289_v15 = vmul.f32 %v2912_v1, %v250_v11  ;;  %v251_v16 = vld [vmem:[%s2918_s26 + $0x30] sm:$0xff]  ;;  %v252_v17 = vld [vmem:[%s2918_s26 + $0x38] sm:$0xff]  ;;  %v323_v18 = vadd.f32 %v2923_v2, %v284_v6 }
  0x14   : > { %431 = vst.msk [vmem:[#allocation2 + $0x150] sm:$0xff] %vm387_vm0, %v2796_v0  ;;  %432 = vst.msk [vmem:[#allocation2 + $0x158] sm:$0xff] %vm387_vm0, %v2796_v0  ;;  %v324_v20 = vadd.f32 %v2923_v2, %v285_v7  ;;  %v325_v21 = vadd.f32 %v2923_v2, %v286_v8  ;;  %v290_v22 = vmul.f32 %v2912_v1, %v251_v16  ;;  %v253_v27 = vld [vmem:[%s2918_s26 + $0x40] sm:$0xff]  ;;  %v254_v28 = vld [vmem:[%s2918_s26 + $0x48] sm:$0xff] }
  0x15   : > { %434 = vst.msk [vmem:[#allocation2 + $0x168] sm:$0xff] %vm387_vm0, %v2796_v0  ;;  %435 = vst.msk [vmem:[#allocation2 + $0x170] sm:$0xff] %vm387_vm0, %v2796_v0  ;;  %v326_v23 = vadd.f32 %v2923_v2, %v287_v13  ;;  %v327_v24 = vadd.f32 %v2923_v2, %v288_v14  ;;  %v328_v25 = vadd.f32 %v2923_v2, %v289_v15  ;;  %v255_v29 = vld [vmem:[%s2918_s26 + $0x50] sm:$0xff]  ;;  %v355_v30 = vmax.f32 %v323_v18, 0.0  ;;  %v256_v34 = vld [vmem:[%s2918_s26 + $0x58] sm:$0xff] }
  0x16   : > { %437 = vst.msk [vmem:[#allocation2 + $0x180] sm:$0xff] %vm387_vm0, %v2796_v0  ;;  %438 = vst.msk [vmem:[#allocation2 + $0x188] sm:$0xff] %vm387_vm0, %v2796_v0  ;;  %v291_v26 = vmul.f32 %v2912_v1, %v252_v17  ;;  %v356_v31 = vmax.f32 %v324_v20, 0.0  ;;  %v357_v32 = vmax.f32 %v325_v21, 0.0  ;;  %v329_v33 = vadd.f32 %v2923_v2, %v290_v22  ;;  %v257_v35 = vld [vmem:[%s2918_s26 + $0x60] sm:$0xff]  ;;  %v258_v36 = vld [vmem:[%s2918_s26 + $0x68] sm:$0xff] }
  0x17   : > { %440 = vst.msk [vmem:[#allocation2 + $0x198] sm:$0xff] %vm387_vm0, %v2796_v0  ;;  %441 = vst.msk [vmem:[#allocation2 + $0x1a0] sm:$0xff] %vm387_vm0, %v2796_v0  ;;  %v358_v37 = vmax.f32 %v326_v23, 0.0  ;;  %v359_v38 = vmax.f32 %v327_v24, 0.0  ;;  %v360_v39 = vmax.f32 %v328_v25, 0.0  ;;  %v259_v41 = vld [vmem:[%s2918_s26 + $0x70] sm:$0xff]  ;;  %v292_v43 = vmul.f32 %v2912_v1, %v253_v27 }
  0x18   : > { %391 = vst.msk [vmem:[#allocation2 + $0x10] sm:$0x3] %vm390_vm1, %v2796_v0  ;;  %394 = vst.msk [vmem:[#allocation2 + $0x28] sm:$0x3] %vm390_vm1, %v2796_v0  ;;  %v330_v40 = vadd.f32 %v2923_v2, %v291_v26  ;;  %v361_v42 = vmax.f32 %v329_v33, 0.0  ;;  %v293_v44 = vmul.f32 %v2912_v1, %v254_v28  ;;  %v294_v45 = vmul.f32 %v2912_v1, %v255_v29  ;;  %v260_v46 = vld [vmem:[%s2918_s26 + $0x78] sm:$0xff] }
  0x19   : > { %397 = vst.msk [vmem:[#allocation2 + $0x40] sm:$0x3] %vm390_vm1, %v2796_v0  ;;  %400 = vst.msk [vmem:[#allocation2 + $0x58] sm:$0x3] %vm390_vm1, %v2796_v0  ;;  %v295_v48 = vmul.f32 %v2912_v1, %v256_v34  ;;  %v296_v49 = vmul.f32 %v2912_v1, %v257_v35  ;;  %v297_v50 = vmul.f32 %v2912_v1, %v258_v36  ;;  %v261_v55 = vld [vmem:[%s2918_s26 + $0x80] sm:$0xff]  ;;  %v262_v56 = vld [vmem:[%s2918_s26 + $0x88] sm:$0xff] }
  0x1a   : > { %403 = vst.msk [vmem:[#allocation2 + $0x70] sm:$0x3] %vm390_vm1, %v2796_v0  ;;  %406 = vst.msk [vmem:[#allocation2 + $0x88] sm:$0x3] %vm390_vm1, %v2796_v0  ;;  %v362_v47 = vmax.f32 %v330_v40, 0.0  ;;  %v331_v51 = vadd.f32 %v2923_v2, %v292_v43  ;;  %v332_v52 = vadd.f32 %v2923_v2, %v293_v44  ;;  %v333_v53 = vadd.f32 %v2923_v2, %v294_v45  ;;  %v263_v61 = vld [vmem:[%s2918_s26 + $0x90] sm:$0xff] }
  0x1b   : > { %409 = vst.msk [vmem:[#allocation2 + $0xa0] sm:$0x3] %vm390_vm1, %v2796_v0  ;;  %412 = vst.msk [vmem:[#allocation2 + $0xb8] sm:$0x3] %vm390_vm1, %v2796_v0  ;;  %v298_v54 = vmul.f32 %v2912_v1, %v259_v41  ;;  %v334_v57 = vadd.f32 %v2923_v2, %v295_v48  ;;  %v335_v58 = vadd.f32 %v2923_v2, %v296_v49  ;;  %v264_v62 = vld [vmem:[%s2918_s26 + $0x98] sm:$0xff]  ;;  %v265_v63 = vld [vmem:[%s2918_s26 + $0xa0] sm:$0xff] }
  0x1c   : > { %415 = vst.msk [vmem:[#allocation2 + $0xd0] sm:$0x3] %vm390_vm1, %v2796_v0  ;;  %418 = vst.msk [vmem:[#allocation2 + $0xe8] sm:$0x3] %vm390_vm1, %v2796_v0  ;;  %v336_v59 = vadd.f32 %v2923_v2, %v297_v50  ;;  %v299_v60 = vmul.f32 %v2912_v1, %v260_v46  ;;  %v364_v3 = vmax.f32 %v332_v52, 0.0  ;;  %v365_v4 = vmax.f32 %v333_v53, 0.0 }
  0x1d   : > { %421 = vst.msk [vmem:[#allocation2 + $0x100] sm:$0x3] %vm390_vm1, %v2796_v0  ;;  %424 = vst.msk [vmem:[#allocation2 + $0x118] sm:$0x3] %vm390_vm1, %v2796_v0  ;;  %v337_v5 = vadd.f32 %v2923_v2, %v298_v54  ;;  %v266_v6 = vld [vmem:[%s2918_s26 + $0xa8] sm:$0xff]  ;;  %v476_v7 = vld [vmem:[#allocation2] sm:$0xff]  ;;  %v300_v14 = vmul.f32 %v2912_v1, %v261_v55  ;;  %v301_v15 = vmul.f32 %v2912_v1, %v262_v56 }
  0x1e   : > { %427 = vst.msk [vmem:[#allocation2 + $0x130] sm:$0x3] %vm390_vm1, %v2796_v0  ;;  %430 = vst.msk [vmem:[#allocation2 + $0x148] sm:$0x3] %vm390_vm1, %v2796_v0  ;;  %v477_v8 = vld [vmem:[#allocation2 + $0x8] sm:$0xff]  ;;  %v366_v9 = vmax.f32 %v334_v57, 0.0  ;;  %v338_v12 = vadd.f32 %v2923_v2, %v299_v60  ;;  %v302_v16 = vmul.f32 %v2912_v1, %v263_v61  ;;  %v303_v21 = vmul.f32 %v2912_v1, %v264_v62 }
  0x1f   : > { %433 = vst.msk [vmem:[#allocation2 + $0x160] sm:$0x3] %vm390_vm1, %v2796_v0  ;;  %436 = vst.msk [vmem:[#allocation2 + $0x178] sm:$0x3] %vm390_vm1, %v2796_v0  ;;  %v541_v19 = vld [vmem:[#allocation2 + $0x9] sm:$0xff]  ;;  %v367_v10 = vmax.f32 %v335_v58, 0.0  ;;  %v304_v22 = vmul.f32 %v2912_v1, %v265_v63  ;;  %v305_v23 = vmul.f32 %v2912_v1, %v266_v6  ;;  %v339_v25 = vadd.f32 %v2923_v2, %v300_v14 }
  0x20   : > { %439 = vst.msk [vmem:[#allocation2 + $0x190] sm:$0x3] %vm390_vm1, %v2796_v0  ;;  %442 = vst.msk [vmem:[#allocation2 + $0x1a8] sm:$0x3] %vm390_vm1, %v2796_v0  ;;  %606 = vrot.lane.b32.xlu0 %v541_v19, %s2797_s29  ;;  %v363_v0 = vmax.f32 %v331_v51, 0.0  ;;  %v368_v11 = vmax.f32 %v336_v59, 0.0  ;;  %v340_v26 = vadd.f32 %v2923_v2, %v301_v15  ;;  %v341_v27 = vadd.f32 %v2923_v2, %v302_v16 }
  0x21   : > { %444 = vst.msk [vmem:[#allocation2 + $0x19] sm:$0xff] %vm387_vm0, %v355_v30  ;;  %445 = vst.msk [vmem:[#allocation2 + $0x21] sm:$0xff] %vm387_vm0, %v356_v31  ;;  %v369_v13 = vmax.f32 %v337_v5, 0.0  ;;  %v267_v17 = vld [vmem:[%s2918_s26 + $0xb0] sm:$0xff]  ;;  %v370_v20 = vmax.f32 %v338_v12, 0.0  ;;  %v268_v24 = vld [vmem:[%s2918_s26 + $0xb8] sm:$0xff]  ;;  %v342_v31 = vadd.f32 %v2923_v2, %v303_v21  ;;  %v344_v33 = vadd.f32 %v2923_v2, %v305_v23 }
  0x22   : > { %446 = vst.msk [vmem:[#allocation2 + $0x31] sm:$0xff] %vm387_vm0, %v357_v32  ;;  %447 = vst.msk [vmem:[#allocation2 + $0x39] sm:$0xff] %vm387_vm0, %v358_v37  ;;  %v269_v28 = vld [vmem:[%s2918_s26 + $0xc0] sm:$0xff]  ;;  %v343_v32 = vadd.f32 %v2923_v2, %v304_v22  ;;  %v306_v34 = vmul.f32 %v2912_v1, %v267_v17  ;;  %v270_v35 = vld [vmem:[%s2918_s26 + $0xc8] sm:$0xff]  ;;  %v371_v36 = vmax.f32 %v339_v25, 0.0  ;;  %v372_v37 = vmax.f32 %v340_v26, 0.0 }
  0x23   : > { %448 = vst.msk [vmem:[#allocation2 + $0x49] sm:$0xff] %vm387_vm0, %v359_v38  ;;  %449 = vst.msk [vmem:[#allocation2 + $0x51] sm:$0xff] %vm387_vm0, %v360_v39  ;;  %v373_v38 = vmax.f32 %v341_v27, 0.0  ;;  %v307_v39 = vmul.f32 %v2912_v1, %v268_v24  ;;  %v271_v40 = vld [vmem:[%s2918_s26 + $0xd0] sm:$0xff]  ;;  %v272_v41 = vld [vmem:[%s2918_s26 + $0xd8] sm:$0xff]  ;;  %v374_v43 = vmax.f32 %v342_v31, 0.0  ;;  %v308_v49 = vmul.f32 %v2912_v1, %v269_v28 }
  0x24   : > { %450 = vst.msk [vmem:[#allocation2 + $0x61] sm:$0xff] %vm387_vm0, %v361_v42  ;;  %451 = vst.msk [vmem:[#allocation2 + $0x69] sm:$0xff] %vm387_vm0, %v362_v47  ;;  %v273_v42 = vld [vmem:[%s2918_s26 + $0xe0] sm:$0xff]  ;;  %v375_v44 = vmax.f32 %v343_v32, 0.0  ;;  %v376_v45 = vmax.f32 %v344_v33, 0.0  ;;  %v345_v46 = vadd.f32 %v2923_v2, %v306_v34  ;;  %v274_v47 = vld [vmem:[%s2918_s26 + $0xe8] sm:$0xff]  ;;  %v309_v50 = vmul.f32 %v2912_v1, %v270_v35 }
  0x25   : > { %508 = vst.msk [vmem:[#allocation3] sm:$0xff] %vm387_vm0, %v476_v7  ;;  %509 = vst.msk [vmem:[#allocation3 + $0x8] sm:$0xff] %vm387_vm0, %v477_v8  ;;  %v346_v48 = vadd.f32 %v2923_v2, %v307_v39  ;;  %v310_v56 = vmul.f32 %v2912_v1, %v271_v40  ;;  %v311_v57 = vmul.f32 %v2912_v1, %v272_v41 }
  0x26   : > { %452 = vst.msk [vmem:[#allocation2 + $0x79] sm:$0xff] %vm387_vm0, %v363_v0  ;;  %453 = vst.msk [vmem:[#allocation2 + $0x81] sm:$0xff] %vm387_vm0, %v364_v3  ;;  %v377_v55 = vmax.f32 %v345_v46, 0.0  ;;  %v312_v58 = vmul.f32 %v2912_v1, %v273_v42  ;;  %v347_v60 = vadd.f32 %v2923_v2, %v308_v49  ;;  %v348_v61 = vadd.f32 %v2923_v2, %v309_v50 }
  0x27   : > { %454 = vst.msk [vmem:[#allocation2 + $0x91] sm:$0xff] %vm387_vm0, %v365_v4  ;;  %455 = vst.msk [vmem:[#allocation2 + $0x99] sm:$0xff] %vm387_vm0, %v366_v9  ;;  %v378_v59 = vmax.f32 %v346_v48, 0.0  ;;  %v313_v62 = vmul.f32 %v2912_v1, %v274_v47  ;;  %v349_v63 = vadd.f32 %v2923_v2, %v310_v56  ;;  %v350_v0 = vadd.f32 %v2923_v2, %v311_v57 }
  0x28   : > { %v2998_v18 = vld [vmem:[#allocation2 + $0x19] sm:$0xff]  ;;  %456 = vst.msk [vmem:[#allocation2 + $0xa9] sm:$0xff] %vm387_vm0, %v367_v10  ;;  %457 = vst.msk [vmem:[#allocation2 + $0xb1] sm:$0xff] %vm387_vm0, %v368_v11  ;;  %v3018_v29 = vld [vmem:[#allocation2 + $0x21] sm:$0xff]  ;;  %v351_v3 = vadd.f32 %v2923_v2, %v312_v58  ;;  %v379_v4 = vmax.f32 %v347_v60, 0.0  ;;  %v380_v5 = vmax.f32 %v348_v61, 0.0 }
  0x29   : > { %v3000_v19 = vld [vmem:[#allocation2 + $0x31] sm:$0xff]  ;;  %608 = vrot.lane.b32.xlu1 %v2998_v18, %s2797_s29  ;;  %458 = vst.msk [vmem:[#allocation2 + $0xc1] sm:$0xff] %vm387_vm0, %v369_v13  ;;  %459 = vst.msk [vmem:[#allocation2 + $0xc9] sm:$0xff] %vm387_vm0, %v370_v20  ;;  %v3043_v52 = vld [vmem:[#allocation2 + $0x20] sm:$0xff]  ;;  %v352_v6 = vadd.f32 %v2923_v2, %v313_v62  ;;  %v381_v9 = vmax.f32 %v349_v63, 0.0  ;;  %v382_v10 = vmax.f32 %v350_v0, 0.0 }
  0x2a   : > { %612 = vrot.lane.b32.xlu0 %v3000_v19, %s2797_s29  ;;  %v546_v30 = vld [vmem:[#allocation2 + $0x49] sm:$0xff]  ;;  %460 = vst.msk [vmem:[#allocation2 + $0xd9] sm:$0xff] %vm387_vm0, %v371_v36  ;;  %461 = vst.msk [vmem:[#allocation2 + $0xe1] sm:$0xff] %vm387_vm0, %v372_v37  ;;  %v3041_v51 = vld [vmem:[#allocation2 + $0x18] sm:$0xff]  ;;  %v383_v11 = vmax.f32 %v351_v3, 0.0 }
  0x2b   : > { %462 = vst.msk [vmem:[#allocation2 + $0xf1] sm:$0xff] %vm387_vm0, %v373_v38  ;;  %v545_v53 = vld [vmem:[#allocation2 + $0x39] sm:$0xff]  ;;  %v548_v54 = vld [vmem:[#allocation2 + $0x61] sm:$0xff]  ;;  %463 = vst.msk [vmem:[#allocation2 + $0xf9] sm:$0xff] %vm387_vm0, %v374_v43  ;;  %v384_v12 = vmax.f32 %v352_v6, 0.0 }
  0x2c   : > { %464 = vst.msk [vmem:[#allocation2 + $0x109] sm:$0xff] %vm387_vm0, %v375_v44  ;;  %465 = vst.msk [vmem:[#allocation2 + $0x111] sm:$0xff] %vm387_vm0, %v376_v45  ;;  %v547_v7 = vld [vmem:[#allocation2 + $0x51] sm:$0xff]  ;;  %v549_v15 = vld [vmem:[#allocation2 + $0x69] sm:$0xff] }
  0x2d   : > { %610 = vrot.lane.b32.xlu1 %v3018_v29, %s2797_s29  ;;  %510 = vst.msk [vmem:[#allocation3 + $0x10] sm:$0xff] %vm387_vm0, %v3041_v51  ;;  %511 = vst.msk [vmem:[#allocation3 + $0x18] sm:$0xff] %vm387_vm0, %v3043_v52  ;;  %v550_v8 = vld [vmem:[#allocation2 + $0x79] sm:$0xff]  ;;  %v3068_v13 = vld [vmem:[#allocation2 + $0x30] sm:$0xff] }
  0x2e   : > { %616 = vrot.lane.b32.xlu0 %v546_v30, %s2797_s29  ;;  %466 = vst.msk [vmem:[#allocation2 + $0x121] sm:$0xff] %vm387_vm0, %v377_v55  ;;  %467 = vst.msk [vmem:[#allocation2 + $0x129] sm:$0xff] %vm387_vm0, %v378_v59  ;;  %v3070_v14 = vld [vmem:[#allocation2 + $0x38] sm:$0xff]  ;;  %v3084_v17 = vld [vmem:[#allocation2 + $0x48] sm:$0xff] }
  0x2f   : > { %468 = vst.msk [vmem:[#allocation2 + $0x139] sm:$0xff] %vm387_vm0, %v379_v4  ;;  %469 = vst.msk [vmem:[#allocation2 + $0x141] sm:$0xff] %vm387_vm0, %v380_v5  ;;  %v552_v16 = vld [vmem:[#allocation2 + $0x91] sm:$0xff]  ;;  %v551_v21 = vld [vmem:[#allocation2 + $0x81] sm:$0xff] }
  0x30   : > { %470 = vst.msk [vmem:[#allocation2 + $0x151] sm:$0xff] %vm387_vm0, %v381_v9  ;;  %471 = vst.msk [vmem:[#allocation2 + $0x159] sm:$0xff] %vm387_vm0, %v382_v10  ;;  %v3086_v20 = vld [vmem:[#allocation2 + $0x50] sm:$0xff]  ;;  %v553_v23 = vld [vmem:[#allocation2 + $0x99] sm:$0xff] }
  0x31   : > { %614 = vrot.lane.b32.xlu1 %v545_v53, %s2797_s29  ;;  %472 = vst.msk [vmem:[#allocation2 + $0x169] sm:$0xff] %vm387_vm0, %v383_v11  ;;  %512 = vst.msk [vmem:[#allocation3 + $0x20] sm:$0xff] %vm387_vm0, %v3068_v13  ;;  %v554_v22 = vld [vmem:[#allocation2 + $0xa9] sm:$0xff]  ;;  %v556_v24 = vld [vmem:[#allocation2 + $0xc1] sm:$0xff] }
  0x32   : > { %620 = vrot.lane.b32.xlu0 %v548_v54, %s2797_s29  ;;  %513 = vst.msk [vmem:[#allocation3 + $0x28] sm:$0xff] %vm387_vm0, %v3070_v14  ;;  %473 = vst.msk [vmem:[#allocation2 + $0x171] sm:$0xff] %vm387_vm0, %v384_v12  ;;  %v3094_v25 = vld [vmem:[#allocation2 + $0x60] sm:$0xff]  ;;  %v3096_v26 = vld [vmem:[#allocation2 + $0x68] sm:$0xff] }
  0x33   : > { %514 = vst.msk [vmem:[#allocation3 + $0x30] sm:$0xff] %vm387_vm0, %v3084_v17  ;;  %515 = vst.msk [vmem:[#allocation3 + $0x38] sm:$0xff] %vm387_vm0, %v3086_v20  ;;  %v3098_v27 = vld [vmem:[#allocation2 + $0x78] sm:$0xff]  ;;  %v3106_v28 = vld [vmem:[#allocation2 + $0x80] sm:$0xff] }
  0x34   : > { %516 = vst.msk [vmem:[#allocation3 + $0x40] sm:$0xff] %vm387_vm0, %v3094_v25  ;;  %517 = vst.msk [vmem:[#allocation3 + $0x48] sm:$0xff] %vm387_vm0, %v3096_v26  ;;  %v3108_v30 = vld [vmem:[#allocation2 + $0x90] sm:$0xff]  ;;  %v3110_v31 = vld [vmem:[#allocation2 + $0x98] sm:$0xff] }
  0x35   : > { %618 = vrot.lane.b32.xlu1 %v547_v7, %s2797_s29  ;;  %518 = vst.msk [vmem:[#allocation3 + $0x50] sm:$0xff] %vm387_vm0, %v3098_v27  ;;  %v555_v32 = vld [vmem:[#allocation2 + $0xb1] sm:$0xff]  ;;  %519 = vst.msk [vmem:[#allocation3 + $0x58] sm:$0xff] %vm387_vm0, %v3106_v28  ;;  %v3118_v33 = vld [vmem:[#allocation2 + $0xa8] sm:$0xff] }
  0x36   : > { %624 = vrot.lane.b32.xlu0 %v550_v8, %s2797_s29  ;;  %520 = vst.msk [vmem:[#allocation3 + $0x60] sm:$0xff] %vm387_vm0, %v3108_v30  ;;  %521 = vst.msk [vmem:[#allocation3 + $0x68] sm:$0xff] %vm387_vm0, %v3110_v31  ;;  %v3120_v34 = vld [vmem:[#allocation2 + $0xb0] sm:$0xff]  ;;  %v3122_v35 = vld [vmem:[#allocation2 + $0xc0] sm:$0xff] }
  0x37   : > { %522 = vst.msk [vmem:[#allocation3 + $0x70] sm:$0xff] %vm387_vm0, %v3118_v33  ;;  %523 = vst.msk [vmem:[#allocation3 + $0x78] sm:$0xff] %vm387_vm0, %v3120_v34  ;;  %v3132_v36 = vld [vmem:[#allocation2 + $0xc8] sm:$0xff]  ;;  %v3134_v37 = vld [vmem:[#allocation2 + $0xd8] sm:$0xff] }
  0x38   : > { %524 = vst.msk [vmem:[#allocation3 + $0x80] sm:$0xff] %vm387_vm0, %v3122_v35  ;;  %v3136_v38 = vld [vmem:[#allocation2 + $0xe0] sm:$0xff]  ;;  %525 = vst.msk [vmem:[#allocation3 + $0x88] sm:$0xff] %vm387_vm0, %v3132_v36  ;;  %v3146_v40 = vld [vmem:[#allocation2 + $0xf0] sm:$0xff] }
  0x39   : > { %622 = vrot.lane.b32.xlu1 %v549_v15, %s2797_s29  ;;  %v3138_v39 = vld [vmem:[#allocation2 + $0xd9] sm:$0xff]  ;;  %526 = vst.msk [vmem:[#allocation3 + $0x90] sm:$0xff] %vm387_vm0, %v3134_v37  ;;  %527 = vst.msk [vmem:[#allocation3 + $0x98] sm:$0xff] %vm387_vm0, %v3136_v38  ;;  %v3157_v42 = vld [vmem:[#allocation2 + $0x108] sm:$0xff] }
  0x3a   : > { %628 = vrot.lane.b32.xlu0 %v552_v16, %s2797_s29  ;;  %v3148_v41 = vld [vmem:[#allocation2 + $0xf8] sm:$0xff]  ;;  %528 = vst.msk [vmem:[#allocation3 + $0xa0] sm:$0xff] %vm387_vm0, %v3146_v40  ;;  %v3159_v43 = vld [vmem:[#allocation2 + $0x110] sm:$0xff]  ;;  %530 = vst.msk [vmem:[#allocation3 + $0xb0] sm:$0xff] %vm387_vm0, %v3157_v42 }
  0x3b   : > { %529 = vst.msk [vmem:[#allocation3 + $0xa8] sm:$0xff] %vm387_vm0, %v3148_v41  ;;  %v557_v44 = vld [vmem:[#allocation2 + $0xc9] sm:$0xff]  ;;  %v3161_v45 = vld [vmem:[#allocation2 + $0xf1] sm:$0xff]  ;;  %531 = vst.msk [vmem:[#allocation3 + $0xb8] sm:$0xff] %vm387_vm0, %v3159_v43 }
  0x3c   : > { %v3170_v46 = vld [vmem:[#allocation2 + $0x120] sm:$0xff]  ;;  %v3172_v47 = vld [vmem:[#allocation2 + $0x128] sm:$0xff]  ;;  %v3186_v50 = vld [vmem:[#allocation2 + $0x138] sm:$0xff] }
  0x3d   : > { %626 = vrot.lane.b32.xlu1 %v551_v21, %s2797_s29  ;;  %v3174_v48 = vld [vmem:[#allocation2 + $0xe1] sm:$0xff]  ;;  %v3176_v49 = vld [vmem:[#allocation2 + $0x109] sm:$0xff]  ;;  %532 = vst.msk [vmem:[#allocation3 + $0xc0] sm:$0xff] %vm387_vm0, %v3170_v46  ;;  %533 = vst.msk [vmem:[#allocation3 + $0xc8] sm:$0xff] %vm387_vm0, %v3172_v47 }
  0x3e   : > { %632 = vrot.lane.b32.xlu0 %v554_v22, %s2797_s29  ;;  %v3188_v53 = vld [vmem:[#allocation2 + $0x140] sm:$0xff]  ;;  %534 = vst.msk [vmem:[#allocation3 + $0xd0] sm:$0xff] %vm387_vm0, %v3186_v50  ;;  %v3199_v56 = vld [vmem:[#allocation2 + $0x150] sm:$0xff]  ;;  %v3201_v57 = vld [vmem:[#allocation2 + $0x158] sm:$0xff] }
  0x3f   : > { %v3190_v54 = vld [vmem:[#allocation2 + $0xf9] sm:$0xff]  ;;  %v564_v55 = vld [vmem:[#allocation2 + $0x121] sm:$0xff]  ;;  %535 = vst.msk [vmem:[#allocation3 + $0xd8] sm:$0xff] %vm387_vm0, %v3188_v53  ;;  %v3203_v58 = vld [vmem:[#allocation2 + $0x111] sm:$0xff] }
  0x40   : > { %v566_v59 = vld [vmem:[#allocation2 + $0x139] sm:$0xff]  ;;  %536 = vst.msk [vmem:[#allocation3 + $0xe0] sm:$0xff] %vm387_vm0, %v3199_v56  ;;  %537 = vst.msk [vmem:[#allocation3 + $0xe8] sm:$0xff] %vm387_vm0, %v3201_v57  ;;  %v3212_v60 = vld [vmem:[#allocation2 + $0x168] sm:$0xff] }
  0x41   : > { %630 = vrot.lane.b32.xlu1 %v553_v23, %s2797_s29  ;;  %v3214_v61 = vld [vmem:[#allocation2 + $0x170] sm:$0xff]  ;;  %538 = vst.msk [vmem:[#allocation3 + $0xf0] sm:$0xff] %vm387_vm0, %v3212_v60  ;;  %v276_v4 = vld [vmem:[%s2918_s26 + $0xf8] sm:$0xff]  ;;  %v567_v8 = vld [vmem:[#allocation2 + $0x141] sm:$0xff] }
  0x42   : > { %636 = vrot.lane.b32.xlu0 %v556_v24, %s2797_s29  ;;  %v275_v62 = vld [vmem:[%s2918_s26 + $0xf0] sm:$0xff]  ;;  %539 = vst.msk [vmem:[#allocation3 + $0xf8] sm:$0xff] %vm387_vm0, %v3214_v61  ;;  %v315_v5 = vmul.f32 %v2912_v1, %v276_v4  ;;  %v733_v12 = vld [vmem:[#allocation2 + $0x2] sm:$0xff]  ;;  %v3234_v15 = vld [vmem:[#allocation2 + $0x1a] sm:$0xff]  ;;  %s3857_s26 = scalar_lea.vmem %s4007_s4, %s2907_s21 }
  0x43   : > { %v565_v63 = vld [vmem:[#allocation2 + $0x129] sm:$0xff]  ;;  %v568_v0 = vld [vmem:[#allocation2 + $0x151] sm:$0xff]  ;;  %v314_v3 = vmul.f32 %v2912_v1, %v275_v62  ;;  %v569_v1 = vld [vmem:[#allocation2 + $0x159] sm:$0xff] }
  0x44   : > { %v354_v7 = vadd.f32 %v2923_v2, %v315_v5  ;;  %v570_v9 = vld [vmem:[#allocation2 + $0x169] sm:$0xff]  ;;  %v3239_v21 = vld [vmem:[#allocation2 + $0x32] sm:$0xff]  ;;  %v3252_v24 = vld [vmem:[#allocation2 + $0x3a] sm:$0xff] }
  0x45   : > { %634 = vrot.lane.b32.xlu1 %v555_v32, %s2797_s29  ;;  %v353_v6 = vadd.f32 %v2923_v2, %v314_v3  ;;  %v571_v2 = vld [vmem:[#allocation2 + $0x171] sm:$0xff]  ;;  %v3244_v22 = vld [vmem:[#allocation2 + $0x22] sm:$0xff]  ;;  %v746_v3 = vld [vmem:[#allocation2 + $0x9a] sm:$0xff] }
  0x46   : > { %640 = vrot.lane.b32.xlu0 %v3138_v39, %s2797_s29  ;;  %v386_v11 = vmax.f32 %v354_v7, 0.0  ;;  %v734_v16 = vld [vmem:[#allocation2 + $0xa] sm:$0xff]  ;;  %v3254_v32 = vld [vmem:[#allocation2 + $0x62] sm:$0xff]  ;;  %v745_v62 = vld [vmem:[#allocation2 + $0x92] sm:$0xff] }
  0x47   : > { %v385_v10 = vmax.f32 %v353_v6, 0.0  ;;  %v3246_v23 = vld [vmem:[#allocation2 + $0x4a] sm:$0xff]  ;;  %v749_v4 = vld [vmem:[#allocation2 + $0xc2] sm:$0xff]  ;;  %v748_v5 = vld [vmem:[#allocation2 + $0xb2] sm:$0xff] }
  0x48   : > { %475 = vst.msk [vmem:[#allocation2 + $0x189] sm:$0xff] %vm387_vm0, %v386_v11  ;;  %v3271_v6 = vld [vmem:[#allocation2 + $0xda] sm:$0xff]  ;;  %v750_v7 = vld [vmem:[#allocation2 + $0xca] sm:$0xff] }
  0x49   : > { %638 = vrot.lane.b32.xlu1 %v557_v44, %s2797_s29  ;;  %474 = vst.msk [vmem:[#allocation2 + $0x181] sm:$0xff] %vm387_vm0, %v385_v10  ;;  %v3260_v44 = vld [vmem:[#allocation2 + $0x52] sm:$0xff]  ;;  %v3283_v10 = vld [vmem:[#allocation2 + $0x10a] sm:$0xff]  ;;  %v3289_v11 = vld [vmem:[#allocation2 + $0xfa] sm:$0xff] }
  0x4a   : > { %644 = vrot.lane.b32.xlu0 %v3161_v45, %s2797_s29 }
  0x4d   : > { %642 = vrot.lane.b32.xlu1 %v3174_v48, %s2797_s29 }
  0x4e   : > { %648 = vrot.lane.b32.xlu0 %v3176_v49, %s2797_s29 }
  0x51   : > { %646 = vrot.lane.b32.xlu1 %v3190_v54, %s2797_s29 }
  0x52   : > { %652 = vrot.lane.b32.xlu0 %v564_v55, %s2797_s29  ;;  %v743_v55 = vld [vmem:[#allocation2 + $0x7a] sm:$0xff] }
  0x55   : > { %650 = vrot.lane.b32.xlu1 %v3203_v58, %s2797_s29 }
  0x56   : > { %656 = vrot.lane.b32.xlu0 %v566_v59, %s2797_s29  ;;  %v742_v59 = vld [vmem:[#allocation2 + $0x6a] sm:$0xff] }
  0x59   : > { %654 = vrot.lane.b32.xlu1 %v565_v63, %s2797_s29  ;;  %v744_v63 = vld [vmem:[#allocation2 + $0x82] sm:$0xff] }
  0x5a   : > { %660 = vrot.lane.b32.xlu0 %v568_v0, %s2797_s29  ;;  %v747_v0 = vld [vmem:[#allocation2 + $0xaa] sm:$0xff] }
  0x5d   : > { %658 = vrot.lane.b32.xlu1 %v567_v8, %s2797_s29  ;;  %v3276_v8 = vld [vmem:[#allocation2 + $0xf2] sm:$0xff] }
  0x5e   : > { %664 = vrot.lane.b32.xlu0 %v570_v9, %s2797_s29  ;;  %v3281_v9 = vld [vmem:[#allocation2 + $0xe2] sm:$0xff] }
  0x61   : > { %662 = vrot.lane.b32.xlu1 %v569_v1, %s2797_s29  ;;  %v3291_v1 = vld [vmem:[#allocation2 + $0x122] sm:$0xff] }
  0x62   : > { %797 = vrot.lane.b32.xlu0 %v733_v12, %s2798_s30 }
  0x65   : > { %666 = vrot.lane.b32.xlu1 %v571_v2, %s2797_s29  ;;  %v3298_v2 = vld [vmem:[#allocation2 + $0x112] sm:$0xff]  ;;  %s3870_s29 = scalar_lea.vmem %s4008_s5, %s2907_s21 }
  0x66   : > { %801 = vrot.lane.b32.xlu0 %v3234_v15, %s2798_s30 }
  0x69   : > { %799 = vrot.lane.b32.xlu1 %v734_v16, %s2798_s30  ;;  %v759_v16 = vld [vmem:[#allocation2 + $0x13a] sm:$0xff] }
  0x6a   : > { %805 = vrot.lane.b32.xlu0 %v3239_v21, %s2798_s30 }
  0x6d   : > { %803 = vrot.lane.b32.xlu1 %v3244_v22, %s2798_s30 }
  0x6e   : > { %809 = vrot.lane.b32.xlu0 %v3246_v23, %s2798_s30 }
  0x71   : > { %807 = vrot.lane.b32.xlu1 %v3252_v24, %s2798_s30 }
  0x72   : > { %813 = vrot.lane.b32.xlu0 %v3254_v32, %s2798_s30 }
  0x75   : > { %811 = vrot.lane.b32.xlu1 %v3260_v44, %s2798_s30 }
  0x76   : > { %817 = vrot.lane.b32.xlu0 %v743_v55, %s2798_s30 }
  0x79   : > { %815 = vrot.lane.b32.xlu1 %v742_v59, %s2798_s30  ;;  %v3304_v59 = vld [vmem:[#allocation2 + $0x12a] sm:$0xff] }
  0x7a   : > { %821 = vrot.lane.b32.xlu0 %v745_v62, %s2798_s30  ;;  %v761_v62 = vld [vmem:[#allocation2 + $0x152] sm:$0xff] }
  0x7d   : > { %819 = vrot.lane.b32.xlu1 %v744_v63, %s2798_s30  ;;  %v760_v63 = vld [vmem:[#allocation2 + $0x142] sm:$0xff] }
  0x7e   : > { %825 = vrot.lane.b32.xlu0 %v747_v0, %s2798_s30  ;;  %v763_v0 = vld [vmem:[#allocation2 + $0x16a] sm:$0xff] }
  0x80   : > { %v605_v12 = vpop.permute.xlu0 %604 }
  0x81   : > { %823 = vrot.lane.b32.xlu1 %v746_v3, %s2798_s30  ;;  %701 = vst.msk [vmem:[#allocation3] sm:$0xff] %vm700_vm2, %v605_v12 }
  0x82   : > { %829 = vrot.lane.b32.xlu0 %v749_v4, %s2798_s30 }
  0x85   : > { %827 = vrot.lane.b32.xlu1 %v748_v5, %s2798_s30  ;;  %v762_v5 = vld [vmem:[#allocation2 + $0x15a] sm:$0xff] }
  0x86   : > { %833 = vrot.lane.b32.xlu0 %v3271_v6, %s2798_s30 }
  0x89   : > { %831 = vrot.lane.b32.xlu1 %v750_v7, %s2798_s30 }
  0x8a   : > { %837 = vrot.lane.b32.xlu0 %v3276_v8, %s2798_s30 }
  0x8d   : > { %835 = vrot.lane.b32.xlu1 %v3281_v9, %s2798_s30 }
  0x8e   : > { %841 = vrot.lane.b32.xlu0 %v3283_v10, %s2798_s30 }
  0x91   : > { %839 = vrot.lane.b32.xlu1 %v3289_v11, %s2798_s30 }
  0x92   : > { %845 = vrot.lane.b32.xlu0 %v3291_v1, %s2798_s30  ;;  %v607_v55 = vpop.permute.xlu0 %606 }
  0x93   : > { %702 = vst.msk [vmem:[#allocation3 + $0x8] sm:$0xff] %vm700_vm2, %v607_v55 }
  0x95   : > { %843 = vrot.lane.b32.xlu1 %v3298_v2, %s2798_s30 }
  0x96   : > { %849 = vrot.lane.b32.xlu0 %v759_v16, %s2798_s30  ;;  %v764_v16 = vld [vmem:[#allocation2 + $0x172] sm:$0xff] }
  0x99   : > { %847 = vrot.lane.b32.xlu1 %v3304_v59, %s2798_s30 }
  0x9a   : > { %853 = vrot.lane.b32.xlu0 %v761_v62, %s2798_s30 }
  0x9b   : > { %v609_v3 = vpop.permute.xlu1 %608 }
  0x9c   : > { %v613_v4 = vpop.permute.xlu0 %612  ;;  %703 = vst.msk [vmem:[#allocation3 + $0x10] sm:$0xff] %vm700_vm2, %v609_v3 }
  0x9d   : > { %705 = vst.msk [vmem:[#allocation3 + $0x20] sm:$0xff] %vm700_vm2, %v613_v4  ;;  %851 = vrot.lane.b32.xlu1 %v760_v63, %s2798_s30 }
  0x9e   : > { %857 = vrot.lane.b32.xlu0 %v763_v0, %s2798_s30 }
  0x9f   : > { %v611_v7 = vpop.permute.xlu1 %610 }
  0xa0   : > { %v617_v12 = vpop.permute.xlu0 %616  ;;  %704 = vst.msk [vmem:[#allocation3 + $0x18] sm:$0xff] %vm700_vm2, %v611_v7 }
  0xa1   : > { %707 = vst.msk [vmem:[#allocation3 + $0x30] sm:$0xff] %vm700_vm2, %v617_v12  ;;  %855 = vrot.lane.b32.xlu1 %v762_v5, %s2798_s30 }
  0xa2   : > { %990 = vrot.lane.b32.xlu0 %v3041_v51, %s2799_s6 }
  0xa3   : > { %v615_v55 = vpop.permute.xlu1 %614 }
  0xa4   : > { %v621_v62 = vpop.permute.xlu0 %620  ;;  %706 = vst.msk [vmem:[#allocation3 + $0x28] sm:$0xff] %vm700_vm2, %v615_v55 }
  0xa5   : > { %709 = vst.msk [vmem:[#allocation3 + $0x40] sm:$0xff] %vm700_vm2, %v621_v62  ;;  %859 = vrot.lane.b32.xlu1 %v764_v16, %s2798_s30 }
  0xa6   : > { %994 = vrot.lane.b32.xlu0 %v3068_v13, %s2799_s6 }
  0xa7   : > { %v619_v63 = vpop.permute.xlu1 %618 }
  0xa8   : > { %v625_v0 = vpop.permute.xlu0 %624  ;;  %708 = vst.msk [vmem:[#allocation3 + $0x38] sm:$0xff] %vm700_vm2, %v619_v63 }
  0xa9   : > { %711 = vst.msk [vmem:[#allocation3 + $0x50] sm:$0xff] %vm700_vm2, %v625_v0  ;;  %992 = vrot.lane.b32.xlu1 %v3043_v52, %s2799_s6 }
  0xaa   : > { %998 = vrot.lane.b32.xlu0 %v3084_v17, %s2799_s6 }
  0xab   : > { %v623_v51 = vpop.permute.xlu1 %622 }
  0xac   : > { %v629_v3 = vpop.permute.xlu0 %628  ;;  %710 = vst.msk [vmem:[#allocation3 + $0x48] sm:$0xff] %vm700_vm2, %v623_v51 }
  0xad   : > { %713 = vst.msk [vmem:[#allocation3 + $0x60] sm:$0xff] %vm700_vm2, %v629_v3  ;;  %996 = vrot.lane.b32.xlu1 %v3070_v14, %s2799_s6 }
  0xae   : > { %1002 = vrot.lane.b32.xlu0 %v3094_v25, %s2799_s6 }
  0xaf   : > { %v627_v4 = vpop.permute.xlu1 %626 }
  0xb0   : > { %v633_v5 = vpop.permute.xlu0 %632  ;;  %712 = vst.msk [vmem:[#allocation3 + $0x58] sm:$0xff] %vm700_vm2, %v627_v4 }
  0xb1   : > { %715 = vst.msk [vmem:[#allocation3 + $0x70] sm:$0xff] %vm700_vm2, %v633_v5  ;;  %1000 = vrot.lane.b32.xlu1 %v3086_v20, %s2799_s6 }
  0xb2   : > { %1006 = vrot.lane.b32.xlu0 %v3098_v27, %s2799_s6 }
  0xb3   : > { %v631_v52 = vpop.permute.xlu1 %630 }
  0xb4   : > { %v637_v7 = vpop.permute.xlu0 %636  ;;  %714 = vst.msk [vmem:[#allocation3 + $0x68] sm:$0xff] %vm700_vm2, %v631_v52  ;;  %v956_v52 = vld [vmem:[#allocation2 + $0x180] sm:$0xff] }
  0xb5   : > { %717 = vst.msk [vmem:[#allocation3 + $0x80] sm:$0xff] %vm700_vm2, %v637_v7  ;;  %1004 = vrot.lane.b32.xlu1 %v3096_v26, %s2799_s6 }
  0xb6   : > { %1010 = vrot.lane.b32.xlu0 %v3108_v30, %s2799_s6 }
  0xb7   : > { %v635_v12 = vpop.permute.xlu1 %634 }
  0xb8   : > { %v641_v16 = vpop.permute.xlu0 %640  ;;  %716 = vst.msk [vmem:[#allocation3 + $0x78] sm:$0xff] %vm700_vm2, %v635_v12 }
  0xb9   : > { %719 = vst.msk [vmem:[#allocation3 + $0x90] sm:$0xff] %vm700_vm2, %v641_v16  ;;  %1008 = vrot.lane.b32.xlu1 %v3106_v28, %s2799_s6 }
  0xba   : > { %1014 = vrot.lane.b32.xlu0 %v3118_v33, %s2799_s6 }
  0xbb   : > { %v639_v55 = vpop.permute.xlu1 %638 }
  0xbc   : > { %v645_v62 = vpop.permute.xlu0 %644  ;;  %718 = vst.msk [vmem:[#allocation3 + $0x88] sm:$0xff] %vm700_vm2, %v639_v55 }
  0xbd   : > { %721 = vst.msk [vmem:[#allocation3 + $0xa0] sm:$0xff] %vm700_vm2, %v645_v62  ;;  %1012 = vrot.lane.b32.xlu1 %v3110_v31, %s2799_s6 }
  0xbe   : > { %1018 = vrot.lane.b32.xlu0 %v3122_v35, %s2799_s6 }
  0xbf   : > { %v643_v30 = vpop.permute.xlu1 %642 }
  0xc0   : > { %v649_v63 = vpop.permute.xlu0 %648  ;;  %720 = vst.msk [vmem:[#allocation3 + $0x98] sm:$0xff] %vm700_vm2, %v643_v30 }
  0xc1   : > { %723 = vst.msk [vmem:[#allocation3 + $0xb0] sm:$0xff] %vm700_vm2, %v649_v63  ;;  %1016 = vrot.lane.b32.xlu1 %v3120_v34, %s2799_s6 }
  0xc2   : > { %1022 = vrot.lane.b32.xlu0 %v3134_v37, %s2799_s6 }
  0xc3   : > { %v647_v33 = vpop.permute.xlu1 %646 }
  0xc4   : > { %v653_v0 = vpop.permute.xlu0 %652  ;;  %722 = vst.msk [vmem:[#allocation3 + $0xa8] sm:$0xff] %vm700_vm2, %v647_v33 }
  0xc5   : > { %725 = vst.msk [vmem:[#allocation3 + $0xc0] sm:$0xff] %vm700_vm2, %v653_v0  ;;  %1020 = vrot.lane.b32.xlu1 %v3132_v36, %s2799_s6 }
  0xc6   : > { %1026 = vrot.lane.b32.xlu0 %v3146_v40, %s2799_s6 }
  0xc7   : > { %v651_v31 = vpop.permute.xlu1 %650 }
  0xc8   : > { %v657_v35 = vpop.permute.xlu0 %656  ;;  %724 = vst.msk [vmem:[#allocation3 + $0xb8] sm:$0xff] %vm700_vm2, %v651_v31 }
  0xc9   : > { %727 = vst.msk [vmem:[#allocation3 + $0xd0] sm:$0xff] %vm700_vm2, %v657_v35  ;;  %1024 = vrot.lane.b32.xlu1 %v3136_v38, %s2799_s6 }
  0xca   : > { %1030 = vrot.lane.b32.xlu0 %v3157_v42, %s2799_s6 }
  0xcb   : > { %v655_v34 = vpop.permute.xlu1 %654 }
  0xcc   : > { %v661_v37 = vpop.permute.xlu0 %660  ;;  %726 = vst.msk [vmem:[#allocation3 + $0xc8] sm:$0xff] %vm700_vm2, %v655_v34  ;;  %v2118_v34 = vld [vmem:[%s4006_s3 + $0x8] sm:$0xff] }
  0xcd   : > { %729 = vst.msk [vmem:[#allocation3 + $0xe0] sm:$0xff] %vm700_vm2, %v661_v37  ;;  %1028 = vrot.lane.b32.xlu1 %v3148_v41, %s2799_s6 }
  0xce   : > { %1034 = vrot.lane.b32.xlu0 %v3170_v46, %s2799_s6 }
  0xcf   : > { %v659_v36 = vpop.permute.xlu1 %658 }
  0xd0   : > { %v665_v51 = vpop.permute.xlu0 %664  ;;  %728 = vst.msk [vmem:[#allocation3 + $0xd8] sm:$0xff] %vm700_vm2, %v659_v36 }
  0xd1   : > { %731 = vst.msk [vmem:[#allocation3 + $0xf0] sm:$0xff] %vm700_vm2, %v665_v51  ;;  %1032 = vrot.lane.b32.xlu1 %v3159_v43, %s2799_s6 }
  0xd2   : > { %1038 = vrot.lane.b32.xlu0 %v3186_v50, %s2799_s6 }
  0xd3   : > { %v663_v38 = vpop.permute.xlu1 %662 }
  0xd4   : > { %v798_v3 = vpop.permute.xlu0 %797  ;;  %730 = vst.msk [vmem:[#allocation3 + $0xe8] sm:$0xff] %vm700_vm2, %v663_v38  ;;  %v2120_v38 = vld [vmem:[%s4006_s3 + $0x18] sm:$0xff] }
  0xd5   : > { %894 = vst.msk [vmem:[#allocation3] sm:$0xff] %vm893_vm3, %v798_v3  ;;  %1036 = vrot.lane.b32.xlu1 %v3172_v47, %s2799_s6 }
  0xd6   : > { %1042 = vrot.lane.b32.xlu0 %v3199_v56, %s2799_s6 }
  0xd7   : > { %v667_v4 = vpop.permute.xlu1 %666 }
  0xd8   : > { %v802_v5 = vpop.permute.xlu0 %801  ;;  %732 = vst.msk [vmem:[#allocation3 + $0xf8] sm:$0xff] %vm700_vm2, %v667_v4 }
  0xd9   : > { %896 = vst.msk [vmem:[#allocation3 + $0x10] sm:$0xff] %vm893_vm3, %v802_v5  ;;  %1040 = vrot.lane.b32.xlu1 %v3188_v53, %s2799_s6 }
  0xda   : > { %1046 = vrot.lane.b32.xlu0 %v3212_v60, %s2799_s6  ;;  %v957_v60 = vld [vmem:[#allocation2 + $0x188] sm:$0xff] }
  0xdb   : > { %v800_v7 = vpop.permute.xlu1 %799 }
  0xdc   : > { %v806_v12 = vpop.permute.xlu0 %805  ;;  %895 = vst.msk [vmem:[#allocation3 + $0x8] sm:$0xff] %vm893_vm3, %v800_v7 }
  0xdd   : > { %898 = vst.msk [vmem:[#allocation3 + $0x20] sm:$0xff] %vm893_vm3, %v806_v12  ;;  %1044 = vrot.lane.b32.xlu1 %v3201_v57, %s2799_s6  ;;  %v2121_v12 = vld [vmem:[%s4006_s3 + $0x20] sm:$0xf] }
  0xde   : > { %1050 = vrot.lane.b32.xlu0 %v956_v52, %s2799_s6 }
  0xdf   : > { %v804_v16 = vpop.permute.xlu1 %803 }
  0xe0   : > { %v810_v55 = vpop.permute.xlu0 %809  ;;  %897 = vst.msk [vmem:[#allocation3 + $0x18] sm:$0xff] %vm893_vm3, %v804_v16 }
  0xe1   : > { %900 = vst.msk [vmem:[#allocation3 + $0x30] sm:$0xff] %vm893_vm3, %v810_v55  ;;  %1048 = vrot.lane.b32.xlu1 %v3214_v61, %s2799_s6 }
  0xe2   : > { %1183 = vrot.lane.b32.xlu0 %v2998_v18, %s2800_s7 }
  0xe3   : > { %v808_v62 = vpop.permute.xlu1 %807 }
  0xe4   : > { %v814_v30 = vpop.permute.xlu0 %813  ;;  %899 = vst.msk [vmem:[#allocation3 + $0x28] sm:$0xff] %vm893_vm3, %v808_v62 }
  0xe5   : > { %902 = vst.msk [vmem:[#allocation3 + $0x40] sm:$0xff] %vm893_vm3, %v814_v30  ;;  %1052 = vrot.lane.b32.xlu1 %v957_v60, %s2799_s6 }
  0xe6   : > { %1187 = vrot.lane.b32.xlu0 %v3000_v19, %s2800_s7 }
  0xe7   : > { %v812_v63 = vpop.permute.xlu1 %811 }
  0xe8   : > { %v818_v33 = vpop.permute.xlu0 %817  ;;  %901 = vst.msk [vmem:[#allocation3 + $0x38] sm:$0xff] %vm893_vm3, %v812_v63 }
  0xe9   : > { %904 = vst.msk [vmem:[#allocation3 + $0x50] sm:$0xff] %vm893_vm3, %v818_v33  ;;  %1185 = vrot.lane.b32.xlu1 %v3018_v29, %s2800_s7 }
  0xea   : > { %1217 = vrot.lane.b32.xlu0 %v3174_v48, %s2800_s7 }
  0xeb   : > { %v816_v18 = vpop.permute.xlu1 %815 }
  0xec   : > { %v822_v61 = vpop.permute.xlu0 %821  ;;  %903 = vst.msk [vmem:[#allocation3 + $0x48] sm:$0xff] %vm893_vm3, %v816_v18 }
  0xed   : > { %906 = vst.msk [vmem:[#allocation3 + $0x60] sm:$0xff] %vm893_vm3, %v822_v61  ;;  %1215 = vrot.lane.b32.xlu1 %v3138_v39, %s2800_s7 }
  0xee   : > { %1408 = vrot.lane.b32.xlu0 %v3271_v6, %s2801_s8 }
  0xef   : > { %v820_v19 = vpop.permute.xlu1 %819 }
  0xf0   : > { %v826_v0 = vpop.permute.xlu0 %825  ;;  %905 = vst.msk [vmem:[#allocation3 + $0x58] sm:$0xff] %vm893_vm3, %v820_v19 }
  0xf1   : > { %908 = vst.msk [vmem:[#allocation3 + $0x70] sm:$0xff] %vm893_vm3, %v826_v0  ;;  %1376 = vrot.lane.b32.xlu1 %v3234_v15, %s2801_s8 }
  0xf2   : > { %1410 = vrot.lane.b32.xlu0 %v3281_v9, %s2801_s8 }
  0xf3   : > { %v824_v29 = vpop.permute.xlu1 %823 }
  0xf4   : > { %v830_v48 = vpop.permute.xlu0 %829  ;;  %907 = vst.msk [vmem:[#allocation3 + $0x68] sm:$0xff] %vm893_vm3, %v824_v29 }
  0xf5   : > { %910 = vst.msk [vmem:[#allocation3 + $0x80] sm:$0xff] %vm893_vm3, %v830_v48  ;;  %1378 = vrot.lane.b32.xlu1 %v3244_v22, %s2801_s8  ;;  %v1700_v22 = vld [vmem:[#allocation2 + $0x39] sm:$0xff] }
  0xf6   : > { %1602 = vrot.lane.b32.xlu0 %v3146_v40, %s2802_s9  ;;  %v1699_v40 = vld [vmem:[#allocation2 + $0x31] sm:$0xff] }
  0xf7   : > { %v828_v39 = vpop.permute.xlu1 %827 }
  0xf8   : > { %v834_v6 = vpop.permute.xlu0 %833  ;;  %909 = vst.msk [vmem:[#allocation3 + $0x78] sm:$0xff] %vm893_vm3, %v828_v39 }
  0xf9   : > { %912 = vst.msk [vmem:[#allocation3 + $0x90] sm:$0xff] %vm893_vm3, %v834_v6  ;;  %1570 = vrot.lane.b32.xlu1 %v3068_v13, %s2802_s9 }
  0xfa   : > { %1604 = vrot.lane.b32.xlu0 %v3148_v41, %s2802_s9 }
  0xfb   : > { %v832_v15 = vpop.permute.xlu1 %831 }
  0xfc   : > { %v838_v9 = vpop.permute.xlu0 %837  ;;  %911 = vst.msk [vmem:[#allocation3 + $0x88] sm:$0xff] %vm893_vm3, %v832_v15 }
  0xfd   : > { %914 = vst.msk [vmem:[#allocation3 + $0xa0] sm:$0xff] %vm893_vm3, %v838_v9  ;;  %1572 = vrot.lane.b32.xlu1 %v3070_v14, %s2802_s9  ;;  %v2117_v14 = vld [vmem:[%s4006_s3] sm:$0xff] }
  0xfe   : > { %1795 = vrot.lane.b32.xlu0 %v3161_v45, %s2803_s10  ;;  %v2757_v51 = vpack.c.bf16 %v2118_v34, %v2117_v14  ;;  %v1318_v14 = vld [vmem:[#allocation2 + $0x62] sm:$0xff] }
  0xff   : > { %v836_v31 = vpop.permute.xlu1 %835 }
 0x100   : > { %v842_v13 = vpop.permute.xlu0 %841  ;;  %913 = vst.msk [vmem:[#allocation3 + $0x98] sm:$0xff] %vm893_vm3, %v836_v31  ;;  %2758 = vmatprep.subr.bf16.mxu0 %v2757_v51  ;;  %2765 = vmatprep.subr.bf16.mxu1 %v2757_v51 }
 0x101   : > { %916 = vst.msk [vmem:[#allocation3 + $0xb0] sm:$0xff] %vm893_vm3, %v842_v13  ;;  %1763 = vrot.lane.b32.xlu1 %v1699_v40, %s2803_s10  ;;  %2760 = vmatpush3.bf16.msra.mxu0 %v2757_v51 }
 0x102   : > { %1765 = vrot.lane.b32.xlu0 %v1700_v22, %s2803_s10  ;;  %2768 = vmatpush3.bf16.msra.mxu1 %v2757_v51 }
 0x103   : > { %v840_v41 = vpop.permute.xlu1 %839 }
 0x104   : > { %v846_v35 = vpop.permute.xlu0 %845  ;;  %915 = vst.msk [vmem:[#allocation3 + $0xa8] sm:$0xff] %vm893_vm3, %v840_v41 }
 0x105   : > { %918 = vst.msk [vmem:[#allocation3 + $0xc0] sm:$0xff] %vm893_vm3, %v846_v35  ;;  %1219 = vrot.lane.b32.xlu1 %v3161_v45, %s2800_s7  ;;  %v2119_v45 = vld [vmem:[%s4006_s3 + $0x10] sm:$0xff] }
 0x106   : > { %1956 = vrot.lane.b32.xlu0 %v3239_v21, %s2804_s11  ;;  %v2761_v5 = vpack.c.bf16 %v2120_v38, %v2119_v45 }
 0x107   : > { %v844_v37 = vpop.permute.xlu1 %843 }
 0x108   : > { %v850_v36 = vpop.permute.xlu0 %849  ;;  %917 = vst.msk [vmem:[#allocation3 + $0xb8] sm:$0xff] %vm893_vm3, %v844_v37  ;;  %2762 = vmatprep.subr.bf16.mxu0 %v2761_v5  ;;  %2766 = vmatprep.subr.bf16.mxu1 %v2761_v5 }
 0x109   : > { %920 = vst.msk [vmem:[#allocation3 + $0xd0] sm:$0xff] %vm893_vm3, %v850_v36  ;;  %1797 = vrot.lane.b32.xlu1 %v3190_v54, %s2803_s10  ;;  %2764 = vmatpush3.bf16.msra.mxu0 %v2761_v5 }
 0x10a   : > { %1189 = vrot.lane.b32.xlu0 %v1700_v22, %s2800_s7  ;;  %2769 = vmatpush3.bf16.msra.mxu1 %v2761_v5 }
 0x10b   : > { %v848_v3 = vpop.permute.xlu1 %847  ;;  %2707 = vmatprep.subr.msk.mxu0 %vm2219_vm4, %v2121_v12  ;;  %2767 = vmatprep.subr.msk.mxu1 %vm2219_vm4, %v2121_v12 }
 0x10c   : > { %v854_v4 = vpop.permute.xlu0 %853  ;;  %919 = vst.msk [vmem:[#allocation3 + $0xc8] sm:$0xff] %vm893_vm3, %v848_v3 }
 0x10d   : > { %922 = vst.msk [vmem:[#allocation3 + $0xe0] sm:$0xff] %vm893_vm3, %v854_v4  ;;  %1988 = vrot.lane.b32.xlu1 %v3276_v8, %s2804_s11  ;;  %2708 = vmatpush3.msk.msra.mxu0 %vm2219_vm4, %v2121_v12 }
 0x10e   : > { %1380 = vrot.lane.b32.xlu0 %v3239_v21, %s2801_s8  ;;  %2770 = vmatpush3.msk.msra.mxu1 %vm2219_vm4, %v2121_v12 }
 0x10f   : > { %v852_v52 = vpop.permute.xlu1 %851 }
 0x110   : > { %v858_v7 = vpop.permute.xlu0 %857  ;;  %921 = vst.msk [vmem:[#allocation3 + $0xd8] sm:$0xff] %vm893_vm3, %v852_v52 }
 0x111   : > { %924 = vst.msk [vmem:[#allocation3 + $0xf0] sm:$0xff] %vm893_vm3, %v858_v7  ;;  %1221 = vrot.lane.b32.xlu1 %v3190_v54, %s2800_s7 }
 0x112   : > { %1958 = vrot.lane.b32.xlu0 %v3252_v24, %s2804_s11 }
 0x113   : > { %v856_v21 = vpop.permute.xlu1 %855 }
 0x114   : > { %v991_v16 = vpop.permute.xlu0 %990  ;;  %923 = vst.msk [vmem:[#allocation3 + $0xe8] sm:$0xff] %vm893_vm3, %v856_v21 }
 0x115   : > { %1087 = vst.msk [vmem:[#allocation3] sm:$0xff] %vm1086_vm5, %v991_v16  ;;  %1412 = vrot.lane.b32.xlu1 %v3276_v8, %s2801_s8 }
 0x116   : > { %1382 = vrot.lane.b32.xlu0 %v3252_v24, %s2801_s8  ;;  %v1701_v24 = vld [vmem:[#allocation2 + $0x49] sm:$0xff] }
 0x117   : > { %v860_v54 = vpop.permute.xlu1 %859 }
 0x118   : > { %v995_v55 = vpop.permute.xlu0 %994  ;;  %925 = vst.msk [vmem:[#allocation3 + $0xf8] sm:$0xff] %vm893_vm3, %v860_v54 }
 0x119   : > { %1089 = vst.msk [vmem:[#allocation3 + $0x10] sm:$0xff] %vm1086_vm5, %v995_v55  ;;  %1990 = vrot.lane.b32.xlu1 %v3289_v11, %s2804_s11 }
 0x11a   : > { %1574 = vrot.lane.b32.xlu0 %v3084_v17, %s2802_s9 }
 0x11b   : > { %v993_v60 = vpop.permute.xlu1 %992 }
 0x11c   : > { %v999_v62 = vpop.permute.xlu0 %998  ;;  %1088 = vst.msk [vmem:[#allocation3 + $0x8] sm:$0xff] %vm1086_vm5, %v993_v60 }
 0x11d   : > { %1091 = vst.msk [vmem:[#allocation3 + $0x20] sm:$0xff] %vm1086_vm5, %v999_v62  ;;  %1414 = vrot.lane.b32.xlu1 %v3289_v11, %s2801_s8 }
 0x11e   : > { %1576 = vrot.lane.b32.xlu0 %v3086_v20, %s2802_s9  ;;  %v1702_v20 = vld [vmem:[#allocation2 + $0x51] sm:$0xff] }
 0x11f   : > { %v997_v8 = vpop.permute.xlu1 %996 }
 0x120   : > { %v1003_v30 = vpop.permute.xlu0 %1002  ;;  %1090 = vst.msk [vmem:[#allocation3 + $0x18] sm:$0xff] %vm1086_vm5, %v997_v8 }
 0x121   : > { %1093 = vst.msk [vmem:[#allocation3 + $0x30] sm:$0xff] %vm1086_vm5, %v1003_v30  ;;  %1606 = vrot.lane.b32.xlu1 %v3157_v42, %s2802_s9  ;;  %v1914_v30 = vld [vmem:[#allocation2 + $0x13a] sm:$0xff] }
 0x122   : > { %1767 = vrot.lane.b32.xlu0 %v1701_v24, %s2803_s10 }
 0x123   : > { %v1001_v17 = vpop.permute.xlu1 %1000 }
 0x124   : > { %v1007_v63 = vpop.permute.xlu0 %1006  ;;  %1092 = vst.msk [vmem:[#allocation3 + $0x28] sm:$0xff] %vm1086_vm5, %v1001_v17 }
 0x125   : > { %1095 = vst.msk [vmem:[#allocation3 + $0x40] sm:$0xff] %vm1086_vm5, %v1007_v63  ;;  %1608 = vrot.lane.b32.xlu1 %v3159_v43, %s2802_s9 }
 0x126   : > { %1191 = vrot.lane.b32.xlu0 %v1701_v24, %s2800_s7 }
 0x127   : > { %v1005_v11 = vpop.permute.xlu1 %1004 }
 0x128   : > { %v1011_v33 = vpop.permute.xlu0 %1010  ;;  %1094 = vst.msk [vmem:[#allocation3 + $0x38] sm:$0xff] %vm1086_vm5, %v1005_v11 }
 0x129   : > { %1097 = vst.msk [vmem:[#allocation3 + $0x50] sm:$0xff] %vm1086_vm5, %v1011_v33  ;;  %1799 = vrot.lane.b32.xlu1 %v3176_v49, %s2803_s10 }
 0x12a   : > { %1769 = vrot.lane.b32.xlu0 %v1702_v20, %s2803_s10 }
 0x12b   : > { %v1009_v42 = vpop.permute.xlu1 %1008 }
 0x12c   : > { %v1015_v18 = vpop.permute.xlu0 %1014  ;;  %1096 = vst.msk [vmem:[#allocation3 + $0x48] sm:$0xff] %vm1086_vm5, %v1009_v42 }
 0x12d   : > { %1099 = vst.msk [vmem:[#allocation3 + $0x60] sm:$0xff] %vm1086_vm5, %v1015_v18  ;;  %1223 = vrot.lane.b32.xlu1 %v3176_v49, %s2800_s7 }
 0x12e   : > { %1960 = vrot.lane.b32.xlu0 %v3246_v23, %s2804_s11 }
 0x12f   : > { %v1013_v43 = vpop.permute.xlu1 %1012 }
 0x130   : > { %v1019_v61 = vpop.permute.xlu0 %1018  ;;  %1098 = vst.msk [vmem:[#allocation3 + $0x58] sm:$0xff] %vm1086_vm5, %v1013_v43 }
 0x131   : > { %1101 = vst.msk [vmem:[#allocation3 + $0x70] sm:$0xff] %vm1086_vm5, %v1019_v61  ;;  %1801 = vrot.lane.b32.xlu1 %v3203_v58, %s2803_s10 }
 0x132   : > { %1193 = vrot.lane.b32.xlu0 %v1702_v20, %s2800_s7  ;;  %v1899_v20 = vld [vmem:[#allocation2 + $0x82] sm:$0xff] }
 0x133   : > { %v1017_v19 = vpop.permute.xlu1 %1016 }
 0x134   : > { %v1023_v0 = vpop.permute.xlu0 %1022  ;;  %1100 = vst.msk [vmem:[#allocation3 + $0x68] sm:$0xff] %vm1086_vm5, %v1017_v19  ;;  %v1915_v19 = vld [vmem:[#allocation2 + $0x142] sm:$0xff] }
 0x135   : > { %1103 = vst.msk [vmem:[#allocation3 + $0x80] sm:$0xff] %vm1086_vm5, %v1023_v0  ;;  %1992 = vrot.lane.b32.xlu1 %v3283_v10, %s2804_s11  ;;  %v1514_v0 = vld [vmem:[#allocation2 + $0x90] sm:$0xff] }
 0x136   : > { %1384 = vrot.lane.b32.xlu0 %v3246_v23, %s2801_s8 }
 0x137   : > { %v1021_v49 = vpop.permute.xlu1 %1020 }
 0x138   : > { %v1027_v29 = vpop.permute.xlu0 %1026  ;;  %1102 = vst.msk [vmem:[#allocation3 + $0x78] sm:$0xff] %vm1086_vm5, %v1021_v49 }
 0x139   : > { %1105 = vst.msk [vmem:[#allocation3 + $0x90] sm:$0xff] %vm1086_vm5, %v1027_v29  ;;  %1225 = vrot.lane.b32.xlu1 %v3203_v58, %s2800_s7 }
 0x13a   : > { %1962 = vrot.lane.b32.xlu0 %v3260_v44, %s2804_s11 }
 0x13b   : > { %v1025_v48 = vpop.permute.xlu1 %1024 }
 0x13c   : > { %v1031_v39 = vpop.permute.xlu0 %1030  ;;  %1104 = vst.msk [vmem:[#allocation3 + $0x88] sm:$0xff] %vm1086_vm5, %v1025_v48  ;;  %v1515_v48 = vld [vmem:[#allocation2 + $0x98] sm:$0xff] }
 0x13d   : > { %1107 = vst.msk [vmem:[#allocation3 + $0xa0] sm:$0xff] %vm1086_vm5, %v1031_v39  ;;  %1416 = vrot.lane.b32.xlu1 %v3283_v10, %s2801_s8 }
 0x13e   : > { %1386 = vrot.lane.b32.xlu0 %v3260_v44, %s2801_s8  ;;  %v1703_v44 = vld [vmem:[#allocation2 + $0x61] sm:$0xff] }
 0x13f   : > { %v1029_v23 = vpop.permute.xlu1 %1028 }
 0x140   : > { %v1035_v6 = vpop.permute.xlu0 %1034  ;;  %1106 = vst.msk [vmem:[#allocation3 + $0x98] sm:$0xff] %vm1086_vm5, %v1029_v23 }
 0x141   : > { %1109 = vst.msk [vmem:[#allocation3 + $0xb0] sm:$0xff] %vm1086_vm5, %v1035_v6  ;;  %1994 = vrot.lane.b32.xlu1 %v3298_v2, %s2804_s11 }
 0x142   : > { %1578 = vrot.lane.b32.xlu0 %v3094_v25, %s2802_s9 }
 0x143   : > { %v1033_v58 = vpop.permute.xlu1 %1032 }
 0x144   : > { %v1039_v15 = vpop.permute.xlu0 %1038  ;;  %1108 = vst.msk [vmem:[#allocation3 + $0xa8] sm:$0xff] %vm1086_vm5, %v1033_v58  ;;  %v1707_v58 = vld [vmem:[#allocation2 + $0x91] sm:$0xff] }
 0x145   : > { %1111 = vst.msk [vmem:[#allocation3 + $0xc0] sm:$0xff] %vm1086_vm5, %v1039_v15  ;;  %1418 = vrot.lane.b32.xlu1 %v3298_v2, %s2801_s8  ;;  %v1704_v2 = vld [vmem:[#allocation2 + $0x69] sm:$0xff] }
 0x146   : > { %1580 = vrot.lane.b32.xlu0 %v3096_v26, %s2802_s9  ;;  %v1719_v26 = vld [vmem:[#allocation2 + $0x121] sm:$0xff] }
 0x147   : > { %v1037_v10 = vpop.permute.xlu1 %1036 }
 0x148   : > { %v1043_v9 = vpop.permute.xlu0 %1042  ;;  %1110 = vst.msk [vmem:[#allocation3 + $0xb8] sm:$0xff] %vm1086_vm5, %v1037_v10 }
 0x149   : > { %1113 = vst.msk [vmem:[#allocation3 + $0xd0] sm:$0xff] %vm1086_vm5, %v1043_v9  ;;  %1610 = vrot.lane.b32.xlu1 %v3170_v46, %s2802_s9 }
 0x14a   : > { %1771 = vrot.lane.b32.xlu0 %v1703_v44, %s2803_s10 }
 0x14b   : > { %v1041_v25 = vpop.permute.xlu1 %1040 }
 0x14c   : > { %v1047_v40 = vpop.permute.xlu0 %1046  ;;  %1112 = vst.msk [vmem:[#allocation3 + $0xc8] sm:$0xff] %vm1086_vm5, %v1041_v25  ;;  %v1723_v25 = vld [vmem:[#allocation2 + $0x151] sm:$0xff] }
 0x14d   : > { %1115 = vst.msk [vmem:[#allocation3 + $0xe0] sm:$0xff] %vm1086_vm5, %v1047_v40  ;;  %1612 = vrot.lane.b32.xlu1 %v3172_v47, %s2802_s9  ;;  %v1720_v47 = vld [vmem:[#allocation2 + $0x129] sm:$0xff]  ;;  %v1708_v40 = vld [vmem:[#allocation2 + $0x99] sm:$0xff] }
 0x14e   : > { %1195 = vrot.lane.b32.xlu0 %v1703_v44, %s2800_s7 }
 0x14f   : > { %v1045_v22 = vpop.permute.xlu1 %1044 }
 0x150   : > { %v1051_v31 = vpop.permute.xlu0 %1050  ;;  %1114 = vst.msk [vmem:[#allocation3 + $0xd8] sm:$0xff] %vm1086_vm5, %v1045_v22 }
 0x151   : > { %1117 = vst.msk [vmem:[#allocation3 + $0xf0] sm:$0xff] %vm1086_vm5, %v1051_v31  ;;  %1803 = vrot.lane.b32.xlu1 %v1719_v26, %s2803_s10 }
 0x152   : > { %1773 = vrot.lane.b32.xlu0 %v1704_v2, %s2803_s10 }
 0x153   : > { %v1049_v46 = vpop.permute.xlu1 %1048 }
 0x154   : > { %v1184_v13 = vpop.permute.xlu0 %1183  ;;  %1116 = vst.msk [vmem:[#allocation3 + $0xe8] sm:$0xff] %vm1086_vm5, %v1049_v46 }
 0x155   : > { %1280 = vst.msk [vmem:[#allocation3] sm:$0xff] %vm1279_vm6, %v1184_v13  ;;  %1227 = vrot.lane.b32.xlu1 %v1719_v26, %s2800_s7 }
 0x156   : > { %1964 = vrot.lane.b32.xlu0 %v3254_v32, %s2804_s11  ;;  %v1897_v32 = vld [vmem:[#allocation2 + $0x6a] sm:$0xff] }
 0x157   : > { %v1053_v41 = vpop.permute.xlu1 %1052 }
 0x158   : > { %v1188_v35 = vpop.permute.xlu0 %1187  ;;  %1118 = vst.msk [vmem:[#allocation3 + $0xf8] sm:$0xff] %vm1086_vm5, %v1053_v41  ;;  %v1916_v41 = vld [vmem:[#allocation2 + $0x152] sm:$0xff] }
 0x159   : > { %1282 = vst.msk [vmem:[#allocation3 + $0x10] sm:$0xff] %vm1279_vm6, %v1188_v35  ;;  %1805 = vrot.lane.b32.xlu1 %v1720_v47, %s2803_s10 }
 0x15a   : > { %1197 = vrot.lane.b32.xlu0 %v1704_v2, %s2800_s7 }
 0x15b   : > { %v1186_v34 = vpop.permute.xlu1 %1185 }
 0x15c   : > { %v1218_v37 = vpop.permute.xlu0 %1217  ;;  %1281 = vst.msk [vmem:[#allocation3 + $0x8] sm:$0xff] %vm1279_vm6, %v1186_v34  ;;  %v1901_v34 = vld [vmem:[#allocation2 + $0x9a] sm:$0xff] }
 0x15d   : > { %1297 = vst.msk [vmem:[#allocation3 + $0x88] sm:$0xff] %vm1279_vm6, %v1218_v37  ;;  %1996 = vrot.lane.b32.xlu1 %v3291_v1, %s2804_s11 }
 0x15e   : > { %1388 = vrot.lane.b32.xlu0 %v1318_v14, %s2801_s8 }
 0x15f   : > { %v1216_v36 = vpop.permute.xlu1 %1215 }
 0x160   : > { %v1409_v51 = vpop.permute.xlu0 %1408  ;;  %1296 = vst.msk [vmem:[#allocation3 + $0x80] sm:$0xff] %vm1279_vm6, %v1216_v36 }
 0x161   : > { %1229 = vrot.lane.b32.xlu1 %v1720_v47, %s2800_s7  ;;  %1489 = vst.msk [vmem:[#allocation3 + $0x80] sm:$0xff] %vm1472_vm7, %v1409_v51 }
 0x162   : > { %1966 = vrot.lane.b32.xlu0 %v1897_v32, %s2804_s11 }
 0x163   : > { %v1377_v45 = vpop.permute.xlu1 %1376 }
 0x164   : > { %v1411_v38 = vpop.permute.xlu0 %1410  ;;  %1473 = vst.msk [vmem:[#allocation3] sm:$0xff] %vm1472_vm7, %v1377_v45 }
 0x165   : > { %1490 = vst.msk [vmem:[#allocation3 + $0x88] sm:$0xff] %vm1472_vm7, %v1411_v38  ;;  %1420 = vrot.lane.b32.xlu1 %v3291_v1, %s2801_s8  ;;  %v1705_v1 = vld [vmem:[#allocation2 + $0x79] sm:$0xff] }
 0x166   : > { %1390 = vrot.lane.b32.xlu0 %v1897_v32, %s2801_s8 }
 0x167   : > { %v1379_v3 = vpop.permute.xlu1 %1378 }
 0x168   : > { %v1603_v4 = vpop.permute.xlu0 %1602  ;;  %1474 = vst.msk [vmem:[#allocation3 + $0x8] sm:$0xff] %vm1472_vm7, %v1379_v3  ;;  %v1917_v3 = vld [vmem:[#allocation2 + $0x15a] sm:$0xff] }
 0x169   : > { %1683 = vst.msk [vmem:[#allocation3 + $0x80] sm:$0xff] %vm1666_vm8, %v1603_v4  ;;  %1998 = vrot.lane.b32.xlu1 %v3304_v59, %s2804_s11  ;;  %v1516_v4 = vld [vmem:[#allocation2 + $0xa8] sm:$0xff] }
 0x16a   : > { %1582 = vrot.lane.b32.xlu0 %v3098_v27, %s2802_s9 }
 0x16b   : > { %v1571_v5 = vpop.permute.xlu1 %1570 }
 0x16c   : > { %v1605_v52 = vpop.permute.xlu0 %1604  ;;  %1667 = vst.msk [vmem:[#allocation3] sm:$0xff] %vm1666_vm8, %v1571_v5 }
 0x16d   : > { %1684 = vst.msk [vmem:[#allocation3 + $0x88] sm:$0xff] %vm1666_vm8, %v1605_v52  ;;  %1422 = vrot.lane.b32.xlu1 %v3304_v59, %s2801_s8  ;;  %v1706_v59 = vld [vmem:[#allocation2 + $0x81] sm:$0xff] }
 0x16e   : > { %1584 = vrot.lane.b32.xlu0 %v3106_v28, %s2802_s9  ;;  %v1721_v28 = vld [vmem:[#allocation2 + $0x139] sm:$0xff] }
 0x16f   : > { %v1573_v7 = vpop.permute.xlu1 %1572 }
 0x170   : > { %v1796_v12 = vpop.permute.xlu0 %1795  ;;  %1668 = vst.msk [vmem:[#allocation3 + $0x8] sm:$0xff] %vm1666_vm8, %v1573_v7 }
 0x171   : > { %1876 = vst.msk [vmem:[#allocation3 + $0x80] sm:$0xff] %vm1859_vm9, %v1796_v12  ;;  %1614 = vrot.lane.b32.xlu1 %v3186_v50, %s2802_s9  ;;  %v1898_v50 = vld [vmem:[#allocation2 + $0x7a] sm:$0xff] }
 0x172   : > { %1775 = vrot.lane.b32.xlu0 %v1705_v1, %s2803_s10 }
 0x173   : > { %v1764_v27 = vpop.permute.xlu1 %1763 }
 0x174   : > { %v1766_v21 = vpop.permute.xlu0 %1765  ;;  %1860 = vst.msk [vmem:[#allocation3] sm:$0xff] %vm1859_vm9, %v1764_v27 }
 0x175   : > { %1861 = vst.msk [vmem:[#allocation3 + $0x8] sm:$0xff] %vm1859_vm9, %v1766_v21  ;;  %1616 = vrot.lane.b32.xlu1 %v3188_v53, %s2802_s9  ;;  %v1722_v53 = vld [vmem:[#allocation2 + $0x141] sm:$0xff] }
 0x176   : > { %1199 = vrot.lane.b32.xlu0 %v1705_v1, %s2800_s7  ;;  %v1517_v1 = vld [vmem:[#allocation2 + $0xb0] sm:$0xff]  ;;  %v1532_v21 = vld [vmem:[#allocation2 + $0x168] sm:$0xff] }
 0x177   : > { %v1220_v16 = vpop.permute.xlu1 %1219 }
 0x178   : > { %v1957_v54 = vpop.permute.xlu0 %1956  ;;  %1298 = vst.msk [vmem:[#allocation3 + $0x90] sm:$0xff] %vm1279_vm6, %v1220_v16 }
 0x179   : > { %2053 = vst.msk [vmem:[#allocation3] sm:$0xff] %vm2052_vm10, %v1957_v54  ;;  %1807 = vrot.lane.b32.xlu1 %v1721_v28, %s2803_s10  ;;  %v1533_v54 = vld [vmem:[#allocation2 + $0x170] sm:$0xff] }
 0x17a   : > { %1777 = vrot.lane.b32.xlu0 %v1706_v59, %s2803_s10 }
 0x17b   : > { %v1798_v55 = vpop.permute.xlu1 %1797 }
 0x17c   : > { %v1190_v60 = vpop.permute.xlu0 %1189  ;;  %1877 = vst.msk [vmem:[#allocation3 + $0x88] sm:$0xff] %vm1859_vm9, %v1798_v55 }
 0x17d   : > { %1283 = vst.msk [vmem:[#allocation3 + $0x18] sm:$0xff] %vm1279_vm6, %v1190_v60  ;;  %1231 = vrot.lane.b32.xlu1 %v1721_v28, %s2800_s7  ;;  %v1709_v28 = vld [vmem:[#allocation2 + $0xa9] sm:$0xff] }
 0x17e   : > { %1968 = vrot.lane.b32.xlu0 %v1898_v50, %s2804_s11  ;;  %v1725_v60 = vld [vmem:[#allocation2 + $0x169] sm:$0xff] }
 0x17f   : > { %v1989_v62 = vpop.permute.xlu1 %1988 }
 0x180   : > { %v1381_v24 = vpop.permute.xlu0 %1380  ;;  %v2085_v8 = vld [vmem:[#allocation3] sm:$0xff]  ;;  %2069 = vst.msk [vmem:[#allocation3 + $0x80] sm:$0xff] %vm2052_vm10, %v1989_v62 }
 0x181   : > { %1475 = vst.msk [vmem:[#allocation3 + $0x10] sm:$0xff] %vm1472_vm7, %v1381_v24  ;;  %2709 = vmatprep.mubr.msk.f32.mxu0 %vm2122_vm11, %v2085_v8  ;;  %1809 = vrot.lane.b32.xlu1 %v1722_v53, %s2803_s10  ;;  %v1902_v8 = vld [vmem:[#allocation2 + $0xaa] sm:$0xff] }
 0x182   : > { %1201 = vrot.lane.b32.xlu0 %v1706_v59, %s2800_s7 }
 0x183   : > { %v1222_v17 = vpop.permute.xlu1 %1221 }
 0x184   : > { %v1959_v63 = vpop.permute.xlu0 %1958  ;;  %1299 = vst.msk [vmem:[#allocation3 + $0x98] sm:$0xff] %vm1279_vm6, %v1222_v17 }
 0x185   : > { %2054 = vst.msk [vmem:[#allocation3 + $0x8] sm:$0xff] %vm2052_vm10, %v1959_v63  ;;  %2000 = vrot.lane.b32.xlu1 %v1914_v30, %s2804_s11  ;;  %v1726_v63 = vld [vmem:[#allocation2 + $0x171] sm:$0xff] }
 0x186   : > { %1392 = vrot.lane.b32.xlu0 %v1898_v50, %s2801_s8 }
 0x187   : > { %v1413_v11 = vpop.permute.xlu1 %1412  ;;  %v2101_v33 = vld [vmem:[#allocation3 + $0x80] sm:$0xff] }
 0x188   : > { %v1383_v42 = vpop.permute.xlu0 %1382  ;;  %1491 = vst.msk [vmem:[#allocation3 + $0x90] sm:$0xff] %vm1472_vm7, %v1413_v11  ;;  %2733 = vmatprep.mubr.msk.f32.mxu1 %vm2122_vm11, %v2101_v33 }
 0x189   : > { %1476 = vst.msk [vmem:[#allocation3 + $0x18] sm:$0xff] %vm1472_vm7, %v1383_v42  ;;  %1233 = vrot.lane.b32.xlu1 %v1722_v53, %s2800_s7  ;;  %v1710_v53 = vld [vmem:[#allocation2 + $0xb1] sm:$0xff] }
 0x18a   : > { %1970 = vrot.lane.b32.xlu0 %v1899_v20, %s2804_s11  ;;  %v1918_v42 = vld [vmem:[#allocation2 + $0x16a] sm:$0xff] }
 0x18b   : > { %v1991_v18 = vpop.permute.xlu1 %1990 }
 0x18c   : > { %v1575_v43 = vpop.permute.xlu0 %1574  ;;  %v2086_v61 = vld [vmem:[#allocation3 + $0x8] sm:$0xff]  ;;  %2070 = vst.msk [vmem:[#allocation3 + $0x88] sm:$0xff] %vm2052_vm10, %v1991_v18 }
 0x18d   : > { %1669 = vst.msk [vmem:[#allocation3 + $0x10] sm:$0xff] %vm1666_vm8, %v1575_v43  ;;  %2710 = vmatmul.mubr.msk.f32.vlgmr.msra.gmra.mrb[0].mxu0 %vm2122_vm11, %v2086_v61  ;;  %1424 = vrot.lane.b32.xlu1 %v1914_v30, %s2801_s8  ;;  %v1903_v61 = vld [vmem:[#allocation2 + $0xb2] sm:$0xff] }
 0x18e   : > { %1394 = vrot.lane.b32.xlu0 %v1899_v20, %s2801_s8 }
 0x18f   : > { %v1415_v49 = vpop.permute.xlu1 %1414 }
 0x190   : > { %v1577_v29 = vpop.permute.xlu0 %1576  ;;  %1492 = vst.msk [vmem:[#allocation3 + $0x98] sm:$0xff] %vm1472_vm7, %v1415_v49 }
 0x191   : > { %1670 = vst.msk [vmem:[#allocation3 + $0x18] sm:$0xff] %vm1666_vm8, %v1577_v29  ;;  %2002 = vrot.lane.b32.xlu1 %v1915_v19, %s2804_s11 }
 0x192   : > { %1586 = vrot.lane.b32.xlu0 %v1514_v0, %s2802_s9 }
 0x193   : > { %v1607_v39 = vpop.permute.xlu1 %1606  ;;  %v2102_v23 = vld [vmem:[#allocation3 + $0x88] sm:$0xff] }
 0x194   : > { %v1768_v6 = vpop.permute.xlu0 %1767  ;;  %1685 = vst.msk [vmem:[#allocation3 + $0x90] sm:$0xff] %vm1666_vm8, %v1607_v39  ;;  %2734 = vmatmul.mubr.msk.f32.vlgmr.msra.gmra.mrb[0].mxu1 %vm2122_vm11, %v2102_v23  ;;  %v1919_v23 = vld [vmem:[#allocation2 + $0x172] sm:$0xff] }
 0x195   : > { %1862 = vst.msk [vmem:[#allocation3 + $0x10] sm:$0xff] %vm1859_vm9, %v1768_v6  ;;  %1426 = vrot.lane.b32.xlu1 %v1915_v19, %s2801_s8  ;;  %v1518_v6 = vld [vmem:[#allocation2 + $0xc0] sm:$0xff] }
 0x196   : > { %1588 = vrot.lane.b32.xlu0 %v1515_v48, %s2802_s9 }
 0x197   : > { %v1609_v15 = vpop.permute.xlu1 %1608 }
 0x198   : > { %v1192_v44 = vpop.permute.xlu0 %1191  ;;  %1686 = vst.msk [vmem:[#allocation3 + $0x98] sm:$0xff] %vm1666_vm8, %v1609_v15 }
 0x199   : > { %1284 = vst.msk [vmem:[#allocation3 + $0x20] sm:$0xff] %vm1279_vm6, %v1192_v44  ;;  %1618 = vrot.lane.b32.xlu1 %v3199_v56, %s2802_s9  ;;  %v1900_v56 = vld [vmem:[#allocation2 + $0x92] sm:$0xff]  ;;  %v1519_v44 = vld [vmem:[#allocation2 + $0xc8] sm:$0xff] }
 0x19a   : > { %1779 = vrot.lane.b32.xlu0 %v1707_v58, %s2803_s10 }
 0x19b   : > { %v1800_v10 = vpop.permute.xlu1 %1799 }
 0x19c   : > { %v1770_v9 = vpop.permute.xlu0 %1769  ;;  %1878 = vst.msk [vmem:[#allocation3 + $0x90] sm:$0xff] %vm1859_vm9, %v1800_v10 }
 0x19d   : > { %1863 = vst.msk [vmem:[#allocation3 + $0x18] sm:$0xff] %vm1859_vm9, %v1770_v9  ;;  %1620 = vrot.lane.b32.xlu1 %v3201_v57, %s2802_s9  ;;  %v1724_v57 = vld [vmem:[#allocation2 + $0x159] sm:$0xff] }
 0x19e   : > { %1203 = vrot.lane.b32.xlu0 %v1707_v58, %s2800_s7 }
 0x19f   : > { %v1224_v26 = vpop.permute.xlu1 %1223 }
 0x1a0   : > { %v1961_v2 = vpop.permute.xlu0 %1960  ;;  %1300 = vst.msk [vmem:[#allocation3 + $0xa0] sm:$0xff] %vm1279_vm6, %v1224_v26  ;;  %v1711_v26 = vld [vmem:[#allocation2 + $0xc1] sm:$0xff] }
 0x1a1   : > { %2055 = vst.msk [vmem:[#allocation3 + $0x10] sm:$0xff] %vm2052_vm10, %v1961_v2  ;;  %1811 = vrot.lane.b32.xlu1 %v1723_v25, %s2803_s10 }
 0x1a2   : > { %1781 = vrot.lane.b32.xlu0 %v1708_v40, %s2803_s10 }
 0x1a3   : > { %v1802_v22 = vpop.permute.xlu1 %1801 }
 0x1a4   : > { %v1194_v31 = vpop.permute.xlu0 %1193  ;;  %1879 = vst.msk [vmem:[#allocation3 + $0x98] sm:$0xff] %vm1859_vm9, %v1802_v22  ;;  %v1535_v22 = vld [vmem:[#allocation2 + $0x188] sm:$0xff] }
 0x1a5   : > { %1285 = vst.msk [vmem:[#allocation3 + $0x28] sm:$0xff] %vm1279_vm6, %v1194_v31  ;;  %1235 = vrot.lane.b32.xlu1 %v1723_v25, %s2800_s7 }
 0x1a6   : > { %1972 = vrot.lane.b32.xlu0 %v1900_v56, %s2804_s11 }
 0x1a7   : > { %v1993_v46 = vpop.permute.xlu1 %1992 }
 0x1a8   : > { %v1385_v13 = vpop.permute.xlu0 %1384  ;;  %v2087_v47 = vld [vmem:[#allocation3 + $0x10] sm:$0xff]  ;;  %2071 = vst.msk [vmem:[#allocation3 + $0x90] sm:$0xff] %vm2052_vm10, %v1993_v46 }
 0x1a9   : > { %1477 = vst.msk [vmem:[#allocation3 + $0x20] sm:$0xff] %vm1472_vm7, %v1385_v13  ;;  %2712 = vmatprep.mubr.msk.f32.mxu0 %vm2122_vm11, %v2087_v47  ;;  %1813 = vrot.lane.b32.xlu1 %v1724_v57, %s2803_s10  ;;  %v1727_v46 = vld [vmem:[#allocation2 + $0x181] sm:$0xff]  ;;  %v1712_v13 = vld [vmem:[#allocation2 + $0xc9] sm:$0xff] }
 0x1aa   : > { %1205 = vrot.lane.b32.xlu0 %v1708_v40, %s2800_s7  ;;  %v1534_v40 = vld [vmem:[#allocation2 + $0x180] sm:$0xff] }
 0x1ab   : > { %v1226_v35 = vpop.permute.xlu1 %1225 }
 0x1ac   : > { %v1963_v14 = vpop.permute.xlu0 %1962  ;;  %1301 = vst.msk [vmem:[#allocation3 + $0xa8] sm:$0xff] %vm1279_vm6, %v1226_v35  ;;  %v1904_v35 = vld [vmem:[#allocation2 + $0xc2] sm:$0xff] }
 0x1ad   : > { %2056 = vst.msk [vmem:[#allocation3 + $0x18] sm:$0xff] %vm2052_vm10, %v1963_v14  ;;  %2004 = vrot.lane.b32.xlu1 %v1916_v41, %s2804_s11 }
 0x1ae   : > { %1396 = vrot.lane.b32.xlu0 %v1900_v56, %s2801_s8 }
 0x1af   : > { %v1417_v37 = vpop.permute.xlu1 %1416  ;;  %v2103_v32 = vld [vmem:[#allocation3 + $0x90] sm:$0xff] }
 0x1b0   : > { %v1387_v36 = vpop.permute.xlu0 %1386  ;;  %1493 = vst.msk [vmem:[#allocation3 + $0xa0] sm:$0xff] %vm1472_vm7, %v1417_v37  ;;  %2736 = vmatprep.mubr.msk.f32.mxu1 %vm2122_vm11, %v2103_v32  ;;  %v1728_v37 = vld [vmem:[#allocation2 + $0x189] sm:$0xff] }
 0x1b1   : > { %1478 = vst.msk [vmem:[#allocation3 + $0x28] sm:$0xff] %vm1472_vm7, %v1387_v36  ;;  %1237 = vrot.lane.b32.xlu1 %v1724_v57, %s2800_s7 }
 0x1b2   : > { %1974 = vrot.lane.b32.xlu0 %v1901_v34, %s2804_s11 }
 0x1b3   : > { %v1995_v51 = vpop.permute.xlu1 %1994 }
 0x1b4   : > { %v1579_v45 = vpop.permute.xlu0 %1578  ;;  %v2088_v38 = vld [vmem:[#allocation3 + $0x18] sm:$0xff]  ;;  %2072 = vst.msk [vmem:[#allocation3 + $0x98] sm:$0xff] %vm2052_vm10, %v1995_v51 }
 0x1b5   : > { %1671 = vst.msk [vmem:[#allocation3 + $0x20] sm:$0xff] %vm1666_vm8, %v1579_v45  ;;  %2713 = vmatmul.mubr.msk.f32.gmra.mrb[2].mxu0 %vm2122_vm11, %v2088_v38  ;;  %1428 = vrot.lane.b32.xlu1 %v1916_v41, %s2801_s8  ;;  %v1920_v45 = vld [vmem:[#allocation2 + $0x182] sm:$0xff] }
 0x1b6   : > { %1398 = vrot.lane.b32.xlu0 %v1901_v34, %s2801_s8 }
 0x1b7   : > { %v1419_v5 = vpop.permute.xlu1 %1418 }
 0x1b8   : > { %v1581_v52 = vpop.permute.xlu0 %1580  ;;  %1494 = vst.msk [vmem:[#allocation3 + $0xa8] sm:$0xff] %vm1472_vm7, %v1419_v5 }
 0x1b9   : > { %1672 = vst.msk [vmem:[#allocation3 + $0x28] sm:$0xff] %vm1666_vm8, %v1581_v52  ;;  %2006 = vrot.lane.b32.xlu1 %v1917_v3, %s2804_s11 }
 0x1ba   : > { %1590 = vrot.lane.b32.xlu0 %v1516_v4, %s2802_s9  ;;  %v1905_v4 = vld [vmem:[#allocation2 + $0xca] sm:$0xff] }
 0x1bb   : > { %v1611_v7 = vpop.permute.xlu1 %1610  ;;  %v2104_v12 = vld [vmem:[#allocation3 + $0x98] sm:$0xff] }
 0x1bc   : > { %v1772_v27 = vpop.permute.xlu0 %1771  ;;  %1687 = vst.msk [vmem:[#allocation3 + $0xa0] sm:$0xff] %vm1666_vm8, %v1611_v7  ;;  %2737 = vmatmul.mubr.msk.f32.gmra.mrb[2].mxu1 %vm2122_vm11, %v2104_v12 }
 0x1bd   : > { %1864 = vst.msk [vmem:[#allocation3 + $0x20] sm:$0xff] %vm1859_vm9, %v1772_v27  ;;  %1430 = vrot.lane.b32.xlu1 %v1917_v3, %s2801_s8 }
 0x1be   : > { %1592 = vrot.lane.b32.xlu0 %v1517_v1, %s2802_s9 }
 0x1bf   : > { %v1613_v59 = vpop.permute.xlu1 %1612 }
 0x1c0   : > { %v1196_v16 = vpop.permute.xlu0 %1195  ;;  %1688 = vst.msk [vmem:[#allocation3 + $0xa8] sm:$0xff] %vm1666_vm8, %v1613_v59 }
 0x1c1   : > { %1286 = vst.msk [vmem:[#allocation3 + $0x30] sm:$0xff] %vm1279_vm6, %v1196_v16  ;;  %1622 = vrot.lane.b32.xlu1 %v1532_v21, %s2802_s9  ;;  %v1921_v21 = vld [vmem:[#allocation2 + $0x18a] sm:$0xff] }
 0x1c2   : > { %1783 = vrot.lane.b32.xlu0 %v1709_v28, %s2803_s10 }
 0x1c3   : > { %v1804_v50 = vpop.permute.xlu1 %1803 }
 0x1c4   : > { %v1774_v55 = vpop.permute.xlu0 %1773  ;;  %1880 = vst.msk [vmem:[#allocation3 + $0xa0] sm:$0xff] %vm1859_vm9, %v1804_v50 }
 0x1c5   : > { %1865 = vst.msk [vmem:[#allocation3 + $0x28] sm:$0xff] %vm1859_vm9, %v1774_v55  ;;  %1624 = vrot.lane.b32.xlu1 %v1533_v54, %s2802_s9  ;;  %v1521_v54 = vld [vmem:[#allocation2 + $0xe0] sm:$0xff] }
 0x1c6   : > { %1207 = vrot.lane.b32.xlu0 %v1709_v28, %s2800_s7  ;;  %v1520_v28 = vld [vmem:[#allocation2 + $0xd8] sm:$0xff] }
 0x1c7   : > { %v1228_v62 = vpop.permute.xlu1 %1227 }
 0x1c8   : > { %v1965_v24 = vpop.permute.xlu0 %1964  ;;  %1302 = vst.msk [vmem:[#allocation3 + $0xb0] sm:$0xff] %vm1279_vm6, %v1228_v62  ;;  %v1713_v62 = vld [vmem:[#allocation2 + $0xd9] sm:$0xff] }
 0x1c9   : > { %2057 = vst.msk [vmem:[#allocation3 + $0x20] sm:$0xff] %vm2052_vm10, %v1965_v24  ;;  %1815 = vrot.lane.b32.xlu1 %v1725_v60, %s2803_s10 }
 0x1ca   : > { %1785 = vrot.lane.b32.xlu0 %v1710_v53, %s2803_s10 }
 0x1cb   : > { %v1806_v30 = vpop.permute.xlu1 %1805 }
 0x1cc   : > { %v1198_v17 = vpop.permute.xlu0 %1197  ;;  %1881 = vst.msk [vmem:[#allocation3 + $0xa8] sm:$0xff] %vm1859_vm9, %v1806_v30  ;;  %v1537_v30 = vld [vmem:[#allocation2 + $0x1a0] sm:$0xff] }
 0x1cd   : > { %1287 = vst.msk [vmem:[#allocation3 + $0x38] sm:$0xff] %vm1279_vm6, %v1198_v17  ;;  %1239 = vrot.lane.b32.xlu1 %v1725_v60, %s2800_s7  ;;  %v1714_v17 = vld [vmem:[#allocation2 + $0xe1] sm:$0xff] }
 0x1ce   : > { %1976 = vrot.lane.b32.xlu0 %v1902_v8, %s2804_s11 }
 0x1cf   : > { %v1997_v20 = vpop.permute.xlu1 %1996 }
 0x1d0   : > { %v1389_v11 = vpop.permute.xlu0 %1388  ;;  %v2089_v33 = vld [vmem:[#allocation3 + $0x20] sm:$0xff]  ;;  %2073 = vst.msk [vmem:[#allocation3 + $0xa0] sm:$0xff] %vm2052_vm10, %v1997_v20 }
 0x1d1   : > { %1479 = vst.msk [vmem:[#allocation3 + $0x30] sm:$0xff] %vm1472_vm7, %v1389_v11  ;;  %2715 = vmatprep.mubr.msk.f32.mxu0 %vm2122_vm11, %v2089_v33  ;;  %1817 = vrot.lane.b32.xlu1 %v1726_v63, %s2803_s10  ;;  %v1729_v11 = vld [vmem:[#allocation2 + $0x199] sm:$0xff] }
 0x1d2   : > { %1209 = vrot.lane.b32.xlu0 %v1710_v53, %s2800_s7  ;;  %v1536_v53 = vld [vmem:[#allocation2 + $0x198] sm:$0xff] }
 0x1d3   : > { %v1230_v18 = vpop.permute.xlu1 %1229  ;;  %v1906_v33 = vld [vmem:[#allocation2 + $0xda] sm:$0xff] }
 0x1d4   : > { %v1967_v43 = vpop.permute.xlu0 %1966  ;;  %1303 = vst.msk [vmem:[#allocation3 + $0xb8] sm:$0xff] %vm1279_vm6, %v1230_v18 }
 0x1d5   : > { %2058 = vst.msk [vmem:[#allocation3 + $0x28] sm:$0xff] %vm2052_vm10, %v1967_v43  ;;  %2008 = vrot.lane.b32.xlu1 %v1918_v42, %s2804_s11  ;;  %v1730_v43 = vld [vmem:[#allocation2 + $0x1a1] sm:$0xff] }
 0x1d6   : > { %1400 = vrot.lane.b32.xlu0 %v1902_v8, %s2801_s8 }
 0x1d7   : > { %v1421_v19 = vpop.permute.xlu1 %1420  ;;  %v2105_v0 = vld [vmem:[#allocation3 + $0xa0] sm:$0xff] }
 0x1d8   : > { %v1391_v49 = vpop.permute.xlu0 %1390  ;;  %1495 = vst.msk [vmem:[#allocation3 + $0xb0] sm:$0xff] %vm1472_vm7, %v1421_v19  ;;  %2739 = vmatprep.mubr.msk.f32.mxu1 %vm2122_vm11, %v2105_v0 }
 0x1d9   : > { %1480 = vst.msk [vmem:[#allocation3 + $0x38] sm:$0xff] %vm1472_vm7, %v1391_v49  ;;  %1241 = vrot.lane.b32.xlu1 %v1726_v63, %s2800_s7  ;;  %v1922_v49 = vld [vmem:[#allocation2 + $0x19a] sm:$0xff] }
 0x1da   : > { %1978 = vrot.lane.b32.xlu0 %v1903_v61, %s2804_s11 }
 0x1db   : > { %v1999_v29 = vpop.permute.xlu1 %1998 }
 0x1dc   : > { %v1583_v48 = vpop.permute.xlu0 %1582  ;;  %v2090_v39 = vld [vmem:[#allocation3 + $0x28] sm:$0xff]  ;;  %2074 = vst.msk [vmem:[#allocation3 + $0xa8] sm:$0xff] %vm2052_vm10, %v1999_v29 }
 0x1dd   : > { %1673 = vst.msk [vmem:[#allocation3 + $0x30] sm:$0xff] %vm1666_vm8, %v1583_v48  ;;  %2716 = vmatmul.mubr.msk.f32.gmra.mrb[4].mxu0 %vm2122_vm11, %v2090_v39  ;;  %1432 = vrot.lane.b32.xlu1 %v1918_v42, %s2801_s8 }
 0x1de   : > { %1402 = vrot.lane.b32.xlu0 %v1903_v61, %s2801_s8  ;;  %v1907_v61 = vld [vmem:[#allocation2 + $0xe2] sm:$0xff] }
 0x1df   : > { %v1423_v58 = vpop.permute.xlu1 %1422 }
 0x1e0   : > { %v1585_v15 = vpop.permute.xlu0 %1584  ;;  %1496 = vst.msk [vmem:[#allocation3 + $0xb8] sm:$0xff] %vm1472_vm7, %v1423_v58 }
 0x1e1   : > { %1674 = vst.msk [vmem:[#allocation3 + $0x38] sm:$0xff] %vm1666_vm8, %v1585_v15  ;;  %2010 = vrot.lane.b32.xlu1 %v1919_v23, %s2804_s11 }
 0x1e2   : > { %1594 = vrot.lane.b32.xlu0 %v1518_v6, %s2802_s9 }
 0x1e3   : > { %v1615_v10 = vpop.permute.xlu1 %1614  ;;  %v2106_v9 = vld [vmem:[#allocation3 + $0xa8] sm:$0xff] }
 0x1e4   : > { %v1776_v25 = vpop.permute.xlu0 %1775  ;;  %1689 = vst.msk [vmem:[#allocation3 + $0xb0] sm:$0xff] %vm1666_vm8, %v1615_v10  ;;  %2740 = vmatmul.mubr.msk.f32.gmra.mrb[4].mxu1 %vm2122_vm11, %v2106_v9 }
 0x1e5   : > { %1866 = vst.msk [vmem:[#allocation3 + $0x30] sm:$0xff] %vm1859_vm9, %v1776_v25  ;;  %1434 = vrot.lane.b32.xlu1 %v1919_v23, %s2801_s8  ;;  %v1923_v23 = vld [vmem:[#allocation2 + $0x1a2] sm:$0xff] }
 0x1e6   : > { %1596 = vrot.lane.b32.xlu0 %v1519_v44, %s2802_s9 }
 0x1e7   : > { %v1617_v2 = vpop.permute.xlu1 %1616 }
 0x1e8   : > { %v1200_v56 = vpop.permute.xlu0 %1199  ;;  %1690 = vst.msk [vmem:[#allocation3 + $0xb8] sm:$0xff] %vm1666_vm8, %v1617_v2 }
 0x1e9   : > { %1288 = vst.msk [vmem:[#allocation3 + $0x40] sm:$0xff] %vm1279_vm6, %v1200_v56  ;;  %1626 = vrot.lane.b32.xlu1 %v1534_v40, %s2802_s9 }
 0x1ea   : > { %1787 = vrot.lane.b32.xlu0 %v1711_v26, %s2803_s10 }
 0x1eb   : > { %v1808_v31 = vpop.permute.xlu1 %1807 }
 0x1ec   : > { %v1778_v57 = vpop.permute.xlu0 %1777  ;;  %1882 = vst.msk [vmem:[#allocation3 + $0xb0] sm:$0xff] %vm1859_vm9, %v1808_v31 }
 0x1ed   : > { %1867 = vst.msk [vmem:[#allocation3 + $0x38] sm:$0xff] %vm1859_vm9, %v1778_v57  ;;  %1628 = vrot.lane.b32.xlu1 %v1535_v22, %s2802_s9 }
 0x1ee   : > { %1211 = vrot.lane.b32.xlu0 %v1711_v26, %s2800_s7 }
 0x1ef   : > { %v1232_v47 = vpop.permute.xlu1 %1231 }
 0x1f0   : > { %v1969_v41 = vpop.permute.xlu0 %1968  ;;  %1304 = vst.msk [vmem:[#allocation3 + $0xc0] sm:$0xff] %vm1279_vm6, %v1232_v47 }
 0x1f1   : > { %2059 = vst.msk [vmem:[#allocation3 + $0x30] sm:$0xff] %vm2052_vm10, %v1969_v41  ;;  %1819 = vrot.lane.b32.xlu1 %v1727_v46, %s2803_s10 }
 0x1f2   : > { %1789 = vrot.lane.b32.xlu0 %v1712_v13, %s2803_s10 }
 0x1f3   : > { %v1810_v14 = vpop.permute.xlu1 %1809 }
 0x1f4   : > { %v1202_v34 = vpop.permute.xlu0 %1201  ;;  %1883 = vst.msk [vmem:[#allocation3 + $0xb8] sm:$0xff] %vm1859_vm9, %v1810_v14 }
 0x1f5   : > { %1289 = vst.msk [vmem:[#allocation3 + $0x48] sm:$0xff] %vm1279_vm6, %v1202_v34  ;;  %1243 = vrot.lane.b32.xlu1 %v1727_v46, %s2800_s7 }
 0x1f6   : > { %1980 = vrot.lane.b32.xlu0 %v1904_v35, %s2804_s11 }
 0x1f7   : > { %v2001_v32 = vpop.permute.xlu1 %2000 }
 0x1f8   : > { %v1393_v36 = vpop.permute.xlu0 %1392  ;;  %v2091_v51 = vld [vmem:[#allocation3 + $0x30] sm:$0xff]  ;;  %2075 = vst.msk [vmem:[#allocation3 + $0xb0] sm:$0xff] %vm2052_vm10, %v2001_v32 }
 0x1f9   : > { %1481 = vst.msk [vmem:[#allocation3 + $0x40] sm:$0xff] %vm1472_vm7, %v1393_v36  ;;  %2718 = vmatprep.mubr.msk.f32.mxu0 %vm2122_vm11, %v2091_v51  ;;  %1821 = vrot.lane.b32.xlu1 %v1728_v37, %s2803_s10 }
 0x1fa   : > { %1213 = vrot.lane.b32.xlu0 %v1712_v13, %s2800_s7 }
 0x1fb   : > { %v1234_v38 = vpop.permute.xlu1 %1233 }
 0x1fc   : > { %v1971_v3 = vpop.permute.xlu0 %1970  ;;  %1305 = vst.msk [vmem:[#allocation3 + $0xc8] sm:$0xff] %vm1279_vm6, %v1234_v38 }
 0x1fd   : > { %2060 = vst.msk [vmem:[#allocation3 + $0x38] sm:$0xff] %vm2052_vm10, %v1971_v3  ;;  %2012 = vrot.lane.b32.xlu1 %v1920_v45, %s2804_s11 }
 0x1fe   : > { %1404 = vrot.lane.b32.xlu0 %v1904_v35, %s2801_s8 }
 0x1ff   : > { %v1425_v5 = vpop.permute.xlu1 %1424  ;;  %v2107_v52 = vld [vmem:[#allocation3 + $0xb0] sm:$0xff] }
 0x200   : > { %v1395_v1 = vpop.permute.xlu0 %1394  ;;  %1497 = vst.msk [vmem:[#allocation3 + $0xc0] sm:$0xff] %vm1472_vm7, %v1425_v5  ;;  %2742 = vmatprep.mubr.msk.f32.mxu1 %vm2122_vm11, %v2107_v52 }
 0x201   : > { %1482 = vst.msk [vmem:[#allocation3 + $0x48] sm:$0xff] %vm1472_vm7, %v1395_v1  ;;  %1245 = vrot.lane.b32.xlu1 %v1728_v37, %s2800_s7 }
 0x202   : > { %1982 = vrot.lane.b32.xlu0 %v1905_v4, %s2804_s11 }
 0x203   : > { %v2003_v7 = vpop.permute.xlu1 %2002 }
 0x204   : > { %v1587_v12 = vpop.permute.xlu0 %1586  ;;  %v2092_v27 = vld [vmem:[#allocation3 + $0x38] sm:$0xff]  ;;  %2076 = vst.msk [vmem:[#allocation3 + $0xb8] sm:$0xff] %vm2052_vm10, %v2003_v7 }
 0x205   : > { %1675 = vst.msk [vmem:[#allocation3 + $0x40] sm:$0xff] %vm1666_vm8, %v1587_v12  ;;  %2719 = vmatmul.mubr.msk.f32.gmra.mrb[6].mxu0 %vm2122_vm11, %v2092_v27  ;;  %1436 = vrot.lane.b32.xlu1 %v1920_v45, %s2801_s8 }
 0x206   : > { %1406 = vrot.lane.b32.xlu0 %v1905_v4, %s2801_s8 }
 0x207   : > { %v1427_v59 = vpop.permute.xlu1 %1426 }
 0x208   : > { %v1589_v16 = vpop.permute.xlu0 %1588  ;;  %1498 = vst.msk [vmem:[#allocation3 + $0xc8] sm:$0xff] %vm1472_vm7, %v1427_v59  ;;  %v2449_v59 = vld [vmem:[%s3857_s26 + $0x8] sm:$0xff] }
 0x209   : > { %1676 = vst.msk [vmem:[#allocation3 + $0x48] sm:$0xff] %vm1666_vm8, %v1589_v16  ;;  %2014 = vrot.lane.b32.xlu1 %v1921_v21, %s2804_s11 }
 0x20a   : > { %1598 = vrot.lane.b32.xlu0 %v1520_v28, %s2802_s9 }
 0x20b   : > { %v1619_v50 = vpop.permute.xlu1 %1618  ;;  %v2108_v55 = vld [vmem:[#allocation3 + $0xb8] sm:$0xff] }
 0x20c   : > { %v1780_v60 = vpop.permute.xlu0 %1779  ;;  %1691 = vst.msk [vmem:[#allocation3 + $0xc0] sm:$0xff] %vm1666_vm8, %v1619_v50  ;;  %2743 = vmatmul.mubr.msk.f32.gmra.mrb[6].mxu1 %vm2122_vm11, %v2108_v55  ;;  %v2448_v50 = vld [vmem:[%s3857_s26] sm:$0xff] }
 0x20d   : > { %1868 = vst.msk [vmem:[#allocation3 + $0x40] sm:$0xff] %vm1859_vm9, %v1780_v60  ;;  %1438 = vrot.lane.b32.xlu1 %v1921_v21, %s2801_s8 }
 0x20e   : > { %1600 = vrot.lane.b32.xlu0 %v1521_v54, %s2802_s9 }
 0x20f   : > { %v1621_v24 = vpop.permute.xlu1 %1620 }
 0x210   : > { %v1204_v8 = vpop.permute.xlu0 %1203  ;;  %1692 = vst.msk [vmem:[#allocation3 + $0xc8] sm:$0xff] %vm1666_vm8, %v1621_v24 }
 0x211   : > { %1290 = vst.msk [vmem:[#allocation3 + $0x50] sm:$0xff] %vm1279_vm6, %v1204_v8  ;;  %1630 = vrot.lane.b32.xlu1 %v1536_v53, %s2802_s9 }
 0x212   : > { %1791 = vrot.lane.b32.xlu0 %v1713_v62, %s2803_s10 }
 0x213   : > { %v1812_v63 = vpop.permute.xlu1 %1811 }
 0x214   : > { %v1782_v20 = vpop.permute.xlu0 %1781  ;;  %1884 = vst.msk [vmem:[#allocation3 + $0xc0] sm:$0xff] %vm1859_vm9, %v1812_v63 }
 0x215   : > { %1869 = vst.msk [vmem:[#allocation3 + $0x48] sm:$0xff] %vm1859_vm9, %v1782_v20  ;;  %1632 = vrot.lane.b32.xlu1 %v1537_v30, %s2802_s9  ;;  %v2465_v30 = vld [vmem:[%s3857_s26 + $0x88] sm:$0xff] }
 0x216   : > { %1793 = vrot.lane.b32.xlu0 %v1714_v17, %s2803_s10  ;;  %v2464_v17 = vld [vmem:[%s3857_s26 + $0x80] sm:$0xff] }
 0x217   : > { %v1236_v42 = vpop.permute.xlu1 %1235 }
 0x218   : > { %v1973_v18 = vpop.permute.xlu0 %1972  ;;  %1306 = vst.msk [vmem:[#allocation3 + $0xd0] sm:$0xff] %vm1279_vm6, %v1236_v42 }
 0x219   : > { %2061 = vst.msk [vmem:[#allocation3 + $0x40] sm:$0xff] %vm2052_vm10, %v1973_v18  ;;  %1823 = vrot.lane.b32.xlu1 %v1729_v11, %s2803_s10 }
 0x21a   : > { %1984 = vrot.lane.b32.xlu0 %v1906_v33, %s2804_s11 }
 0x21b   : > { %v1814_v19 = vpop.permute.xlu1 %1813 }
 0x21c   : > { %v1206_v0 = vpop.permute.xlu0 %1205  ;;  %1885 = vst.msk [vmem:[#allocation3 + $0xc8] sm:$0xff] %vm1859_vm9, %v1814_v19 }
 0x21d   : > { %1291 = vst.msk [vmem:[#allocation3 + $0x58] sm:$0xff] %vm1279_vm6, %v1206_v0  ;;  %1825 = vrot.lane.b32.xlu1 %v1730_v43, %s2803_s10 }
 0x21e   : > { %1986 = vrot.lane.b32.xlu0 %v1907_v61, %s2804_s11 }
 0x21f   : > { %v2005_v29 = vpop.permute.xlu1 %2004 }
 0x220   : > { %v1397_v48 = vpop.permute.xlu0 %1396  ;;  %v2093_v39 = vld [vmem:[#allocation3 + $0x40] sm:$0xff]  ;;  %2077 = vst.msk [vmem:[#allocation3 + $0xc0] sm:$0xff] %vm2052_vm10, %v2005_v29 }
 0x221   : > { %1483 = vst.msk [vmem:[#allocation3 + $0x50] sm:$0xff] %vm1472_vm7, %v1397_v48  ;;  %2721 = vmatprep.mubr.msk.f32.mxu0 %vm2122_vm11, %v2093_v39  ;;  %2016 = vrot.lane.b32.xlu1 %v1922_v49, %s2804_s11 }
 0x223   : > { %v1238_v6 = vpop.permute.xlu1 %1237 }
 0x224   : > { %v1975_v58 = vpop.permute.xlu0 %1974  ;;  %1307 = vst.msk [vmem:[#allocation3 + $0xd8] sm:$0xff] %vm1279_vm6, %v1238_v6 }
 0x225   : > { %2062 = vst.msk [vmem:[#allocation3 + $0x48] sm:$0xff] %vm2052_vm10, %v1975_v58  ;;  %2018 = vrot.lane.b32.xlu1 %v1923_v23, %s2804_s11 }
 0x227   : > { %v1429_v15 = vpop.permute.xlu1 %1428  ;;  %v2109_v44 = vld [vmem:[#allocation3 + $0xc0] sm:$0xff] }
 0x228   : > { %v1399_v10 = vpop.permute.xlu0 %1398  ;;  %1499 = vst.msk [vmem:[#allocation3 + $0xd0] sm:$0xff] %vm1472_vm7, %v1429_v15  ;;  %2745 = vmatprep.mubr.msk.f32.mxu1 %vm2122_vm11, %v2109_v44 }
 0x229   : > { %1484 = vst.msk [vmem:[#allocation3 + $0x58] sm:$0xff] %vm1472_vm7, %v1399_v10 }
 0x22b   : > { %v2007_v9 = vpop.permute.xlu1 %2006 }
 0x22c   : > { %v1591_v25 = vpop.permute.xlu0 %1590  ;;  %v2094_v40 = vld [vmem:[#allocation3 + $0x48] sm:$0xff]  ;;  %2078 = vst.msk [vmem:[#allocation3 + $0xc8] sm:$0xff] %vm2052_vm10, %v2007_v9 }
 0x22d   : > { %1677 = vst.msk [vmem:[#allocation3 + $0x50] sm:$0xff] %vm1666_vm8, %v1591_v25  ;;  %2722 = vmatmul.mubr.msk.f32.gmra.mrb[8].mxu0 %vm2122_vm11, %v2094_v40 }
 0x22f   : > { %v1431_v26 = vpop.permute.xlu1 %1430 }
 0x230   : > { %v1593_v2 = vpop.permute.xlu0 %1592  ;;  %1500 = vst.msk [vmem:[#allocation3 + $0xd8] sm:$0xff] %vm1472_vm7, %v1431_v26 }
 0x231   : > { %1678 = vst.msk [vmem:[#allocation3 + $0x58] sm:$0xff] %vm1666_vm8, %v1593_v2  ;;  %v2451_v2 = vld [vmem:[%s3857_s26 + $0x18] sm:$0xff] }
 0x233   : > { %v1623_v56 = vpop.permute.xlu1 %1622  ;;  %v2110_v22 = vld [vmem:[#allocation3 + $0xc8] sm:$0xff] }
 0x234   : > { %v1784_v31 = vpop.permute.xlu0 %1783  ;;  %1693 = vst.msk [vmem:[#allocation3 + $0xd0] sm:$0xff] %vm1666_vm8, %v1623_v56  ;;  %2746 = vmatmul.mubr.msk.f32.gmra.mrb[8].mxu1 %vm2122_vm11, %v2110_v22  ;;  %v2450_v56 = vld [vmem:[%s3857_s26 + $0x10] sm:$0xff] }
 0x235   : > { %1870 = vst.msk [vmem:[#allocation3 + $0x50] sm:$0xff] %vm1859_vm9, %v1784_v31 }
 0x237   : > { %v1625_v57 = vpop.permute.xlu1 %1624 }
 0x238   : > { %v1208_v46 = vpop.permute.xlu0 %1207  ;;  %1694 = vst.msk [vmem:[#allocation3 + $0xd8] sm:$0xff] %vm1666_vm8, %v1625_v57 }
 0x239   : > { %1292 = vst.msk [vmem:[#allocation3 + $0x60] sm:$0xff] %vm1279_vm6, %v1208_v46 }
 0x23b   : > { %v1816_v13 = vpop.permute.xlu1 %1815 }
 0x23c   : > { %v1786_v47 = vpop.permute.xlu0 %1785  ;;  %1886 = vst.msk [vmem:[#allocation3 + $0xd0] sm:$0xff] %vm1859_vm9, %v1816_v13 }
 0x23d   : > { %1871 = vst.msk [vmem:[#allocation3 + $0x58] sm:$0xff] %vm1859_vm9, %v1786_v47 }
 0x23f   : > { %v1240_v41 = vpop.permute.xlu1 %1239 }
 0x240   : > { %v1977_v35 = vpop.permute.xlu0 %1976  ;;  %1308 = vst.msk [vmem:[#allocation3 + $0xe0] sm:$0xff] %vm1279_vm6, %v1240_v41 }
 0x241   : > { %2063 = vst.msk [vmem:[#allocation3 + $0x50] sm:$0xff] %vm2052_vm10, %v1977_v35 }
 0x243   : > { %v1818_v14 = vpop.permute.xlu1 %1817 }
 0x244   : > { %v1210_v34 = vpop.permute.xlu0 %1209  ;;  %1887 = vst.msk [vmem:[#allocation3 + $0xd8] sm:$0xff] %vm1859_vm9, %v1818_v14  ;;  %v2467_v14 = vld [vmem:[%s3857_s26 + $0x98] sm:$0xff] }
 0x245   : > { %1293 = vst.msk [vmem:[#allocation3 + $0x68] sm:$0xff] %vm1279_vm6, %v1210_v34  ;;  %v2466_v34 = vld [vmem:[%s3857_s26 + $0x90] sm:$0xff] }
 0x247   : > { %v2009_v37 = vpop.permute.xlu1 %2008 }
 0x248   : > { %v1401_v32 = vpop.permute.xlu0 %1400  ;;  %v2095_v36 = vld [vmem:[#allocation3 + $0x50] sm:$0xff]  ;;  %2079 = vst.msk [vmem:[#allocation3 + $0xd0] sm:$0xff] %vm2052_vm10, %v2009_v37 }
 0x249   : > { %1485 = vst.msk [vmem:[#allocation3 + $0x60] sm:$0xff] %vm1472_vm7, %v1401_v32  ;;  %2724 = vmatprep.mubr.msk.f32.mxu0 %vm2122_vm11, %v2095_v36 }
 0x24b   : > { %v1242_v51 = vpop.permute.xlu1 %1241 }
 0x24c   : > { %v1979_v45 = vpop.permute.xlu0 %1978  ;;  %1309 = vst.msk [vmem:[#allocation3 + $0xe8] sm:$0xff] %vm1279_vm6, %v1242_v51 }
 0x24d   : > { %2064 = vst.msk [vmem:[#allocation3 + $0x58] sm:$0xff] %vm2052_vm10, %v1979_v45 }
 0x24f   : > { %v1433_v38 = vpop.permute.xlu1 %1432  ;;  %v2111_v3 = vld [vmem:[#allocation3 + $0xd0] sm:$0xff] }
 0x250   : > { %v1403_v4 = vpop.permute.xlu0 %1402  ;;  %1501 = vst.msk [vmem:[#allocation3 + $0xe0] sm:$0xff] %vm1472_vm7, %v1433_v38  ;;  %2748 = vmatprep.mubr.msk.f32.mxu1 %vm2122_vm11, %v2111_v3 }
 0x251   : > { %1486 = vst.msk [vmem:[#allocation3 + $0x68] sm:$0xff] %vm1472_vm7, %v1403_v4 }
 0x253   : > { %v2011_v5 = vpop.permute.xlu1 %2010 }
 0x254   : > { %v1595_v52 = vpop.permute.xlu0 %1594  ;;  %v2096_v1 = vld [vmem:[#allocation3 + $0x58] sm:$0xff]  ;;  %2080 = vst.msk [vmem:[#allocation3 + $0xd8] sm:$0xff] %vm2052_vm10, %v2011_v5 }
 0x255   : > { %1679 = vst.msk [vmem:[#allocation3 + $0x60] sm:$0xff] %vm1666_vm8, %v1595_v52  ;;  %2725 = vmatmul.mubr.msk.f32.gmra.mrb[10].mxu0 %vm2122_vm11, %v2096_v1 }
 0x257   : > { %v1435_v7 = vpop.permute.xlu1 %1434 }
 0x258   : > { %v1597_v12 = vpop.permute.xlu0 %1596  ;;  %1502 = vst.msk [vmem:[#allocation3 + $0xe8] sm:$0xff] %vm1472_vm7, %v1435_v7 }
 0x259   : > { %1680 = vst.msk [vmem:[#allocation3 + $0x68] sm:$0xff] %vm1666_vm8, %v1597_v12  ;;  %v2453_v12 = vld [vmem:[%s3857_s26 + $0x28] sm:$0xff] }
 0x25b   : > { %v1627_v27 = vpop.permute.xlu1 %1626  ;;  %v2112_v21 = vld [vmem:[#allocation3 + $0xd8] sm:$0xff] }
 0x25c   : > { %v1788_v28 = vpop.permute.xlu0 %1787  ;;  %1695 = vst.msk [vmem:[#allocation3 + $0xe0] sm:$0xff] %vm1666_vm8, %v1627_v27  ;;  %2749 = vmatmul.mubr.msk.f32.gmra.mrb[10].mxu1 %vm2122_vm11, %v2112_v21  ;;  %v2452_v27 = vld [vmem:[%s3857_s26 + $0x20] sm:$0xff] }
 0x25d   : > { %1872 = vst.msk [vmem:[#allocation3 + $0x60] sm:$0xff] %vm1859_vm9, %v1788_v28 }
 0x25f   : > { %v1629_v16 = vpop.permute.xlu1 %1628 }
 0x260   : > { %v1212_v54 = vpop.permute.xlu0 %1211  ;;  %1696 = vst.msk [vmem:[#allocation3 + $0xe8] sm:$0xff] %vm1666_vm8, %v1629_v16  ;;  %v2711_v55 = vpop.f32.mrb[0].mxu0 }
 0x261   : > { %1294 = vst.msk [vmem:[#allocation3 + $0x70] sm:$0xff] %vm1279_vm6, %v1212_v54  ;;  %v2481_v60 = vadd.f32 %v2711_v55, %v2449_v59  ;;  %v2289_v53 = vpop.f32.mrb[1].mxu0  ;;  %v2469_v54 = vld [vmem:[%s3857_s26 + $0xa8] sm:$0xff] }
 0x262   : > { %v2480_v62 = vadd.f32 %v2448_v50, %v2289_v53  ;;  %v2468_v50 = vld [vmem:[%s3857_s26 + $0xa0] sm:$0xff] }
 0x263   : > { %v1820_v24 = vpop.permute.xlu1 %1819  ;;  %2513 = vst.msk [vmem:[%s3870_s29 + $0x8] sm:$0xff] %vm387_vm0, %v2481_v60 }
 0x264   : > { %v1790_v8 = vpop.permute.xlu0 %1789  ;;  %1888 = vst.msk [vmem:[#allocation3 + $0xe0] sm:$0xff] %vm1859_vm9, %v1820_v24  ;;  %v2455_v24 = vld [vmem:[%s3857_s26 + $0x38] sm:$0xff] }
 0x265   : > { %2512 = vst.msk [vmem:[%s3870_s29] sm:$0xff] %vm387_vm0, %v2480_v62 }
 0x266   : > { %1873 = vst.msk [vmem:[#allocation3 + $0x68] sm:$0xff] %vm1859_vm9, %v1790_v8  ;;  %v2454_v8 = vld [vmem:[%s3857_s26 + $0x30] sm:$0xff] }
 0x267   : > { %v2735_v63 = vpop.f32.mrb[0].mxu1  ;;  %v1244_v20 = vpop.permute.xlu1 %1243 }
 0x268   : > { %v2497_v11 = vadd.f32 %v2735_v63, %v2465_v30  ;;  %1310 = vst.msk [vmem:[#allocation3 + $0xf0] sm:$0xff] %vm1279_vm6, %v1244_v20  ;;  %v2369_v33 = vpop.f32.mrb[1].mxu1  ;;  %v1981_v42 = vpop.permute.xlu0 %1980 }
 0x269   : > { %v2496_v18 = vadd.f32 %v2464_v17, %v2369_v33  ;;  %2065 = vst.msk [vmem:[#allocation3 + $0x60] sm:$0xff] %vm2052_vm10, %v1981_v42  ;;  %v2470_v33 = vld [vmem:[%s3857_s26 + $0xb0] sm:$0xff] }
 0x26a   : > { %2529 = vst.msk [vmem:[%s3870_s29 + $0x88] sm:$0xff] %vm387_vm0, %v2497_v11  ;;  %v2471_v11 = vld [vmem:[%s3857_s26 + $0xb8] sm:$0xff] }
 0x26b   : > { %2528 = vst.msk [vmem:[%s3870_s29 + $0x80] sm:$0xff] %vm387_vm0, %v2496_v18  ;;  %v1822_v43 = vpop.permute.xlu1 %1821 }
 0x26c   : > { %1889 = vst.msk [vmem:[#allocation3 + $0xe8] sm:$0xff] %vm1859_vm9, %v1822_v43  ;;  %v1214_v61 = vpop.permute.xlu0 %1213 }
 0x26d   : > { %1295 = vst.msk [vmem:[#allocation3 + $0x78] sm:$0xff] %vm1279_vm6, %v1214_v61 }
 0x26f   : > { %v2013_v19 = vpop.permute.xlu1 %2012 }
 0x270   : > { %2081 = vst.msk [vmem:[#allocation3 + $0xe0] sm:$0xff] %vm2052_vm10, %v2013_v19  ;;  %v1405_v0 = vpop.permute.xlu0 %1404  ;;  %v2097_v49 = vld [vmem:[#allocation3 + $0x60] sm:$0xff]  ;;  %v2457_v19 = vld [vmem:[%s3857_s26 + $0x48] sm:$0xff] }
 0x271   : > { %1487 = vst.msk [vmem:[#allocation3 + $0x70] sm:$0xff] %vm1472_vm7, %v1405_v0  ;;  %2727 = vmatprep.mubr.msk.f32.mxu0 %vm2122_vm11, %v2097_v49  ;;  %v2456_v0 = vld [vmem:[%s3857_s26 + $0x40] sm:$0xff] }
 0x273   : > { %v1246_v29 = vpop.permute.xlu1 %1245 }
 0x274   : > { %1311 = vst.msk [vmem:[#allocation3 + $0xf8] sm:$0xff] %vm1279_vm6, %v1246_v29  ;;  %v1983_v48 = vpop.permute.xlu0 %1982 }
 0x275   : > { %2066 = vst.msk [vmem:[#allocation3 + $0x68] sm:$0xff] %vm2052_vm10, %v1983_v48 }
 0x277   : > { %v1437_v39 = vpop.permute.xlu1 %1436  ;;  %v2113_v23 = vld [vmem:[#allocation3 + $0xe0] sm:$0xff] }
 0x278   : > { %1503 = vst.msk [vmem:[#allocation3 + $0xf0] sm:$0xff] %vm1472_vm7, %v1437_v39  ;;  %2751 = vmatprep.mubr.msk.f32.mxu1 %vm2122_vm11, %v2113_v23  ;;  %v1407_v6 = vpop.permute.xlu0 %1406  ;;  %v2473_v23 = vld [vmem:[%s3857_s26 + $0xc8] sm:$0xff] }
 0x279   : > { %1488 = vst.msk [vmem:[#allocation3 + $0x78] sm:$0xff] %vm1472_vm7, %v1407_v6  ;;  %v2472_v6 = vld [vmem:[%s3857_s26 + $0xc0] sm:$0xff] }
 0x27b   : > { %v2015_v58 = vpop.permute.xlu1 %2014 }
 0x27c   : > { %2082 = vst.msk [vmem:[#allocation3 + $0xe8] sm:$0xff] %vm2052_vm10, %v2015_v58  ;;  %v1599_v15 = vpop.permute.xlu0 %1598  ;;  %v2098_v44 = vld [vmem:[#allocation3 + $0x68] sm:$0xff] }
 0x27d   : > { %1681 = vst.msk [vmem:[#allocation3 + $0x70] sm:$0xff] %vm1666_vm8, %v1599_v15  ;;  %2728 = vmatmul.mubr.msk.f32.gmra.mrb[12].mxu0 %vm2122_vm11, %v2098_v44 }
 0x27f   : > { %v1439_v10 = vpop.permute.xlu1 %1438 }
 0x280   : > { %1504 = vst.msk [vmem:[#allocation3 + $0xf8] sm:$0xff] %vm1472_vm7, %v1439_v10  ;;  %v1601_v9 = vpop.permute.xlu0 %1600 }
 0x281   : > { %1682 = vst.msk [vmem:[#allocation3 + $0x78] sm:$0xff] %vm1666_vm8, %v1601_v9  ;;  %v2459_v9 = vld [vmem:[%s3857_s26 + $0x58] sm:$0xff] }
 0x283   : > { %v1631_v25 = vpop.permute.xlu1 %1630  ;;  %v2114_v40 = vld [vmem:[#allocation3 + $0xe8] sm:$0xff] }
 0x284   : > { %1697 = vst.msk [vmem:[#allocation3 + $0xf0] sm:$0xff] %vm1666_vm8, %v1631_v25  ;;  %2752 = vmatmul.mubr.msk.f32.gmra.mrb[12].mxu1 %vm2122_vm11, %v2114_v40  ;;  %v1792_v26 = vpop.permute.xlu0 %1791  ;;  %v2458_v25 = vld [vmem:[%s3857_s26 + $0x50] sm:$0xff] }
 0x285   : > { %1874 = vst.msk [vmem:[#allocation3 + $0x70] sm:$0xff] %vm1859_vm9, %v1792_v26 }
 0x287   : > { %v1633_v22 = vpop.permute.xlu1 %1632 }
 0x288   : > { %v2714_v31 = vpop.f32.mrb[2].mxu0  ;;  %1698 = vst.msk [vmem:[#allocation3 + $0xf8] sm:$0xff] %vm1666_vm8, %v1633_v22  ;;  %v1794_v57 = vpop.permute.xlu0 %1793  ;;  %v2475_v22 = vld [vmem:[%s3857_s26 + $0xd8] sm:$0xff] }
 0x289   : > { %v2483_v46 = vadd.f32 %v2714_v31, %v2451_v2  ;;  %v2299_v13 = vpop.f32.mrb[3].mxu0  ;;  %1875 = vst.msk [vmem:[#allocation3 + $0x78] sm:$0xff] %vm1859_vm9, %v1794_v57  ;;  %v2474_v31 = vld [vmem:[%s3857_s26 + $0xd0] sm:$0xff] }
 0x28a   : > { %v2482_v47 = vadd.f32 %v2450_v56, %v2299_v13 }
 0x28b   : > { %2515 = vst.msk [vmem:[%s3870_s29 + $0x18] sm:$0xff] %vm387_vm0, %v2483_v46  ;;  %v1824_v41 = vpop.permute.xlu1 %1823 }
 0x28c   : > { %2514 = vst.msk [vmem:[%s3870_s29 + $0x10] sm:$0xff] %vm387_vm0, %v2482_v47  ;;  %v1985_v35 = vpop.permute.xlu0 %1984 }
 0x28d   : > { %1890 = vst.msk [vmem:[#allocation3 + $0xf0] sm:$0xff] %vm1859_vm9, %v1824_v41  ;;  %v2461_v41 = vld [vmem:[%s3857_s26 + $0x68] sm:$0xff] }
 0x28e   : > { %2067 = vst.msk [vmem:[#allocation3 + $0x70] sm:$0xff] %vm2052_vm10, %v1985_v35  ;;  %v2460_v35 = vld [vmem:[%s3857_s26 + $0x60] sm:$0xff] }
 0x28f   : > { %v2738_v37 = vpop.f32.mrb[2].mxu1  ;;  %v1826_v32 = vpop.permute.xlu1 %1825 }
 0x290   : > { %v2499_v36 = vadd.f32 %v2738_v37, %v2467_v14  ;;  %1891 = vst.msk [vmem:[#allocation3 + $0xf8] sm:$0xff] %vm1859_vm9, %v1826_v32  ;;  %v2379_v51 = vpop.f32.mrb[3].mxu1  ;;  %v1987_v45 = vpop.permute.xlu0 %1986 }
 0x291   : > { %v2498_v38 = vadd.f32 %v2466_v34, %v2379_v51  ;;  %2068 = vst.msk [vmem:[#allocation3 + $0x78] sm:$0xff] %vm2052_vm10, %v1987_v45  ;;  %v2476_v51 = vld [vmem:[%s3857_s26 + $0xe0] sm:$0xff] }
 0x292   : > { %2531 = vst.msk [vmem:[%s3870_s29 + $0x98] sm:$0xff] %vm387_vm0, %v2499_v36  ;;  %v2477_v36 = vld [vmem:[%s3857_s26 + $0xe8] sm:$0xff] }
 0x293   : > { %2530 = vst.msk [vmem:[%s3870_s29 + $0x90] sm:$0xff] %vm387_vm0, %v2498_v38  ;;  %v2017_v3 = vpop.permute.xlu1 %2016 }
 0x294   : > { %2083 = vst.msk [vmem:[#allocation3 + $0xf0] sm:$0xff] %vm2052_vm10, %v2017_v3 }
 0x295   : > { %v2099_v4 = vld [vmem:[#allocation3 + $0x70] sm:$0xff] }
 0x296   : > { %2730 = vmatprep.mubr.msk.f32.mxu0 %vm2122_vm11, %v2099_v4 }
 0x297   : > { %v2019_v5 = vpop.permute.xlu1 %2018 }
 0x298   : > { %2084 = vst.msk [vmem:[#allocation3 + $0xf8] sm:$0xff] %vm2052_vm10, %v2019_v5  ;;  %v2100_v52 = vld [vmem:[#allocation3 + $0x78] sm:$0xff]  ;;  %v2463_v5 = vld [vmem:[%s3857_s26 + $0x78] sm:$0xff] }
 0x299   : > { %2731 = vmatmul.mubr.msk.f32.gmra.mrb[14].mxu0 %vm2122_vm11, %v2100_v52  ;;  %v2462_v52 = vld [vmem:[%s3857_s26 + $0x70] sm:$0xff] }
 0x29b   : > { %v2115_v1 = vld [vmem:[#allocation3 + $0xf0] sm:$0xff] }
 0x29c   : > { %2754 = vmatprep.mubr.msk.f32.mxu1 %vm2122_vm11, %v2115_v1 }
 0x29f   : > { %v2116_v7 = vld [vmem:[#allocation3 + $0xf8] sm:$0xff] }
 0x2a0   : > { %2755 = vmatmul.mubr.msk.f32.gmra.mrb[14].mxu1 %vm2122_vm11, %v2116_v7 }
 0x2b0   : > { %v2717_v21 = vpop.f32.mrb[4].mxu0 }
 0x2b1   : > { %v2485_v28 = vadd.f32 %v2717_v21, %v2453_v12  ;;  %v2309_v59 = vpop.f32.mrb[5].mxu0  ;;  %v2479_v21 = vld [vmem:[%s3857_s26 + $0xf8] sm:$0xff] }
 0x2b2   : > { %v2484_v16 = vadd.f32 %v2452_v27, %v2309_v59 }
 0x2b3   : > { %2517 = vst.msk [vmem:[%s3870_s29 + $0x28] sm:$0xff] %vm387_vm0, %v2485_v28  ;;  %v2478_v28 = vld [vmem:[%s3857_s26 + $0xf0] sm:$0xff] }
 0x2b4   : > { %2516 = vst.msk [vmem:[%s3870_s29 + $0x20] sm:$0xff] %vm387_vm0, %v2484_v16 }
 0x2b7   : > { %v2741_v55 = vpop.f32.mrb[4].mxu1 }
 0x2b8   : > { %v2501_v60 = vadd.f32 %v2741_v55, %v2469_v54  ;;  %v2389_v53 = vpop.f32.mrb[5].mxu1 }
 0x2b9   : > { %v2500_v62 = vadd.f32 %v2468_v50, %v2389_v53 }
 0x2ba   : > { %2533 = vst.msk [vmem:[%s3870_s29 + $0xa8] sm:$0xff] %vm387_vm0, %v2501_v60 }
 0x2bb   : > { %2532 = vst.msk [vmem:[%s3870_s29 + $0xa0] sm:$0xff] %vm387_vm0, %v2500_v62 }
 0x2d8   : > { %v2720_v30 = vpop.f32.mrb[6].mxu0 }
 0x2d9   : > { %v2487_v17 = vadd.f32 %v2720_v30, %v2455_v24  ;;  %v2319_v63 = vpop.f32.mrb[7].mxu0 }
 0x2da   : > { %v2486_v20 = vadd.f32 %v2454_v8, %v2319_v63 }
 0x2db   : > { %2519 = vst.msk [vmem:[%s3870_s29 + $0x38] sm:$0xff] %vm387_vm0, %v2487_v17 }
 0x2dc   : > { %2518 = vst.msk [vmem:[%s3870_s29 + $0x30] sm:$0xff] %vm387_vm0, %v2486_v20 }
 0x2df   : > { %v2744_v42 = vpop.f32.mrb[6].mxu1 }
 0x2e0   : > { %v2503_v18 = vadd.f32 %v2744_v42, %v2471_v11  ;;  %v2399_v43 = vpop.f32.mrb[7].mxu1 }
 0x2e1   : > { %v2502_v61 = vadd.f32 %v2470_v33, %v2399_v43 }
 0x2e2   : > { %2535 = vst.msk [vmem:[%s3870_s29 + $0xb8] sm:$0xff] %vm387_vm0, %v2503_v18 }
 0x2e3   : > { %2534 = vst.msk [vmem:[%s3870_s29 + $0xb0] sm:$0xff] %vm387_vm0, %v2502_v61 }
 0x300   : > { %v2723_v49 = vpop.f32.mrb[8].mxu0 }
 0x301   : > { %v2489_v29 = vadd.f32 %v2723_v49, %v2457_v19  ;;  %v2329_v48 = vpop.f32.mrb[9].mxu0 }
 0x302   : > { %v2488_v39 = vadd.f32 %v2456_v0, %v2329_v48 }
 0x303   : > { %2521 = vst.msk [vmem:[%s3870_s29 + $0x48] sm:$0xff] %vm387_vm0, %v2489_v29 }
 0x304   : > { %2520 = vst.msk [vmem:[%s3870_s29 + $0x40] sm:$0xff] %vm387_vm0, %v2488_v39 }
 0x307   : > { %v2747_v58 = vpop.f32.mrb[8].mxu1 }
 0x308   : > { %v2505_v15 = vadd.f32 %v2747_v58, %v2473_v23  ;;  %v2409_v44 = vpop.f32.mrb[9].mxu1 }
 0x309   : > { %v2504_v10 = vadd.f32 %v2472_v6, %v2409_v44 }
 0x30a   : > { %2537 = vst.msk [vmem:[%s3870_s29 + $0xc8] sm:$0xff] %vm387_vm0, %v2505_v15 }
 0x30b   : > { %2536 = vst.msk [vmem:[%s3870_s29 + $0xc0] sm:$0xff] %vm387_vm0, %v2504_v10 }
 0x328   : > { %v2726_v40 = vpop.f32.mrb[10].mxu0 }
 0x329   : > { %v2491_v26 = vadd.f32 %v2726_v40, %v2459_v9  ;;  %v2339_v2 = vpop.f32.mrb[11].mxu0 }
 0x32a   : > { %v2490_v56 = vadd.f32 %v2458_v25, %v2339_v2 }
 0x32b   : > { %2523 = vst.msk [vmem:[%s3870_s29 + $0x58] sm:$0xff] %vm387_vm0, %v2491_v26 }
 0x32c   : > { %2522 = vst.msk [vmem:[%s3870_s29 + $0x50] sm:$0xff] %vm387_vm0, %v2490_v56 }
 0x32f   : > { %v2750_v57 = vpop.f32.mrb[10].mxu1 }
 0x330   : > { %v2507_v46 = vadd.f32 %v2750_v57, %v2475_v22  ;;  %v2419_v13 = vpop.f32.mrb[11].mxu1 }
 0x331   : > { %v2506_v47 = vadd.f32 %v2474_v31, %v2419_v13 }
 0x332   : > { %2539 = vst.msk [vmem:[%s3870_s29 + $0xd8] sm:$0xff] %vm387_vm0, %v2507_v46 }
 0x333   : > { %2538 = vst.msk [vmem:[%s3870_s29 + $0xd0] sm:$0xff] %vm387_vm0, %v2506_v47 }
 0x350   : > { %v2729_v14 = vpop.f32.mrb[12].mxu0 }
 0x351   : > { %v2493_v34 = vadd.f32 %v2729_v14, %v2461_v41  ;;  %v2349_v37 = vpop.f32.mrb[13].mxu0 }
 0x352   : > { %v2492_v32 = vadd.f32 %v2460_v35, %v2349_v37 }
 0x353   : > { %2525 = vst.msk [vmem:[%s3870_s29 + $0x68] sm:$0xff] %vm387_vm0, %v2493_v34 }
 0x354   : > { %2524 = vst.msk [vmem:[%s3870_s29 + $0x60] sm:$0xff] %vm387_vm0, %v2492_v32 }
 0x357   : > { %v2753_v45 = vpop.f32.mrb[12].mxu1 }
 0x358   : > { %v2509_v38 = vadd.f32 %v2753_v45, %v2477_v36  ;;  %v2429_v3 = vpop.f32.mrb[13].mxu1 }
 0x359   : > { %v2508_v4 = vadd.f32 %v2476_v51, %v2429_v3 }
 0x35a   : > { %2541 = vst.msk [vmem:[%s3870_s29 + $0xe8] sm:$0xff] %vm387_vm0, %v2509_v38 }
 0x35b   : > { %2540 = vst.msk [vmem:[%s3870_s29 + $0xe0] sm:$0xff] %vm387_vm0, %v2508_v4 }
 0x36c   : > { %v2732_v1 = vpop.f32.mrb[14].mxu0 }
 0x36d   : > { %v2495_v7 = vadd.f32 %v2732_v1, %v2463_v5  ;;  %v2359_v12 = vpop.f32.mrb[15].mxu0 }
 0x36e   : > { %v2494_v27 = vadd.f32 %v2462_v52, %v2359_v12 }
 0x36f   : > { %2527 = vst.msk [vmem:[%s3870_s29 + $0x78] sm:$0xff] %vm387_vm0, %v2495_v7 }
 0x370   : > { %2526 = vst.msk [vmem:[%s3870_s29 + $0x70] sm:$0xff] %vm387_vm0, %v2494_v27 }
 0x373   : > { %v2756_v59 = vpop.f32.mrb[14].mxu1 }
 0x374   : > { %v2511_v16 = vadd.f32 %v2756_v59, %v2479_v21  ;;  %v2439_v54 = vpop.f32.mrb[15].mxu1 }
 0x375   : > { %v2510_v50 = vadd.f32 %v2478_v28, %v2439_v54 }
 0x376   : > { %2543 = vst.msk [vmem:[%s3870_s29 + $0xf8] sm:$0xff] %vm387_vm0, %v2511_v16 }
 0x377   : > { %2542 = vst.msk [vmem:[%s3870_s29 + $0xf0] sm:$0xff] %vm387_vm0, %v2510_v50 }
 0x378 PF: > { %s15_s18 = sadd.s32 1, %s2794_s18  }
 0x379   : > { %p12_p4 = scmp.ge.s32.totalorder %s15_s18, 4  }
 0x37b   :  { %14 = sbr.rel (!%p12_p4) target bundleno = 1 (0x1), region = 75 }

</bundles_post_ra>
